<compile_context>
chip_gen: v7x
topology: tpu7x:2x2x1
jax: 0.10.0
libtpu: 0.0.40
codegen_flags: <defaults>
</compile_context>

<pallas_src>
import math

import jax
import jax.numpy as jnp
from jax.experimental import pallas as pl
from jax.experimental.pallas import tpu as pltpu

N_FFT = 256
HOP = 4
WIN = 64
WIN_OFF = (N_FFT - WIN) // 2      # 96: rect window of ones centered inside the n_fft frame
N_FREQ = N_FFT // 2 + 1           # 129 onesided bins
F_PAD = 256                       # per-component (re / im) freq width, padded to 2*128 lanes
TM_MAX = 512                      # frame-row tile (per pred/target half)
NSPLIT = 2                        # leading "parallel" grid axis (one split per TC on v7x)
LANES = 512                       # lane width for the time-domain MSE reduction


def _cdiv(a, b):
    return -(-a // b)


def _round_up(a, b):
    return _cdiv(a, b) * b


# ----------------------------- Pallas kernels ------------------------------


def stft_mse_kernel(x_ref, rhs_ref, out_ref):
    """One (2*tm, WIN) bf16 tile: rows [:tm] = pred frames, rows [tm:] = target frames.
    Single MXU matmul against the fused [cos | -sin] DFT RHS, f32 magnitude math,
    partial sums accumulated into an (8, F_PAD) VMEM accumulator (vreg adds only)."""
    @pl.when(pl.program_id(1) == 0)
    def _():
        out_ref[...] = jnp.zeros_like(out_ref)

    x = x_ref[...]                                                         # (2*tm, WIN) bf16
    res = jnp.dot(x, rhs_ref[...], preferred_element_type=jnp.float32)     # (2*tm, 2*F_PAD) f32
    re = res[:, :F_PAD]
    im = res[:, F_PAD:]
    # Padded freq cols / padded frame rows are exact zeros in both halves -> contribute 0.
    mag = jnp.sqrt(re * re + im * im)                                      # (2*tm, F_PAD)

    tm = x_ref.shape[0] // 2
    d = mag[:tm] - mag[tm:]
    dd = d * d
    partial = jnp.sum(dd.reshape(tm // 8, 8, F_PAD), axis=0)               # (8, F_PAD)
    out_ref[...] += partial[None, :, :]


def sq_err_kernel(a_ref, b_ref, out_ref):
    """Tiled sum((a - b)^2) with an (8, LANES) VMEM accumulator."""
    @pl.when(pl.program_id(0) == 0)
    def _():
        out_ref[...] = jnp.zeros_like(out_ref)

    d = a_ref[...] - b_ref[...]
    dd = d * d
    tr = a_ref.shape[0]
    out_ref[...] += jnp.sum(dd.reshape(tr // 8, 8, a_ref.shape[1]), axis=0)


# ---------------------------- pallas_call wrappers --------------------------


def _stft_sq_err_sum(fa, fb, rhs):
    """fa/fb: (rows, WIN) f32 frames (pred / target seasonal). Returns sum((|A|-|B|)^2)."""
    rows = fa.shape[0]
    rows_per_split = _cdiv(rows, NSPLIT)
    tm = min(TM_MAX, _round_up(rows_per_split, 8))
    tiles_per_split = _cdiv(rows_per_split, tm)
    rows_pad = NSPLIT * tiles_per_split * tm

    fa = jnp.pad(fa, ((0, rows_pad - rows), (0, 0)))
    fb = jnp.pad(fb, ((0, rows_pad - rows), (0, 0)))
    n_tiles = rows_pad // tm
    # Interleave per tile so one block is [fa tile ; fb tile]: a single matmul shares the RHS.
    frames = jnp.stack(
        [fa.reshape(n_tiles, tm, WIN), fb.reshape(n_tiles, tm, WIN)], axis=1
    ).reshape(n_tiles * 2 * tm, WIN).astype(jnp.bfloat16)

    out = pl.pallas_call(
        stft_mse_kernel,
        out_shape=jax.ShapeDtypeStruct((NSPLIT, 8, F_PAD), jnp.float32),
        grid_spec=pltpu.PrefetchScalarGridSpec(
            num_scalar_prefetch=0,
            grid=(NSPLIT, tiles_per_split),
            in_specs=[
                pl.BlockSpec((2 * tm, WIN),
                             lambda s, i: (s * tiles_per_split + i, 0)),
                pl.BlockSpec((WIN, 2 * F_PAD), lambda s, i: (0, 0)),
            ],
            out_specs=pl.BlockSpec((1, 8, F_PAD), lambda s, i: (s, 0, 0)),
        ),
        compiler_params=pltpu.CompilerParams(
            dimension_semantics=("parallel", "arbitrary")),
    )(frames, rhs)
    return jnp.sum(out)


def _sq_err_sum(a, b):
    """sum((a - b)^2) over (B, L) arrays, tiled over lane-dense (tr, 512) blocks."""
    n = a.size
    rows = _cdiv(n, LANES)
    rows8 = _round_up(rows, 8)
    tr = min(256, rows8)
    ntiles = _cdiv(rows8, tr)
    rows_pad = ntiles * tr
    total = rows_pad * LANES
    af = jnp.pad(a.reshape(-1), (0, total - n)).reshape(rows_pad, LANES)
    bf = jnp.pad(b.reshape(-1), (0, total - n)).reshape(rows_pad, LANES)

    out = pl.pallas_call(
        sq_err_kernel,
        out_shape=jax.ShapeDtypeStruct((8, LANES), jnp.float32),
        grid_spec=pltpu.PrefetchScalarGridSpec(
            num_scalar_prefetch=0,
            grid=(ntiles,),
            in_specs=[pl.BlockSpec((tr, LANES), lambda i: (i, 0)),
                      pl.BlockSpec((tr, LANES), lambda i: (i, 0))],
            out_specs=pl.BlockSpec((8, LANES), lambda i: (0, 0)),
        ),
        compiler_params=pltpu.CompilerParams(dimension_semantics=("arbitrary",)),
    )(af, bf)
    return jnp.sum(out)


# ------------------------------- JAX glue -----------------------------------


def zero_lpf(x, alpha):
    """Zero-phase forward/backward one-pole LPF along the last axis.
    y_t = a*y_{t-1} + (1-a)*x_t with y_0 = x_0, run forward then backward.
    Implemented as an associative scan (first-order linear recurrence)."""
    a = jnp.float32(alpha)

    def combine(left, right):
        al, bl = left
        ar, br = right
        return al * ar, ar * bl + br

    def one_pass(sig):
        coeff = jnp.full(sig.shape, a, dtype=jnp.float32).at[:, 0].set(0.0)
        off = ((1.0 - a) * sig).at[:, 0].set(sig[:, 0])
        _, y = jax.lax.associative_scan(combine, (coeff, off), axis=1)
        return y

    y = one_pass(x)
    return one_pass(y[:, ::-1])[:, ::-1]


def _frame_windows(x):
    """torch.stft framing restricted to the 64 samples where the centered rect window is
    nonzero: reflect pad by n_fft//2; frame t covers xp[:, 4t+96 : 4t+160]. Returns
    (B*T, WIN) frames and the frame count T."""
    B, L = x.shape
    xp = jnp.pad(x, ((0, 0), (N_FFT // 2, N_FFT // 2)), mode="reflect")
    T = L // HOP + 1
    idx = (jnp.arange(T) * HOP)[:, None] + (WIN_OFF + jnp.arange(WIN))[None, :]
    frames = xp[:, idx]                      # (B, T, WIN)
    return frames.reshape(B * T, WIN), T


def _dft_rhs():
    """Fused [cos | -sin] DFT matrix restricted to window rows 96..159, each half padded
    129 -> 256 freq lanes with exact zeros. Shape (WIN, 2*F_PAD), bf16."""
    n = (WIN_OFF + jnp.arange(WIN, dtype=jnp.float32))[:, None]
    f = jnp.arange(N_FREQ, dtype=jnp.float32)[None, :]
    ang = 2.0 * math.pi * n * f / N_FFT
    cosm = jnp.pad(jnp.cos(ang), ((0, 0), (0, F_PAD - N_FREQ)))
    sinm = jnp.pad(-jnp.sin(ang), ((0, 0), (0, F_PAD - N_FREQ)))
    return jnp.concatenate([cosm, sinm], axis=1).astype(jnp.bfloat16)


@jax.jit
def alaap_loss(pred, target, alpha=0.9):
    B = pred.shape[0]
    p = pred.reshape(B, -1).astype(jnp.float32)
    t = target.reshape(B, -1).astype(jnp.float32)
    L = p.shape[1]

    seasonal_p = p - zero_lpf(p, alpha)
    seasonal_t = p - zero_lpf(t, alpha)      # reproduces the reference: pred - trend(target)

    fa, T = _frame_windows(seasonal_p)
    fb, _ = _frame_windows(seasonal_t)

    sum_f = _stft_sq_err_sum(fa, fb, _dft_rhs())
    sum_t = _sq_err_sum(p, t)

    mse_f = sum_f / jnp.float32(B * N_FREQ * T)   # mean over the (B, 129, T) STFT magnitudes
    mse_t = sum_t / jnp.float32(B * L)            # mean over the flattened (B, L) signals
    return mse_f + mse_t


if __name__ == "__main__":
    key = jax.random.PRNGKey(0)
    k1, k2 = jax.random.split(key)
    pred = jax.random.normal(k1, (2, 4, 16, 16), dtype=jnp.float32)
    target = jax.random.normal(k2, (2, 4, 16, 16), dtype=jnp.float32)

    loss = alaap_loss(pred, target)
    jax.block_until_ready(loss)
    assert jnp.isfinite(loss), "loss is not finite"
    print("KERNEL_OK")
</pallas_src>

<mosaic_0001>
module attributes {stable_mosaic.version = 11 : i64} {
  func.func @stft_mse_kernel(%arg0: i32, %arg1: i32, %arg2: memref<528x64xbf16, #tpu.memory_space<vmem>>, %arg3: memref<64x512xbf16, #tpu.memory_space<vmem>>, %arg4: memref<1x8x256xf32, #tpu.memory_space<vmem>>) attributes {dimension_semantics = [#tpu.dimension_semantics<parallel>, #tpu.dimension_semantics<arbitrary>], iteration_bounds = array<i64: 2, 1>, scalar_prefetch = 0 : i64, scratch_operands = 0 : i64, tpu.core_type = #tpu.core_type<tc>, window_params = [{transform_indices = @transform_0, window_bounds = array<i64: 528, 64>}, {pipeline_mode = #tpu.pipeline_mode<synchronous>, transform_indices = @transform_1, window_bounds = array<i64: 64, 512>}, {transform_indices = @transform_2, window_bounds = array<i64: 1, 8, 256>}]} {
    %c0_i32 = arith.constant 0 : i32
    %0 = arith.cmpi eq, %arg1, %c0_i32 : i32
    %1 = arith.extui %0 : i1 to i32
    %c0_i32_0 = arith.constant 0 : i32
    %2 = arith.cmpi ne, %1, %c0_i32_0 : i32
    scf.if %2 {
      %cst_11 = arith.constant 0.000000e+00 : f32
      %22 = vector.broadcast %cst_11 : f32 to vector<1x8x256xf32>
      %c0_12 = arith.constant 0 : index
      %c0_13 = arith.constant 0 : index
      %c0_14 = arith.constant 0 : index
      %23 = vector.load %arg4[%c0_12, %c0_13, %c0_14] : memref<1x8x256xf32, #tpu.memory_space<vmem>>, vector<1x8x256xf32>
      tpu.vector_store %arg4[%c0_12, %c0_13, %c0_14], %22 {strides = array<i32>} : memref<1x8x256xf32, #tpu.memory_space<vmem>>, vector<1x8x256xf32>,
    } else {
    }
    %c0 = arith.constant 0 : index
    %c0_1 = arith.constant 0 : index
    %3 = vector.load %arg2[%c0, %c0_1] : memref<528x64xbf16, #tpu.memory_space<vmem>>, vector<528x64xbf16>
    %c0_2 = arith.constant 0 : index
    %c0_3 = arith.constant 0 : index
    %4 = vector.load %arg3[%c0_2, %c0_3] : memref<64x512xbf16, #tpu.memory_space<vmem>>, vector<64x512xbf16>
    %cst = arith.constant dense<0.000000e+00> : vector<528x512xf32>
    %5 = tpu.matmul %3, %4, %cst {dimension_numbers = #tpu.dot_dimension_numbers<[1], [0], [0], [1], [0, 0, 1, 1], [], []>} : vector<528x64xbf16>, vector<64x512xbf16>, vector<528x512xf32> -> vector<528x512xf32>
    %6 = vector.extract_strided_slice %5 {offsets = [0, 0], sizes = [528, 256], strides = [1, 1]} : vector<528x512xf32> to vector<528x256xf32>
    %7 = vector.extract_strided_slice %5 {offsets = [0, 256], sizes = [528, 256], strides = [1, 1]} : vector<528x512xf32> to vector<528x256xf32>
    %8 = arith.mulf %6, %6 : vector<528x256xf32>
    %9 = arith.mulf %7, %7 : vector<528x256xf32>
    %10 = arith.addf %8, %9 : vector<528x256xf32>
    %11 = math.sqrt %10 : vector<528x256xf32>
    %12 = vector.extract_strided_slice %11 {offsets = [0, 0], sizes = [264, 256], strides = [1, 1]} : vector<528x256xf32> to vector<264x256xf32>
    %13 = vector.extract_strided_slice %11 {offsets = [264, 0], sizes = [264, 256], strides = [1, 1]} : vector<528x256xf32> to vector<264x256xf32>
    %14 = arith.subf %12, %13 : vector<264x256xf32>
    %15 = arith.mulf %14, %14 : vector<264x256xf32>
    %16 = vector.shape_cast %15 : vector<264x256xf32> to vector<33x8x256xf32>
    %cst_4 = arith.constant dense<0.000000e+00> : vector<8x256xf32>
    %17 = vector.multi_reduction <add>, %16, %cst_4 [0] : vector<33x8x256xf32> to vector<8x256xf32>
    %c0_5 = arith.constant 0 : index
    %c0_6 = arith.constant 0 : index
    %c0_7 = arith.constant 0 : index
    %18 = vector.load %arg4[%c0_5, %c0_6, %c0_7] : memref<1x8x256xf32, #tpu.memory_space<vmem>>, vector<1x8x256xf32>
    %19 = vector.shape_cast %17 : vector<8x256xf32> to vector<1x8x256xf32>
    %20 = arith.addf %18, %19 : vector<1x8x256xf32>
    %c0_8 = arith.constant 0 : index
    %c0_9 = arith.constant 0 : index
    %c0_10 = arith.constant 0 : index
    %21 = vector.load %arg4[%c0_8, %c0_9, %c0_10] : memref<1x8x256xf32, #tpu.memory_space<vmem>>, vector<1x8x256xf32>
    tpu.vector_store %arg4[%c0_8, %c0_9, %c0_10], %20 {strides = array<i32>} : memref<1x8x256xf32, #tpu.memory_space<vmem>>, vector<1x8x256xf32>,
    return
  }
  func.func @transform_0(%arg0: i32, %arg1: i32) -> (i32, i32) {
    %c1_i32 = arith.constant 1 : i32
    %0 = arith.muli %arg0, %c1_i32 : i32
    %1 = arith.addi %0, %arg1 : i32
    %c0_i32 = arith.constant 0 : i32
    %c0_i32_0 = arith.constant 0 : i32
    return %1, %c0_i32 : i32, i32
  }
  func.func @transform_1(%arg0: i32, %arg1: i32) -> (i32, i32) {
    %c0_i32 = arith.constant 0 : i32
    %c0_i32_0 = arith.constant 0 : i32
    %c0_i32_1 = arith.constant 0 : i32
    return %c0_i32, %c0_i32_0 : i32, i32
  }
  func.func @transform_2(%arg0: i32, %arg1: i32) -> (i32, i32, i32) {
    %c0_i32 = arith.constant 0 : i32
    %c0_i32_0 = arith.constant 0 : i32
    %c0_i32_1 = arith.constant 0 : i32
    return %arg0, %c0_i32, %c0_i32_0 : i32, i32, i32
  }
}

module attributes {stable_mosaic.version = 11 : i64} {
  func.func @sq_err_kernel(%arg0: i32, %arg1: memref<8x512xf32, #tpu.memory_space<vmem>>, %arg2: memref<8x512xf32, #tpu.memory_space<vmem>>, %arg3: memref<8x512xf32, #tpu.memory_space<vmem>>) attributes {dimension_semantics = [#tpu.dimension_semantics<arbitrary>], iteration_bounds = array<i64: 1>, scalar_prefetch = 0 : i64, scratch_operands = 0 : i64, tpu.core_type = #tpu.core_type<tc>, window_params = [{transform_indices = @transform_0, window_bounds = array<i64: 8, 512>}, {transform_indices = @transform_1, window_bounds = array<i64: 8, 512>}, {pipeline_mode = #tpu.pipeline_mode<synchronous>, transform_indices = @transform_2, window_bounds = array<i64: 8, 512>}]} {
    %c0_i32 = arith.constant 0 : i32
    %0 = arith.cmpi eq, %arg0, %c0_i32 : i32
    %1 = arith.extui %0 : i1 to i32
    %c0_i32_0 = arith.constant 0 : i32
    %2 = arith.cmpi ne, %1, %c0_i32_0 : i32
    scf.if %2 {
      %cst_8 = arith.constant 0.000000e+00 : f32
      %12 = vector.broadcast %cst_8 : f32 to vector<8x512xf32>
      %c0_9 = arith.constant 0 : index
      %c0_10 = arith.constant 0 : index
      %13 = vector.load %arg3[%c0_9, %c0_10] : memref<8x512xf32, #tpu.memory_space<vmem>>, vector<8x512xf32>
      tpu.vector_store %arg3[%c0_9, %c0_10], %12 {strides = array<i32>} : memref<8x512xf32, #tpu.memory_space<vmem>>, vector<8x512xf32>,
    } else {
    }
    %c0 = arith.constant 0 : index
    %c0_1 = arith.constant 0 : index
    %3 = vector.load %arg1[%c0, %c0_1] : memref<8x512xf32, #tpu.memory_space<vmem>>, vector<8x512xf32>
    %c0_2 = arith.constant 0 : index
    %c0_3 = arith.constant 0 : index
    %4 = vector.load %arg2[%c0_2, %c0_3] : memref<8x512xf32, #tpu.memory_space<vmem>>, vector<8x512xf32>
    %5 = arith.subf %3, %4 : vector<8x512xf32>
    %6 = arith.mulf %5, %5 : vector<8x512xf32>
    %c0_4 = arith.constant 0 : index
    %c0_5 = arith.constant 0 : index
    %7 = vector.load %arg3[%c0_4, %c0_5] : memref<8x512xf32, #tpu.memory_space<vmem>>, vector<8x512xf32>
    %8 = vector.shape_cast %6 : vector<8x512xf32> to vector<1x8x512xf32>
    %cst = arith.constant dense<0.000000e+00> : vector<8x512xf32>
    %9 = vector.multi_reduction <add>, %8, %cst [0] : vector<1x8x512xf32> to vector<8x512xf32>
    %10 = arith.addf %7, %9 : vector<8x512xf32>
    %c0_6 = arith.constant 0 : index
    %c0_7 = arith.constant 0 : index
    %11 = vector.load %arg3[%c0_6, %c0_7] : memref<8x512xf32, #tpu.memory_space<vmem>>, vector<8x512xf32>
    tpu.vector_store %arg3[%c0_6, %c0_7], %10 {strides = array<i32>} : memref<8x512xf32, #tpu.memory_space<vmem>>, vector<8x512xf32>,
    return
  }
  func.func @transform_0(%arg0: i32) -> (i32, i32) {
    %c0_i32 = arith.constant 0 : i32
    %c0_i32_0 = arith.constant 0 : i32
    return %arg0, %c0_i32 : i32, i32
  }
  func.func @transform_1(%arg0: i32) -> (i32, i32) {
    %c0_i32 = arith.constant 0 : i32
    %c0_i32_0 = arith.constant 0 : i32
    return %arg0, %c0_i32 : i32, i32
  }
  func.func @transform_2(%arg0: i32) -> (i32, i32) {
    %c0_i32 = arith.constant 0 : i32
    %c0_i32_0 = arith.constant 0 : i32
    %c0_i32_1 = arith.constant 0 : i32
    return %c0_i32, %c0_i32_0 : i32, i32
  }
}

</mosaic_0001>

<bundles_post_ra>
// kernel: mul.10
= control target key start
LH: loop header
LB: loop body
LE: loop exit
PB: predicated region body
PF: predicated region fallthrough
CT: control target
= control target key end

     0   :  { %s34_s0 = inlined_call_operand.vmem [shape: f32[256], index: 0, kind: input, shape index: {}]   ;;  %s35_s1 = inlined_call_operand.vmem [shape: f32[256], index: 1, kind: input, shape index: {}]   ;;  %s36_s2 = inlined_call_operand.vmem [shape: f32[256], index: 2, kind: output, shape index: {}]  }
   0x1   :  { %v3_v0 = vld [vmem:[%s34_s0] sm:$0x3] }
   0x2   :  { %v4_v1 = vld [vmem:[%s35_s1] sm:$0x3] }
   0x3   :  { %v7_v2 = vmul.f32 %v4_v1, %v3_v0 }
   0x5   :  { %9 = vst [vmem:[%s36_s2] sm:$0x3] %v7_v2 }

// kernel: mul.11
= control target key start
LH: loop header
LB: loop body
LE: loop exit
PB: predicated region body
PF: predicated region fallthrough
CT: control target
= control target key end

     0   :  { %s34_s0 = inlined_call_operand.vmem [shape: f32[128], index: 0, kind: input, shape index: {}]   ;;  %s35_s1 = inlined_call_operand.vmem [shape: f32[128], index: 1, kind: input, shape index: {}]   ;;  %s36_s2 = inlined_call_operand.vmem [shape: f32[128], index: 2, kind: output, shape index: {}]  }
   0x1   :  { %v3_v0 = vld [vmem:[%s34_s0] sm:$0x1] }
   0x2   :  { %v4_v1 = vld [vmem:[%s35_s1] sm:$0x1] }
   0x3   :  { %v7_v2 = vmul.f32 %v4_v1, %v3_v0 }
   0x5   :  { %9 = vst [vmem:[%s36_s2] sm:$0x1] %v7_v2 }

// kernel: mul.12
= control target key start
LH: loop header
LB: loop body
LE: loop exit
PB: predicated region body
PF: predicated region fallthrough
CT: control target
= control target key end

     0   :  { %s34_s0 = inlined_call_operand.vmem [shape: f32[64], index: 0, kind: input, shape index: {}]   ;;  %s35_s1 = inlined_call_operand.vmem [shape: f32[64], index: 1, kind: input, shape index: {}]   ;;  %s36_s2 = inlined_call_operand.vmem [shape: f32[64], index: 2, kind: output, shape index: {}]  }
   0x1   :  { %v3_v0 = vld [vmem:[%s34_s0] sm:$0x1] }
   0x2   :  { %v4_v1 = vld [vmem:[%s35_s1] sm:$0x1] }
   0x3   :  { %v7_v2 = vmul.f32 %v4_v1, %v3_v0 }
   0x5   :  { %9 = vst [vmem:[%s36_s2] sm:$0x1] %v7_v2 }

// kernel: mul.13
= control target key start
LH: loop header
LB: loop body
LE: loop exit
PB: predicated region body
PF: predicated region fallthrough
CT: control target
= control target key end

     0   :  { %s34_s0 = inlined_call_operand.vmem [shape: f32[32], index: 0, kind: input, shape index: {}]   ;;  %s35_s1 = inlined_call_operand.vmem [shape: f32[32], index: 1, kind: input, shape index: {}]   ;;  %s36_s2 = inlined_call_operand.vmem [shape: f32[32], index: 2, kind: output, shape index: {}]  }
   0x1   :  { %v3_v0 = vld [vmem:[%s34_s0] sm:$0x1] }
   0x2   :  { %v4_v1 = vld [vmem:[%s35_s1] sm:$0x1] }
   0x3   :  { %v7_v2 = vmul.f32 %v4_v1, %v3_v0 }
   0x5   :  { %9 = vst [vmem:[%s36_s2] sm:$0x1] %v7_v2 }

// kernel: mul.14
= control target key start
LH: loop header
LB: loop body
LE: loop exit
PB: predicated region body
PF: predicated region fallthrough
CT: control target
= control target key end

     0   :  { %s34_s0 = inlined_call_operand.vmem [shape: f32[16], index: 0, kind: input, shape index: {}]   ;;  %s35_s1 = inlined_call_operand.vmem [shape: f32[16], index: 1, kind: input, shape index: {}]   ;;  %s36_s2 = inlined_call_operand.vmem [shape: f32[16], index: 2, kind: output, shape index: {}]  }
   0x1   :  { %v3_v0 = vld [vmem:[%s34_s0] sm:$0x1] }
   0x2   :  { %v4_v1 = vld [vmem:[%s35_s1] sm:$0x1] }
   0x3   :  { %v7_v2 = vmul.f32 %v4_v1, %v3_v0 }
   0x5   :  { %9 = vst [vmem:[%s36_s2] sm:$0x1] %v7_v2 }

// kernel: mul.15
= control target key start
LH: loop header
LB: loop body
LE: loop exit
PB: predicated region body
PF: predicated region fallthrough
CT: control target
= control target key end

     0   :  { %s34_s0 = inlined_call_operand.vmem [shape: f32[8], index: 0, kind: input, shape index: {}]   ;;  %s35_s1 = inlined_call_operand.vmem [shape: f32[8], index: 1, kind: input, shape index: {}]   ;;  %s36_s2 = inlined_call_operand.vmem [shape: f32[8], index: 2, kind: output, shape index: {}]  }
   0x1   :  { %v3_v0 = vld [vmem:[%s34_s0] sm:$0x1] }
   0x2   :  { %v4_v1 = vld [vmem:[%s35_s1] sm:$0x1] }
   0x3   :  { %v7_v2 = vmul.f32 %v4_v1, %v3_v0 }
   0x5   :  { %9 = vst [vmem:[%s36_s2] sm:$0x1] %v7_v2 }

// kernel: mul.16
= control target key start
LH: loop header
LB: loop body
LE: loop exit
PB: predicated region body
PF: predicated region fallthrough
CT: control target
= control target key end

     0   :  { %s34_s0 = inlined_call_operand.vmem [shape: f32[4], index: 0, kind: input, shape index: {}]   ;;  %s35_s1 = inlined_call_operand.vmem [shape: f32[4], index: 1, kind: input, shape index: {}]   ;;  %s36_s2 = inlined_call_operand.vmem [shape: f32[4], index: 2, kind: output, shape index: {}]  }
   0x1   :  { %v3_v0 = vld [vmem:[%s34_s0] sm:$0x1] }
   0x2   :  { %v4_v1 = vld [vmem:[%s35_s1] sm:$0x1] }
   0x3   :  { %v7_v2 = vmul.f32 %v4_v1, %v3_v0 }
   0x5   :  { %9 = vst [vmem:[%s36_s2] sm:$0x1] %v7_v2 }

// kernel: mul.17
= control target key start
LH: loop header
LB: loop body
LE: loop exit
PB: predicated region body
PF: predicated region fallthrough
CT: control target
= control target key end

     0   :  { %s34_s0 = inlined_call_operand.vmem [shape: f32[2], index: 0, kind: input, shape index: {}]   ;;  %s35_s1 = inlined_call_operand.vmem [shape: f32[2], index: 1, kind: input, shape index: {}]   ;;  %s36_s2 = inlined_call_operand.vmem [shape: f32[2], index: 2, kind: output, shape index: {}]  }
   0x1   :  { %v3_v0 = vld [vmem:[%s34_s0] sm:$0x1] }
   0x2   :  { %v4_v1 = vld [vmem:[%s35_s1] sm:$0x1] }
   0x3   :  { %v7_v2 = vmul.f32 %v4_v1, %v3_v0 }
   0x5   :  { %9 = vst [vmem:[%s36_s2] sm:$0x1] %v7_v2 }

// kernel: alaap_loss.3
= control target key start
LH: loop header
LB: loop body
LE: loop exit
PB: predicated region body
PF: predicated region fallthrough
CT: control target
= control target key end

     0   :  { %s107_s0 = inlined_call_operand.vmem [shape: f32[8,512], index: 0, kind: input, shape index: {}]   ;;  %s108_s1 = inlined_call_operand.vmem [shape: f32[8,512], index: 1, kind: input, shape index: {}]   ;;  %s109_s2 = inlined_call_operand.vmem [shape: f32[8,512], index: 2, kind: output, shape index: {}]  }
   0x1   :  { %v19_v0 = vld [vmem:[%s107_s0] sm:$0xff]  ;;  %v20_v2 = vld [vmem:[%s107_s0 + $0x8] sm:$0xff]  ;;  %v21_v5 = vld [vmem:[%s107_s0 + $0x10] sm:$0xff] }
   0x2   :  { %v23_v1 = vld [vmem:[%s108_s1] sm:$0xff]  ;;  %v24_v4 = vld [vmem:[%s108_s1 + $0x8] sm:$0xff]  ;;  %v25_v6 = vld [vmem:[%s108_s1 + $0x10] sm:$0xff] }
   0x3   :  { %v27_v3 = vsub.f32 %v19_v0, %v23_v1  ;;  %v28_v7 = vsub.f32 %v20_v2, %v24_v4  ;;  %v29_v8 = vsub.f32 %v21_v5, %v25_v6  ;;  %v22_v9 = vld [vmem:[%s107_s0 + $0x18] sm:$0xff] }
   0x4   :  { %v26_v10 = vld [vmem:[%s108_s1 + $0x18] sm:$0xff] }
   0x5   :  { %v31_v11 = vmul.f32 %v27_v3, %v27_v3  ;;  %v30_v12 = vsub.f32 %v22_v9, %v26_v10  ;;  %v32_v13 = vmul.f32 %v28_v7, %v28_v7  ;;  %v33_v14 = vmul.f32 %v29_v8, %v29_v8 }
   0x7   :  { %v34_v15 = vmul.f32 %v30_v12, %v30_v12  ;;  %47 = vst [vmem:[%s109_s2] sm:$0xff] %v31_v11  ;;  %48 = vst [vmem:[%s109_s2 + $0x8] sm:$0xff] %v32_v13 }
   0x8   :  { %49 = vst [vmem:[%s109_s2 + $0x10] sm:$0xff] %v33_v14 }
   0x9   :  { %50 = vst [vmem:[%s109_s2 + $0x18] sm:$0xff] %v34_v15 }

// kernel: alaap_loss.2
= control target key start
LH: loop header
LB: loop body
LE: loop exit
PB: predicated region body
PF: predicated region fallthrough
CT: control target
= control target key end

     0   :  { %s3423_s9 = smov 0   ;;  %s3425_s10 = smov 0   ;;  %s6317_s0 = inlined_call_operand.vmem [shape: bf16[1056,64], index: 0, kind: input, shape index: {}]   ;;  %s6318_s1 = inlined_call_operand.vmem [shape: bf16[64,512], index: 1, kind: input, shape index: {}]   ;;  %s6319_s2 = inlined_call_operand.vmem [shape: f32[2,8,256], index: 2, kind: output, shape index: {}]  }
   0x1   :  { %s3427_s11 = smov 0  }
   0x2 LB: > { %s24_s12 = sadd.s32 1, %s3401_s10  ;;  %p2914_p0 = scmp.ge.s32.totalorder %s3405_s11, 1  ;;  %s3405_s11 = sphi %s3427_s11, %s12_s11   ;;  %s3401_s10 = sphi %s3425_s10, %s6567_s10   ;;  %s3397_s9 = sphi %s3423_s9, %s6566_s9  }
   0x3   : > { %p26_p1 = scmp.ge.s32.totalorder %s24_s12, 2  ;;  %p129_p2 = scmp.lt.s32.totalorder %s3405_s11, 3 }
   0x5   : > { %s6569_s12 = smov (%p26_p1, %s24_s12), 0  ;;  %p130_p3 = pnand %p2914_p0, %p129_p2 }
   0x7   : > { %133 = sbr.rel (%p130_p3) target bundleno = 643 (0x283), region = 28 }
   0xe   : > { %v3062_v0 = vld [vmem:[%s6318_s1 + $0x4] ss:$16 sps:$4 sm:$0xff]   ;;  %s153_s15 = smul.u32 66, %s3397_s9  ;;  %v3064_v1 = vld [vmem:[%s6318_s1 + $0xc] ss:$16 sps:$4 sm:$0xff]   ;;  %v3407_v2 = vmov 0  }
   0xf   : > { %631 = vmatprep.mubr.bf16.mxu0 %v3407_v2  ;;  %994 = vmatprep.mubr.bf16.mxu1 %v3407_v2  ;;  %v3066_v3 = vld [vmem:[%s6318_s1] ss:$16 sps:$4 sm:$0xff]   ;;  %v3067_v4 = vld [vmem:[%s6318_s1 + $0x8] ss:$16 sps:$4 sm:$0xff]   ;;  %v3068_v5 = vld [vmem:[%s6318_s1 + $0x24] ss:$16 sps:$4 sm:$0xff]  }
  0x10   : > { %599 = vmatprep.subr.bf16.mxu0 %v3062_v0  ;;  %p154_p4 = scmp.lt.s32.totalorder %s153_s15, 131  ;;  %962 = vmatprep.subr.bf16.mxu1 %v3064_v1  ;;  %v3070_v6 = vld [vmem:[%s6318_s1 + $0x2c] ss:$16 sps:$4 sm:$0xff]   ;;  %v3072_v7 = vld [vmem:[%s6318_s1 + $0x20] ss:$16 sps:$4 sm:$0xff]   ;;  %vm499_vm0 = vcmask 523264  }
  0x11   : > { %600 = vmatpush1.bf16.msra.mxu0 %v3066_v3  ;;  %963 = vmatpush1.bf16.msra.mxu1 %v3067_v4  ;;  %v3073_v8 = vld [vmem:[%s6318_s1 + $0x28] ss:$16 sps:$4 sm:$0xff]   ;;  %v3074_v9 = vld [vmem:[%s6318_s1 + $0x44] ss:$16 sps:$4 sm:$0xff]   ;;  %v3076_v10 = vld [vmem:[%s6318_s1 + $0x4c] ss:$16 sps:$4 sm:$0xff]  }
  0x12   : > { %s6571_s15 = smov (!%p154_p4, %s153_s15), 131  ;;  %601 = vmatprep.subr.bf16.mxu0 %v3068_v5  ;;  %964 = vmatprep.subr.bf16.mxu1 %v3070_v6  ;;  %v3078_v11 = vld [vmem:[%s6318_s1 + $0x40] ss:$16 sps:$4 sm:$0xff]   ;;  %v3079_v12 = vld [vmem:[%s6318_s1 + $0x48] ss:$16 sps:$4 sm:$0xff]   ;;  %p160_p5 = scmp.lt.s32.totalorder %s3397_s9, 1 }
  0x13   : > { %s2915_s4 = sshll.u32 %s6571_s15, 2  ;;  %v3080_v13 = vld [vmem:[%s6318_s1 + $0x64] ss:$16 sps:$4 sm:$0xff]   ;;  %v3082_v14 = vld [vmem:[%s6318_s1 + $0x6c] ss:$16 sps:$4 sm:$0xff]  }
  0x14   : > { %s3491_s21 = scalar_lea.vmem %s6317_s0, %s2915_s4  ;;  %v3084_v15 = vld [vmem:[%s6318_s1 + $0x60] ss:$16 sps:$4 sm:$0xff]   ;;  %v3085_v16 = vld [vmem:[%s6318_s1 + $0x68] ss:$16 sps:$4 sm:$0xff]   ;;  %s6573_s9 = smov (!%p160_p5, %s3397_s9), 1 }
  0x15   : > { %602 = vmatpush1.bf16.msra.mxu0 %v3072_v7  ;;  %965 = vmatpush1.bf16.msra.mxu1 %v3073_v8  ;;  %v3086_v17 = vld [vmem:[%s3491_s21] sm:$0xff]   ;;  %v3087_v18 = vld [vmem:[%s3491_s21 + $0x8] sm:$0xff]   ;;  %v3088_v19 = vld [vmem:[%s3491_s21 + $0x10] sm:$0xff]   ;;  %s3035_s26 = sshll.u32 %s6573_s9, 4 }
  0x16   : > { %603 = vmatprep.subr.bf16.mxu0 %v3074_v9  ;;  %966 = vmatprep.subr.bf16.mxu1 %v3076_v10  ;;  %v3089_v20 = vld [vmem:[%s3491_s21 + $0x18] sm:$0xff]   ;;  %v3090_v21 = vld [vmem:[%s3491_s21 + $0x20] sm:$0xff]   ;;  %v3091_v22 = vld [vmem:[%s3491_s21 + $0x28] sm:$0xff]   ;;  %s164_s29 = scalar_lea.vmem %s6319_s2, %s3035_s26 }
  0x17   : > { %v3092_v23 = vld [vmem:[%s3491_s21 + $0x30] sm:$0xff]   ;;  %v3093_v24 = vld [vmem:[%s3491_s21 + $0x38] sm:$0xff]   ;;  %v3094_v25 = vld [vmem:[%s3491_s21 + $0x40] sm:$0xff]  }
  0x18   : > { %v3095_v26 = vld [vmem:[%s3491_s21 + $0x48] sm:$0xff]   ;;  %v3096_v27 = vld [vmem:[%s3491_s21 + $0x50] sm:$0xff]   ;;  %v3097_v28 = vld [vmem:[%s3491_s21 + $0x58] sm:$0xff]  }
  0x19   : > { %604 = vmatpush1.bf16.msra.mxu0 %v3078_v11  ;;  %967 = vmatpush1.bf16.msra.mxu1 %v3079_v12  ;;  %v3098_v29 = vld [vmem:[%s3491_s21 + $0x60] sm:$0xff]   ;;  %v3099_v30 = vld [vmem:[%s3491_s21 + $0x68] sm:$0xff]   ;;  %v3100_v31 = vld [vmem:[%s3491_s21 + $0x70] sm:$0xff]  }
  0x1a   : > { %605 = vmatprep.subr.bf16.mxu0 %v3080_v13  ;;  %968 = vmatprep.subr.bf16.mxu1 %v3082_v14  ;;  %v3101_v32 = vld [vmem:[%s3491_s21 + $0x78] sm:$0xff]   ;;  %v3102_v33 = vld [vmem:[%s3491_s21 + $0x80] sm:$0xff]   ;;  %v3103_v34 = vld [vmem:[%s3491_s21 + $0x88] sm:$0xff]  }
  0x1b   : > { %v3104_v35 = vld [vmem:[%s3491_s21 + $0x90] sm:$0xff]   ;;  %v3105_v36 = vld [vmem:[%s3491_s21 + $0x98] sm:$0xff]   ;;  %v3106_v37 = vld [vmem:[%s3491_s21 + $0xa0] sm:$0xff]  }
  0x1c   : > { %v3107_v38 = vld [vmem:[%s3491_s21 + $0xa8] sm:$0xff]   ;;  %v3108_v39 = vld [vmem:[%s3491_s21 + $0xb0] sm:$0xff]   ;;  %v3109_v40 = vld [vmem:[%s3491_s21 + $0xb8] sm:$0xff]  }
  0x1d   : > { %606 = vmatpush1.bf16.msra.mxu0 %v3084_v15  ;;  %969 = vmatpush1.bf16.msra.mxu1 %v3085_v16  ;;  %v3110_v41 = vld [vmem:[%s3491_s21 + $0xc0] sm:$0xff]   ;;  %v3111_v42 = vld [vmem:[%s3491_s21 + $0xc8] sm:$0xff]   ;;  %v3112_v43 = vld [vmem:[%s3491_s21 + $0xd0] sm:$0xff]  }
  0x1e   : > { %v3113_v50 = vld [vmem:[%s3491_s21 + $0xd8] sm:$0xff]   ;;  %v3114_v6 = vld [vmem:[%s3491_s21 + $0xe0] sm:$0xff]  }
  0x20   : > { %2967 = vmatmul.mubr.msk.bf16.vlgmr.msra.gmra.mrb[0].mxu0 %vm499_vm0, %v3086_v17  ;;  %3000 = vmatmul.mubr.msk.bf16.vlgmr.msra.gmra.mrb[0].mxu1 %vm499_vm0, %v3086_v17 }
  0x21   : > { %641 = vmatprep.mubr.bf16.mxu0 %v3407_v2  ;;  %1004 = vmatprep.mubr.bf16.mxu1 %v3407_v2 }
  0x28   : > { %2968 = vmatmul.mubr.msk.bf16.gmra.mrb[4].mxu0 %vm499_vm0, %v3087_v18  ;;  %3001 = vmatmul.mubr.msk.bf16.gmra.mrb[4].mxu1 %vm499_vm0, %v3087_v18 }
  0x29   : > { %651 = vmatprep.mubr.bf16.mxu0 %v3407_v2  ;;  %1014 = vmatprep.mubr.bf16.mxu1 %v3407_v2 }
  0x30   : > { %2969 = vmatmul.mubr.msk.bf16.gmra.mrb[8].mxu0 %vm499_vm0, %v3088_v19  ;;  %3002 = vmatmul.mubr.msk.bf16.gmra.mrb[8].mxu1 %vm499_vm0, %v3088_v19 }
  0x31   : > { %661 = vmatprep.mubr.bf16.mxu0 %v3407_v2  ;;  %1024 = vmatprep.mubr.bf16.mxu1 %v3407_v2 }
  0x38   : > { %2970 = vmatmul.mubr.msk.bf16.gmra.mrb[12].mxu0 %vm499_vm0, %v3089_v20  ;;  %3003 = vmatmul.mubr.msk.bf16.gmra.mrb[12].mxu1 %vm499_vm0, %v3089_v20 }
  0x39   : > { %671 = vmatprep.mubr.bf16.mxu0 %v3407_v2  ;;  %1034 = vmatprep.mubr.bf16.mxu1 %v3407_v2 }
  0x40   : > { %2971 = vmatmul.mubr.msk.bf16.gmra.mrb[16].mxu0 %vm499_vm0, %v3090_v21  ;;  %3004 = vmatmul.mubr.msk.bf16.gmra.mrb[16].mxu1 %vm499_vm0, %v3090_v21 }
  0x41   : > { %681 = vmatprep.mubr.bf16.mxu0 %v3407_v2  ;;  %1044 = vmatprep.mubr.bf16.mxu1 %v3407_v2 }
  0x48   : > { %2972 = vmatmul.mubr.msk.bf16.gmra.mrb[20].mxu0 %vm499_vm0, %v3091_v22  ;;  %3005 = vmatmul.mubr.msk.bf16.gmra.mrb[20].mxu1 %vm499_vm0, %v3091_v22 }
  0x49   : > { %691 = vmatprep.mubr.bf16.mxu0 %v3407_v2  ;;  %1054 = vmatprep.mubr.bf16.mxu1 %v3407_v2 }
  0x50   : > { %2973 = vmatmul.mubr.msk.bf16.gmra.mrb[24].mxu0 %vm499_vm0, %v3092_v23  ;;  %3006 = vmatmul.mubr.msk.bf16.gmra.mrb[24].mxu1 %vm499_vm0, %v3092_v23 }
  0x51   : > { %701 = vmatprep.mubr.bf16.mxu0 %v3407_v2  ;;  %1064 = vmatprep.mubr.bf16.mxu1 %v3407_v2 }
  0x58   : > { %2974 = vmatmul.mubr.msk.bf16.gmra.mrb[28].mxu0 %vm499_vm0, %v3093_v24  ;;  %3007 = vmatmul.mubr.msk.bf16.gmra.mrb[28].mxu1 %vm499_vm0, %v3093_v24 }
  0x59   : > { %711 = vmatprep.mubr.bf16.mxu0 %v3407_v2  ;;  %1074 = vmatprep.mubr.bf16.mxu1 %v3407_v2 }
  0x60   : > { %2975 = vmatmul.mubr.msk.bf16.gmra.mrb[32].mxu0 %vm499_vm0, %v3094_v25  ;;  %3008 = vmatmul.mubr.msk.bf16.gmra.mrb[32].mxu1 %vm499_vm0, %v3094_v25 }
  0x61   : > { %721 = vmatprep.mubr.bf16.mxu0 %v3407_v2  ;;  %1084 = vmatprep.mubr.bf16.mxu1 %v3407_v2 }
  0x68   : > { %2976 = vmatmul.mubr.msk.bf16.gmra.mrb[36].mxu0 %vm499_vm0, %v3095_v26  ;;  %3009 = vmatmul.mubr.msk.bf16.gmra.mrb[36].mxu1 %vm499_vm0, %v3095_v26 }
  0x69   : > { %731 = vmatprep.mubr.bf16.mxu0 %v3407_v2  ;;  %1094 = vmatprep.mubr.bf16.mxu1 %v3407_v2 }
  0x70   : > { %2977 = vmatmul.mubr.msk.bf16.gmra.mrb[40].mxu0 %vm499_vm0, %v3096_v27  ;;  %3010 = vmatmul.mubr.msk.bf16.gmra.mrb[40].mxu1 %vm499_vm0, %v3096_v27  ;;  %v3115_v27 = vld [vmem:[%s3491_s21 + $0xe8] sm:$0xff]  }
  0x71   : > { %741 = vmatprep.mubr.bf16.mxu0 %v3407_v2  ;;  %1104 = vmatprep.mubr.bf16.mxu1 %v3407_v2 }
  0x78   : > { %2978 = vmatmul.mubr.msk.bf16.gmra.mrb[44].mxu0 %vm499_vm0, %v3097_v28  ;;  %3011 = vmatmul.mubr.msk.bf16.gmra.mrb[44].mxu1 %vm499_vm0, %v3097_v28 }
  0x79   : > { %751 = vmatprep.mubr.bf16.mxu0 %v3407_v2  ;;  %1114 = vmatprep.mubr.bf16.mxu1 %v3407_v2 }
  0x80   : > { %2979 = vmatmul.mubr.msk.bf16.gmra.mrb[48].mxu0 %vm499_vm0, %v3098_v29  ;;  %3012 = vmatmul.mubr.msk.bf16.gmra.mrb[48].mxu1 %vm499_vm0, %v3098_v29 }
  0x81   : > { %761 = vmatprep.mubr.bf16.mxu0 %v3407_v2  ;;  %1124 = vmatprep.mubr.bf16.mxu1 %v3407_v2 }
  0x88   : > { %2980 = vmatmul.mubr.msk.bf16.gmra.mrb[52].mxu0 %vm499_vm0, %v3099_v30  ;;  %3013 = vmatmul.mubr.msk.bf16.gmra.mrb[52].mxu1 %vm499_vm0, %v3099_v30 }
  0x89   : > { %771 = vmatprep.mubr.bf16.mxu0 %v3407_v2  ;;  %1134 = vmatprep.mubr.bf16.mxu1 %v3407_v2 }
  0x90   : > { %2981 = vmatmul.mubr.msk.bf16.gmra.mrb[56].mxu0 %vm499_vm0, %v3100_v31  ;;  %3014 = vmatmul.mubr.msk.bf16.gmra.mrb[56].mxu1 %vm499_vm0, %v3100_v31 }
  0x91   : > { %781 = vmatprep.mubr.bf16.mxu0 %v3407_v2  ;;  %1144 = vmatprep.mubr.bf16.mxu1 %v3407_v2 }
  0x98   : > { %2982 = vmatmul.mubr.msk.bf16.gmra.mrb[60].mxu0 %vm499_vm0, %v3101_v32  ;;  %3015 = vmatmul.mubr.msk.bf16.gmra.mrb[60].mxu1 %vm499_vm0, %v3101_v32 }
  0x99   : > { %791 = vmatprep.mubr.bf16.mxu0 %v3407_v2  ;;  %1154 = vmatprep.mubr.bf16.mxu1 %v3407_v2 }
  0xa0   : > { %2983 = vmatmul.mubr.msk.bf16.gmra.mrb[64].mxu0 %vm499_vm0, %v3102_v33  ;;  %3016 = vmatmul.mubr.msk.bf16.gmra.mrb[64].mxu1 %vm499_vm0, %v3102_v33 }
  0xa1   : > { %801 = vmatprep.mubr.bf16.mxu0 %v3407_v2  ;;  %1164 = vmatprep.mubr.bf16.mxu1 %v3407_v2 }
  0xa8   : > { %2984 = vmatmul.mubr.msk.bf16.gmra.mrb[68].mxu0 %vm499_vm0, %v3103_v34  ;;  %3017 = vmatmul.mubr.msk.bf16.gmra.mrb[68].mxu1 %vm499_vm0, %v3103_v34 }
  0xa9   : > { %811 = vmatprep.mubr.bf16.mxu0 %v3407_v2  ;;  %1174 = vmatprep.mubr.bf16.mxu1 %v3407_v2 }
  0xb0   : > { %2985 = vmatmul.mubr.msk.bf16.gmra.mrb[72].mxu0 %vm499_vm0, %v3104_v35  ;;  %3018 = vmatmul.mubr.msk.bf16.gmra.mrb[72].mxu1 %vm499_vm0, %v3104_v35 }
  0xb1   : > { %821 = vmatprep.mubr.bf16.mxu0 %v3407_v2  ;;  %1184 = vmatprep.mubr.bf16.mxu1 %v3407_v2 }
  0xb8   : > { %2986 = vmatmul.mubr.msk.bf16.gmra.mrb[76].mxu0 %vm499_vm0, %v3105_v36  ;;  %3019 = vmatmul.mubr.msk.bf16.gmra.mrb[76].mxu1 %vm499_vm0, %v3105_v36 }
  0xb9   : > { %831 = vmatprep.mubr.bf16.mxu0 %v3407_v2  ;;  %1194 = vmatprep.mubr.bf16.mxu1 %v3407_v2 }
  0xc0   : > { %2987 = vmatmul.mubr.msk.bf16.gmra.mrb[80].mxu0 %vm499_vm0, %v3106_v37  ;;  %3020 = vmatmul.mubr.msk.bf16.gmra.mrb[80].mxu1 %vm499_vm0, %v3106_v37 }
  0xc1   : > { %841 = vmatprep.mubr.bf16.mxu0 %v3407_v2  ;;  %1204 = vmatprep.mubr.bf16.mxu1 %v3407_v2 }
  0xc8   : > { %2988 = vmatmul.mubr.msk.bf16.gmra.mrb[84].mxu0 %vm499_vm0, %v3107_v38  ;;  %3021 = vmatmul.mubr.msk.bf16.gmra.mrb[84].mxu1 %vm499_vm0, %v3107_v38 }
  0xc9   : > { %851 = vmatprep.mubr.bf16.mxu0 %v3407_v2  ;;  %1214 = vmatprep.mubr.bf16.mxu1 %v3407_v2 }
  0xd0   : > { %2989 = vmatmul.mubr.msk.bf16.gmra.mrb[88].mxu0 %vm499_vm0, %v3108_v39  ;;  %3022 = vmatmul.mubr.msk.bf16.gmra.mrb[88].mxu1 %vm499_vm0, %v3108_v39 }
  0xd1   : > { %861 = vmatprep.mubr.bf16.mxu0 %v3407_v2  ;;  %1224 = vmatprep.mubr.bf16.mxu1 %v3407_v2 }
  0xd8   : > { %2990 = vmatmul.mubr.msk.bf16.gmra.mrb[92].mxu0 %vm499_vm0, %v3109_v40  ;;  %3023 = vmatmul.mubr.msk.bf16.gmra.mrb[92].mxu1 %vm499_vm0, %v3109_v40 }
  0xd9   : > { %871 = vmatprep.mubr.bf16.mxu0 %v3407_v2  ;;  %1234 = vmatprep.mubr.bf16.mxu1 %v3407_v2 }
  0xe0   : > { %2991 = vmatmul.mubr.msk.bf16.gmra.mrb[96].mxu0 %vm499_vm0, %v3110_v41  ;;  %3024 = vmatmul.mubr.msk.bf16.gmra.mrb[96].mxu1 %vm499_vm0, %v3110_v41 }
  0xe1   : > { %881 = vmatprep.mubr.bf16.mxu0 %v3407_v2  ;;  %1244 = vmatprep.mubr.bf16.mxu1 %v3407_v2 }
  0xe8   : > { %2992 = vmatmul.mubr.msk.bf16.gmra.mrb[100].mxu0 %vm499_vm0, %v3111_v42  ;;  %3025 = vmatmul.mubr.msk.bf16.gmra.mrb[100].mxu1 %vm499_vm0, %v3111_v42 }
  0xe9   : > { %891 = vmatprep.mubr.bf16.mxu0 %v3407_v2  ;;  %1254 = vmatprep.mubr.bf16.mxu1 %v3407_v2 }
  0xf0   : > { %2993 = vmatmul.mubr.msk.bf16.gmra.mrb[104].mxu0 %vm499_vm0, %v3112_v43  ;;  %3026 = vmatmul.mubr.msk.bf16.gmra.mrb[104].mxu1 %vm499_vm0, %v3112_v43 }
  0xf1   : > { %901 = vmatprep.mubr.bf16.mxu0 %v3407_v2  ;;  %1264 = vmatprep.mubr.bf16.mxu1 %v3407_v2 }
  0xf3   : > { %v633_v44 = vpop.f32.mrb[0].mxu0  ;;  %v996_v45 = vpop.f32.mrb[0].mxu1 }
  0xf4   : > { %v1325_v46 = vmul.f32 %v633_v44, %v633_v44  ;;  %v1457_v47 = vmul.f32 %v996_v45, %v996_v45  ;;  %v635_v48 = vpop.f32.mrb[1].mxu0  ;;  %v998_v49 = vpop.f32.mrb[1].mxu1 }
  0xf5   : > { %v1326_v51 = vmul.f32 %v635_v48, %v635_v48  ;;  %v1458_v52 = vmul.f32 %v998_v49, %v998_v49  ;;  %v637_v53 = vpop.f32.mrb[2].mxu0  ;;  %v1000_v54 = vpop.f32.mrb[2].mxu1 }
  0xf6   : > { %v3635_v55 = vadd.f32 %v1457_v47, %v1325_v46  ;;  %v1327_v56 = vmul.f32 %v637_v53, %v637_v53  ;;  %v1459_v57 = vmul.f32 %v1000_v54, %v1000_v54  ;;  %v639_v58 = vpop.f32.mrb[3].mxu0  ;;  %v1002_v59 = vpop.f32.mrb[3].mxu1  ;;  %v3116_v47 = vld [vmem:[%s3491_s21 + $0xf0] sm:$0xff]  }
  0xf7   : > { %v3637_v60 = vadd.f32 %v1458_v52, %v1326_v51  ;;  %v1328_v61 = vmul.f32 %v639_v58, %v639_v58  ;;  %v1460_v62 = vmul.f32 %v1002_v59, %v1002_v59 }
  0xf8   : > { %2994 = vmatmul.mubr.msk.bf16.gmra.mrb[108].mxu0 %vm499_vm0, %v3113_v50  ;;  %3027 = vmatmul.mubr.msk.bf16.gmra.mrb[108].mxu1 %vm499_vm0, %v3113_v50  ;;  %v3643_v63 = vadd.f32 %v1459_v57, %v1327_v56  ;;  %3119 = vrsqrt.f32 %v3635_v55  ;;  %vm1723_vm1 = vcmp.eq.f32.partialorder %v3635_v55, inf  ;;  %vm1725_vm2 = vcmp.eq.f32.partialorder %v3635_v55, 0.0 }
  0xf9   : > { %911 = vmatprep.mubr.bf16.mxu0 %v3407_v2  ;;  %1274 = vmatprep.mubr.bf16.mxu1 %v3407_v2  ;;  %v3645_v0 = vadd.f32 %v1460_v62, %v1328_v61  ;;  %3121 = vrsqrt.f32 %v3637_v60  ;;  %vm1730_vm3 = vcmp.eq.f32.partialorder %v3637_v60, inf  ;;  %vm1732_vm4 = vcmp.eq.f32.partialorder %v3637_v60, 0.0 }
  0xfa   : > { %3123 = vrsqrt.f32 %v3643_v63  ;;  %vm1737_vm5 = vcmp.eq.f32.partialorder %v3643_v63, inf  ;;  %vm1739_vm7 = vcmp.eq.f32.partialorder %v3643_v63, 0.0 }
  0xfb   : > { %v643_v1 = vpop.f32.mrb[4].mxu0  ;;  %v1006_v3 = vpop.f32.mrb[4].mxu1  ;;  %3125 = vrsqrt.f32 %v3645_v0  ;;  %vm1744_vm6 = vcmp.eq.f32.partialorder %v3645_v0, inf  ;;  %vm1746_vm8 = vcmp.eq.f32.partialorder %v3645_v0, 0.0 }
  0xfc   : > { %v645_v4 = vpop.f32.mrb[5].mxu0  ;;  %v1008_v5 = vpop.f32.mrb[5].mxu1  ;;  %v1329_v9 = vmul.f32 %v643_v1, %v643_v1  ;;  %v1461_v10 = vmul.f32 %v1006_v3, %v1006_v3 }
  0xfd   : > { %v647_v7 = vpop.f32.mrb[6].mxu0  ;;  %v1010_v8 = vpop.f32.mrb[6].mxu1  ;;  %v1330_v11 = vmul.f32 %v645_v4, %v645_v4  ;;  %v1462_v12 = vmul.f32 %v1008_v5, %v1008_v5  ;;  %v3117_v5 = vld [vmem:[%s3491_s21 + $0xf8] sm:$0xff]  }
  0xfe   : > { %v649_v13 = vpop.f32.mrb[7].mxu0  ;;  %v1012_v14 = vpop.f32.mrb[7].mxu1  ;;  %v1331_v15 = vmul.f32 %v647_v7, %v647_v7  ;;  %v1463_v16 = vmul.f32 %v1010_v8, %v1010_v8  ;;  %v3648_v19 = vadd.f32 %v1461_v10, %v1329_v9 }
  0xff   : > { %v1332_v17 = vmul.f32 %v649_v13, %v649_v13  ;;  %v1464_v18 = vmul.f32 %v1012_v14, %v1012_v14  ;;  %v3650_v20 = vadd.f32 %v1462_v12, %v1330_v11 }
 0x100   : > { %2995 = vmatmul.mubr.msk.bf16.gmra.mrb[112].mxu0 %vm499_vm0, %v3114_v6  ;;  %3028 = vmatmul.mubr.msk.bf16.gmra.mrb[112].mxu1 %vm499_vm0, %v3114_v6  ;;  %v3654_v21 = vadd.f32 %v1463_v16, %v1331_v15  ;;  %3127 = vrsqrt.f32 %v3648_v19  ;;  %vm1751_vm9 = vcmp.eq.f32.partialorder %v3648_v19, inf  ;;  %vm1753_vm12 = vcmp.eq.f32.partialorder %v3648_v19, 0.0 }
 0x101   : > { %v3656_v22 = vadd.f32 %v1464_v18, %v1332_v17  ;;  %921 = vmatprep.mubr.bf16.mxu0 %v3407_v2  ;;  %1284 = vmatprep.mubr.bf16.mxu1 %v3407_v2  ;;  %3129 = vrsqrt.f32 %v3650_v20  ;;  %vm1758_vm10 = vcmp.eq.f32.partialorder %v3650_v20, inf  ;;  %vm1760_vm13 = vcmp.eq.f32.partialorder %v3650_v20, 0.0 }
 0x102   : > { %3131 = vrsqrt.f32 %v3654_v21  ;;  %vm1765_vm11 = vcmp.eq.f32.partialorder %v3654_v21, inf  ;;  %vm1767_vm15 = vcmp.eq.f32.partialorder %v3654_v21, 0.0 }
 0x103   : > { %v653_v23 = vpop.f32.mrb[8].mxu0  ;;  %v1016_v24 = vpop.f32.mrb[8].mxu1  ;;  %3133 = vrsqrt.f32 %v3656_v22  ;;  %vm1772_vm14 = vcmp.eq.f32.partialorder %v3656_v22, inf }
 0x104   : > { %v655_v25 = vpop.f32.mrb[9].mxu0  ;;  %v1018_v26 = vpop.f32.mrb[9].mxu1  ;;  %v1333_v32 = vmul.f32 %v653_v23, %v653_v23  ;;  %v1465_v33 = vmul.f32 %v1016_v24, %v1016_v24 }
 0x105   : > { %v657_v28 = vpop.f32.mrb[10].mxu0  ;;  %v1020_v29 = vpop.f32.mrb[10].mxu1  ;;  %v1334_v34 = vmul.f32 %v655_v25, %v655_v25  ;;  %v1466_v35 = vmul.f32 %v1018_v26, %v1018_v26 }
 0x106   : > { %v659_v30 = vpop.f32.mrb[11].mxu0  ;;  %v1022_v31 = vpop.f32.mrb[11].mxu1  ;;  %v1335_v36 = vmul.f32 %v657_v28, %v657_v28  ;;  %v1467_v37 = vmul.f32 %v1020_v29, %v1020_v29  ;;  %v3663_v38 = vadd.f32 %v1465_v33, %v1333_v32  ;;  %v3118_v28 = vld [vmem:[%s3491_s21 + $0x100] sm:$0xff]  }
 0x107   : > { %v3665_v39 = vadd.f32 %v1466_v35, %v1334_v34  ;;  %v1336_v43 = vmul.f32 %v659_v30, %v659_v30  ;;  %v1468_v44 = vmul.f32 %v1022_v31, %v1022_v31 }
 0x108   : > { %2996 = vmatmul.mubr.msk.bf16.gmra.mrb[116].mxu0 %vm499_vm0, %v3115_v27  ;;  %3029 = vmatmul.mubr.msk.bf16.gmra.mrb[116].mxu1 %vm499_vm0, %v3115_v27  ;;  %v3668_v40 = vadd.f32 %v1467_v37, %v1335_v36  ;;  %v3120_v37 = vpop.eup %3119  ;;  %3135 = vrsqrt.f32 %v3663_v38 }
 0x109   : > { %931 = vmatprep.mubr.bf16.mxu0 %v3407_v2  ;;  %1294 = vmatprep.mubr.bf16.mxu1 %v3407_v2  ;;  %v3672_v52 = vadd.f32 %v1468_v44, %v1336_v43  ;;  %v3122_v43 = vpop.eup %3121  ;;  %3137 = vrsqrt.f32 %v3665_v39 }
 0x10a   : > { %3139 = vrsqrt.f32 %v3668_v40 }
 0x10b   : > { %v663_v41 = vpop.f32.mrb[12].mxu0  ;;  %v1026_v42 = vpop.f32.mrb[12].mxu1  ;;  %3141 = vrsqrt.f32 %v3672_v52 }
 0x10c   : > { %v665_v45 = vpop.f32.mrb[13].mxu0  ;;  %v1028_v46 = vpop.f32.mrb[13].mxu1  ;;  %v1337_v53 = vmul.f32 %v663_v41, %v663_v41  ;;  %v1469_v54 = vmul.f32 %v1026_v42, %v1026_v42 }
 0x10d   : > { %v667_v48 = vpop.f32.mrb[14].mxu0  ;;  %v1030_v49 = vpop.f32.mrb[14].mxu1  ;;  %v1338_v59 = vmul.f32 %v665_v45, %v665_v45  ;;  %v1470_v61 = vmul.f32 %v1028_v46, %v1028_v46 }
 0x10e   : > { %v669_v50 = vpop.f32.mrb[15].mxu0  ;;  %v1032_v51 = vpop.f32.mrb[15].mxu1  ;;  %v3678_v56 = vadd.f32 %v1469_v54, %v1337_v53  ;;  %v1339_v62 = vmul.f32 %v667_v48, %v667_v48  ;;  %v1471_v1 = vmul.f32 %v1030_v49, %v1030_v49  ;;  %v1726_v49 = vand.u32 2147483648, %v3635_v55 }
 0x10f   : > { %v3681_v8 = vadd.f32 %v1470_v61, %v1338_v59  ;;  %v1340_v12 = vmul.f32 %v669_v50, %v669_v50  ;;  %v1472_v13 = vmul.f32 %v1032_v51, %v1032_v51  ;;  %v3124_v48 = vpop.eup %3123  ;;  %v1733_v50 = vand.u32 2147483648, %v3637_v60 }
 0x110   : > { %2997 = vmatmul.mubr.msk.bf16.gmra.mrb[120].mxu0 %vm499_vm0, %v3116_v47  ;;  %3030 = vmatmul.mubr.msk.bf16.gmra.mrb[120].mxu1 %vm499_vm0, %v3116_v47  ;;  %v3683_v9 = vadd.f32 %v1471_v1, %v1339_v62  ;;  %v3126_v54 = vpop.eup %3125  ;;  %v1729_v62 = vmul.f32 %v3122_v43, %v3637_v60  ;;  %v1747_v1 = vand.u32 2147483648, %v3645_v0  ;;  %3143 = vrsqrt.f32 %v3678_v56 }
 0x111   : > { %941 = vmatprep.mubr.bf16.mxu0 %v3407_v2  ;;  %1304 = vmatprep.mubr.bf16.mxu1 %v3407_v2  ;;  %v3693_v16 = vadd.f32 %v1472_v13, %v1340_v12  ;;  %v1743_v12 = vmul.f32 %v3126_v54, %v3645_v0  ;;  %3145 = vrsqrt.f32 %v3681_v8 }
 0x112   : > { %3147 = vrsqrt.f32 %v3683_v9 }
 0x113   : > { %v673_v57 = vpop.f32.mrb[16].mxu0  ;;  %v1036_v58 = vpop.f32.mrb[16].mxu1  ;;  %v1745_v43 = vsel %vm1744_vm6, %v3645_v0, %v1743_v12  ;;  %vm1795_vm6 = vcmp.eq.f32.partialorder %v3668_v40, 0.0  ;;  %3149 = vrsqrt.f32 %v3693_v16 }
 0x114   : > { %v675_v3 = vpop.f32.mrb[17].mxu0  ;;  %v1038_v4 = vpop.f32.mrb[17].mxu1  ;;  %v1341_v14 = vmul.f32 %v673_v57, %v673_v57  ;;  %v1473_v15 = vmul.f32 %v1036_v58, %v1036_v58  ;;  %v1722_v57 = vmul.f32 %v3120_v37, %v3635_v55  ;;  %v1740_v58 = vand.u32 2147483648, %v3643_v63 }
 0x115   : > { %v677_v6 = vpop.f32.mrb[18].mxu0  ;;  %v1040_v7 = vpop.f32.mrb[18].mxu1  ;;  %v1342_v17 = vmul.f32 %v675_v3, %v675_v3  ;;  %v1474_v25 = vmul.f32 %v1038_v4, %v1038_v4 }
 0x116   : > { %v679_v10 = vpop.f32.mrb[19].mxu0  ;;  %v1042_v11 = vpop.f32.mrb[19].mxu1  ;;  %v3695_v24 = vadd.f32 %v1473_v15, %v1341_v14  ;;  %v1343_v31 = vmul.f32 %v677_v6, %v677_v6  ;;  %v1475_v34 = vmul.f32 %v1040_v7, %v1040_v7  ;;  %v1736_v6 = vmul.f32 %v3124_v48, %v3643_v63 }
 0x117   : > { %v1344_v35 = vmul.f32 %v679_v10, %v679_v10  ;;  %v1476_v36 = vmul.f32 %v1042_v11, %v1042_v11 }
 0x118   : > { %2998 = vmatmul.mubr.msk.bf16.gmra.mrb[124].mxu0 %vm499_vm0, %v3117_v5  ;;  %3031 = vmatmul.mubr.msk.bf16.gmra.mrb[124].mxu1 %vm499_vm0, %v3117_v5  ;;  %v3706_v41 = vadd.f32 %v1475_v34, %v1343_v31  ;;  %v1768_v31 = vand.u32 2147483648, %v3654_v21  ;;  %v1738_v37 = vsel %vm1737_vm5, %v3643_v63, %v1736_v6  ;;  %vm1788_vm5 = vcmp.eq.f32.partialorder %v3665_v39, 0.0 }
 0x119   : > { %951 = vmatprep.mubr.bf16.mxu0 %v3407_v2  ;;  %1314 = vmatprep.mubr.bf16.mxu1 %v3407_v2  ;;  %v3699_v2 = vadd.f32 %v1474_v25, %v1342_v17  ;;  %v3708_v42 = vadd.f32 %v1476_v36, %v1344_v35  ;;  %v3128_v17 = vpop.eup %3127  ;;  %3151 = vrsqrt.f32 %v3695_v24 }
 0x11a   : > { %v3130_v25 = vpop.eup %3129  ;;  %v1750_v48 = vmul.f32 %v3128_v17, %v3648_v19 }
 0x11b   : > { %v683_v18 = vpop.f32.mrb[20].mxu0  ;;  %v1046_v23 = vpop.f32.mrb[20].mxu1  ;;  %3153 = vrsqrt.f32 %v3699_v2 }
 0x11c   : > { %v685_v26 = vpop.f32.mrb[21].mxu0  ;;  %v1048_v27 = vpop.f32.mrb[21].mxu1  ;;  %v1345_v44 = vmul.f32 %v683_v18, %v683_v18  ;;  %v1477_v45 = vmul.f32 %v1046_v23, %v1046_v23  ;;  %v1724_v18 = vsel %vm1723_vm1, %v3635_v55, %v1722_v57  ;;  %v1754_v23 = vand.u32 2147483648, %v3648_v19 }
 0x11d   : > { %v687_v29 = vpop.f32.mrb[22].mxu0  ;;  %v1050_v30 = vpop.f32.mrb[22].mxu1  ;;  %v1346_v3 = vmul.f32 %v685_v26, %v685_v26  ;;  %v1478_v10 = vmul.f32 %v1048_v27, %v1048_v27  ;;  %v1731_v26 = vsel %vm1730_vm3, %v3637_v60, %v1729_v62  ;;  %v3771_v36 = vsel %vm1725_vm2, %v1726_v49, %v1724_v18 }
 0x11e   : > { %v689_v32 = vpop.f32.mrb[23].mxu0  ;;  %v1052_v33 = vpop.f32.mrb[23].mxu1  ;;  %v3742_v7 = vadd.f32 %v1477_v45, %v1345_v44  ;;  %v1347_v11 = vmul.f32 %v687_v29, %v687_v29  ;;  %v1479_v13 = vmul.f32 %v1050_v30, %v1050_v30  ;;  %v1761_v30 = vand.u32 2147483648, %v3650_v20 }
 0x11f   : > { %v1348_v14 = vmul.f32 %v689_v32, %v689_v32  ;;  %v1480_v15 = vmul.f32 %v1052_v33, %v1052_v33  ;;  %v3756_v27 = vadd.f32 %v1478_v10, %v1346_v3  ;;  %v3132_v29 = vpop.eup %3131  ;;  %v3788_v55 = vsel %vm1732_vm4, %v1733_v50, %v1731_v26 }
 0x120   : > { %2999 = vmatmul.mubr.msk.bf16.gmra.mrb[128].mxu0 %vm499_vm0, %v3118_v28  ;;  %3032 = vmatmul.mubr.msk.bf16.gmra.mrb[128].mxu1 %vm499_vm0, %v3118_v28  ;;  %v3758_v28 = vadd.f32 %v1479_v13, %v1347_v11  ;;  %v3134_v35 = vpop.eup %3133  ;;  %6330 = vst [vmem:[#allocation2_spill] sm:$0xff] %v3788_v55  ;;  %vm1774_vm0 = vcmp.eq.f32.partialorder %v3656_v22, 0.0  ;;  %v1775_v49 = vand.u32 2147483648, %v3656_v22  ;;  %v1757_v62 = vmul.f32 %v3130_v25, %v3650_v20 }
 0x121   : > { %v3763_v32 = vadd.f32 %v1480_v15, %v1348_v14  ;;  %v1764_v60 = vmul.f32 %v3132_v29, %v3654_v21  ;;  %v3810_v10 = vsel %vm1739_vm7, %v1740_v58, %v1738_v37  ;;  %v3814_v11 = vsel %vm1746_vm8, %v1747_v1, %v1745_v43  ;;  %v3136_v13 = vpop.eup %3135 }
 0x122   : > { %6331 = vst [vmem:[#allocation3_spill] sm:$0xff] %v3810_v10  ;;  %6332 = vst [vmem:[#allocation4_spill] sm:$0xff] %v3814_v11  ;;  %v1771_v12 = vmul.f32 %v3134_v35, %v3656_v22  ;;  %vm1779_vm1 = vcmp.eq.f32.partialorder %v3663_v38, inf  ;;  %v1782_v14 = vand.u32 2147483648, %v3663_v38  ;;  %v1752_v0 = vsel %vm1751_vm9, %v3648_v19, %v1750_v48 }
 0x123   : > { %v3712_v46 = vpop.f32.mrb[24].mxu0  ;;  %v3714_v47 = vpop.f32.mrb[24].mxu1  ;;  %vm1781_vm2 = vcmp.eq.f32.partialorder %v3663_v38, 0.0  ;;  %vm1786_vm3 = vcmp.eq.f32.partialorder %v3665_v39, inf  ;;  %vm1793_vm4 = vcmp.eq.f32.partialorder %v3668_v40, inf  ;;  %vm1800_vm7 = vcmp.eq.f32.partialorder %v3672_v52, inf }
 0x124   : > { %v3720_v51 = vpop.f32.mrb[25].mxu0  ;;  %v3722_v53 = vpop.f32.mrb[25].mxu1  ;;  %v1349_v50 = vmul.f32 %v3712_v46, %v3712_v46  ;;  %v1789_v46 = vand.u32 2147483648, %v3665_v39  ;;  %v1481_v15 = vmul.f32 %v3714_v47, %v3714_v47  ;;  %v1759_v47 = vsel %vm1758_vm10, %v3650_v20, %v1757_v62 }
 0x125   : > { %v3728_v59 = vpop.f32.mrb[26].mxu0  ;;  %v3730_v61 = vpop.f32.mrb[26].mxu1  ;;  %v1350_v63 = vmul.f32 %v3720_v51, %v3720_v51  ;;  %v1482_v58 = vmul.f32 %v3722_v53, %v3722_v53  ;;  %v1766_v51 = vsel %vm1765_vm11, %v3654_v21, %v1764_v60  ;;  %vm1802_vm8 = vcmp.eq.f32.partialorder %v3672_v52, 0.0 }
 0x126   : > { %v3737_v4 = vpop.f32.mrb[27].mxu0  ;;  %v3739_v5 = vpop.f32.mrb[27].mxu1  ;;  %v1351_v1 = vmul.f32 %v3728_v59, %v3728_v59  ;;  %v1483_v17 = vmul.f32 %v3730_v61, %v3730_v61  ;;  %v3842_v18 = vadd.f32 %v1481_v15, %v1349_v50  ;;  %v1773_v59 = vsel %vm1772_vm14, %v3656_v22, %v1771_v12 }
 0x127   : > { %v3138_v53 = vpop.eup %3137  ;;  %v1778_v61 = vmul.f32 %v3136_v13, %v3663_v38  ;;  %v3848_v25 = vadd.f32 %v1482_v58, %v1350_v63  ;;  %v1352_v43 = vmul.f32 %v3737_v4, %v3737_v4  ;;  %v1484_v48 = vmul.f32 %v3739_v5, %v3739_v5 }
 0x128   : > { %v3850_v26 = vadd.f32 %v1483_v17, %v1351_v1  ;;  %v3140_v37 = vpop.eup %3139  ;;  %v3870_v50 = vsel %vm1753_vm12, %v1754_v23, %v1752_v0  ;;  %v3876_v12 = vsel %vm1760_vm13, %v1761_v30, %v1759_v47  ;;  %v1796_v4 = vand.u32 2147483648, %v3668_v40 }
 0x129   : > { %6333 = vst [vmem:[#allocation5_spill] sm:$0xff] %v3870_v50  ;;  %6334 = vst [vmem:[#allocation6_spill] sm:$0xff] %v3876_v12  ;;  %v3889_v19 = vsel %vm1767_vm15, %v1768_v31, %v1766_v51  ;;  %v3893_v20 = vsel %vm1774_vm0, %v1775_v49, %v1773_v59  ;;  %v3142_v15 = vpop.eup %3141  ;;  %v1780_v63 = vsel %vm1779_vm1, %v3663_v38, %v1778_v61  ;;  %v1803_v1 = vand.u32 2147483648, %v3672_v52 }
 0x12a   : > { %6335 = vst [vmem:[#allocation7_spill] sm:$0xff] %v3889_v19  ;;  %6336 = vst [vmem:[#allocation8_spill] sm:$0xff] %v3893_v20  ;;  %v1785_v21 = vmul.f32 %v3138_v53, %v3665_v39  ;;  %v1792_v31 = vmul.f32 %v3140_v37, %v3668_v40  ;;  %v3144_v22 = vpop.eup %3143  ;;  %v3908_v49 = vadd.f32 %v1484_v48, %v1352_v43  ;;  %vm1807_vm9 = vcmp.eq.f32.partialorder %v3678_v56, inf }
 0x12b   : > { %v3765_v33 = vpop.f32.mrb[28].mxu0  ;;  %v3767_v34 = vpop.f32.mrb[28].mxu1  ;;  %v3923_v51 = vsel %vm1781_vm2, %v1782_v14, %v1780_v63  ;;  %vm1809_vm10 = vcmp.eq.f32.partialorder %v3678_v56, 0.0  ;;  %vm1814_vm11 = vcmp.eq.f32.partialorder %v3681_v8, inf  ;;  %v1799_v38 = vmul.f32 %v3142_v15, %v3672_v52 }
 0x12c   : > { %v3782_v44 = vpop.f32.mrb[29].mxu0  ;;  %v3784_v45 = vpop.f32.mrb[29].mxu1  ;;  %v1353_v0 = vmul.f32 %v3765_v33, %v3765_v33  ;;  %v1485_v58 = vmul.f32 %v3767_v34, %v3767_v34  ;;  %6337 = vst [vmem:[#allocation9_spill] sm:$0xff] %v3923_v51  ;;  %v1810_v33 = vand.u32 2147483648, %v3678_v56  ;;  %v1787_v53 = vsel %vm1786_vm3, %v3665_v39, %v1785_v21 }
 0x12d   : > { %v3795_v54 = vpop.f32.mrb[30].mxu0  ;;  %v3797_v57 = vpop.f32.mrb[30].mxu1  ;;  %v1354_v17 = vmul.f32 %v3782_v44, %v3782_v44  ;;  %v1486_v47 = vmul.f32 %v3784_v45, %v3784_v45  ;;  %v1794_v44 = vsel %vm1793_vm4, %v3668_v40, %v1792_v31  ;;  %v1806_v45 = vmul.f32 %v3144_v22, %v3678_v56 }
 0x12e   : > { %v3804_v3 = vpop.f32.mrb[31].mxu0  ;;  %v3806_v6 = vpop.f32.mrb[31].mxu1  ;;  %3155 = vrsqrt.f32 %v3706_v41  ;;  %v3942_v37 = vadd.f32 %v1485_v58, %v1353_v0  ;;  %v1355_v48 = vmul.f32 %v3795_v54, %v3795_v54  ;;  %vm1821_vm12 = vcmp.eq.f32.partialorder %v3683_v9, inf }
 0x12f   : > { %v3146_v61 = vpop.eup %3145  ;;  %v3944_v43 = vadd.f32 %v1486_v47, %v1354_v17  ;;  %v1487_v15 = vmul.f32 %v3797_v57, %v3797_v57  ;;  %v1356_v31 = vmul.f32 %v3804_v3, %v3804_v3  ;;  %v1488_v22 = vmul.f32 %v3806_v6, %v3806_v6 }
 0x130   : > { %v3148_v54 = vpop.eup %3147  ;;  %v3967_v17 = vsel %vm1788_vm5, %v1789_v46, %v1787_v53  ;;  %v3971_v57 = vsel %vm1795_vm6, %v1796_v4, %v1794_v44  ;;  %vm1816_vm13 = vcmp.eq.f32.partialorder %v3681_v8, 0.0  ;;  %3157 = vrsqrt.f32 %v3708_v42 }
 0x131   : > { %6338 = vst [vmem:[#allocation10_spill] sm:$0xff] %v3967_v17  ;;  %6339 = vst [vmem:[#allocation11_spill] sm:$0xff] %v3971_v57  ;;  %v1801_v39 = vsel %vm1800_vm7, %v3672_v52, %v1799_v38  ;;  %v1813_v46 = vmul.f32 %v3146_v61, %v3681_v8  ;;  %vm1828_vm14 = vcmp.eq.f32.partialorder %v3693_v16, inf  ;;  %v3150_v4 = vpop.eup %3149  ;;  %v1808_v53 = vsel %vm1807_vm9, %v3678_v56, %v1806_v45 }
 0x132   : > { %vm1823_vm15 = vcmp.eq.f32.partialorder %v3683_v9, 0.0  ;;  %vm1835_vm0 = vcmp.eq.f32.partialorder %v3695_v24, inf  ;;  %v3991_v44 = vadd.f32 %v1487_v15, %v1355_v48  ;;  %v3993_v3 = vadd.f32 %v1488_v22, %v1356_v31  ;;  %v3152_v38 = vpop.eup %3151 }
 0x133   : > { %v3852_v29 = vpop.f32.mrb[32].mxu0  ;;  %v3854_v35 = vpop.f32.mrb[32].mxu1  ;;  %v1820_v61 = vmul.f32 %v3148_v54, %v3683_v9  ;;  %3159 = vrsqrt.f32 %v3742_v7  ;;  %v4003_v57 = vsel %vm1802_vm8, %v1803_v1, %v1801_v39  ;;  %vm1830_vm1 = vcmp.eq.f32.partialorder %v3693_v16, 0.0 }
 0x134   : > { %v3862_v62 = vpop.f32.mrb[33].mxu0  ;;  %v3864_v60 = vpop.f32.mrb[33].mxu1  ;;  %v1357_v40 = vmul.f32 %v3852_v29, %v3852_v29  ;;  %v1489_v34 = vmul.f32 %v3854_v35, %v3854_v35  ;;  %6340 = vst [vmem:[#allocation12_spill] sm:$0xff] %v4003_v57  ;;  %vm1837_vm2 = vcmp.eq.f32.partialorder %v3695_v24, 0.0  ;;  %v1838_v48 = vand.u32 2147483648, %v3695_v24 }
 0x135   : > { %v3881_v5 = vpop.f32.mrb[34].mxu0  ;;  %v3883_v13 = vpop.f32.mrb[34].mxu1  ;;  %vm1842_vm3 = vcmp.eq.f32.partialorder %v3699_v2, inf  ;;  %3161 = vrsqrt.f32 %v3756_v27  ;;  %v4012_v29 = vsel %vm1809_vm10, %v1810_v33, %v1808_v53  ;;  %v1815_v52 = vsel %vm1814_vm11, %v3681_v8, %v1813_v46 }
 0x136   : > { %v3897_v23 = vpop.f32.mrb[35].mxu0  ;;  %v3899_v30 = vpop.f32.mrb[35].mxu1  ;;  %6341 = vst [vmem:[#allocation13_spill] sm:$0xff] %v4012_v29  ;;  %v1845_v35 = vand.u32 2147483648, %v3699_v2  ;;  %3163 = vrsqrt.f32 %v3758_v28  ;;  %v1827_v31 = vmul.f32 %v3150_v4, %v3693_v16  ;;  %v1834_v22 = vmul.f32 %v3152_v38, %v3695_v24 }
 0x137   : > { %v3154_v45 = vpop.eup %3153  ;;  %vm1844_vm4 = vcmp.eq.f32.partialorder %v3699_v2, 0.0  ;;  %vm1849_vm5 = vcmp.eq.f32.partialorder %v3706_v41, inf  ;;  %3165 = vrsqrt.f32 %v3763_v32  ;;  %v1358_v56 = vmul.f32 %v3862_v62, %v3862_v62 }
 0x138   : > { %v1822_v39 = vsel %vm1821_vm12, %v3683_v9, %v1820_v61  ;;  %v1841_v46 = vmul.f32 %v3154_v45, %v3699_v2  ;;  %v4038_v4 = vadd.f32 %v1489_v34, %v1357_v40  ;;  %v1490_v53 = vmul.f32 %v3864_v60, %v3864_v60  ;;  %v3156_v62 = vpop.eup %3155 }
 0x139   : > { %v1359_v57 = vmul.f32 %v3881_v5, %v3881_v5  ;;  %v1491_v17 = vmul.f32 %v3883_v13, %v3883_v13  ;;  %v1360_v61 = vmul.f32 %v3897_v23, %v3897_v23  ;;  %v1492_v34 = vmul.f32 %v3899_v30, %v3899_v30 }
 0x13a   : > { %v6342_v45 = vand.u32 2147483648, %v3681_v8  ;;  %vm1851_vm6 = vcmp.eq.f32.partialorder %v3706_v41, 0.0  ;;  %v1852_v5 = vand.u32 2147483648, %v3706_v41  ;;  %vm1856_vm7 = vcmp.eq.f32.partialorder %v3708_v42, inf  ;;  %v3158_v13 = vpop.eup %3157 }
 0x13b   : > { %v3937_v14 = vpop.f32.mrb[36].mxu0  ;;  %v3939_v59 = vpop.f32.mrb[36].mxu1  ;;  %v1829_v23 = vsel %vm1828_vm14, %v3693_v16, %v1827_v31  ;;  %v1836_v30 = vsel %vm1835_vm0, %v3695_v24, %v1834_v22  ;;  %v4073_v20 = vadd.f32 %v1490_v53, %v1358_v56  ;;  %v4075_v8 = vadd.f32 %v1491_v17, %v1359_v57 }
 0x13c   : > { %v3948_v63 = vpop.f32.mrb[37].mxu0  ;;  %v3950_v21 = vpop.f32.mrb[37].mxu1  ;;  %v4062_v51 = vsel %vm1816_vm13, %v6342_v45, %v1815_v52  ;;  %v6344_v52 = vand.u32 2147483648, %v3683_v9  ;;  %vm1858_vm8 = vcmp.eq.f32.partialorder %v3708_v42, 0.0  ;;  %v1859_v31 = vand.u32 2147483648, %v3708_v42 }
 0x13d   : > { %v3959_v0 = vpop.f32.mrb[38].mxu0  ;;  %v3961_v58 = vpop.f32.mrb[38].mxu1  ;;  %6343 = vst [vmem:[#allocation14_spill] sm:$0xff] %v4062_v51  ;;  %v1848_v51 = vmul.f32 %v3156_v62, %v3706_v41  ;;  %v4086_v19 = vadd.f32 %v1492_v34, %v1360_v61  ;;  %v1843_v22 = vsel %vm1842_vm3, %v3699_v2, %v1841_v46  ;;  %vm1863_vm9 = vcmp.eq.f32.partialorder %v3742_v7, inf }
 0x13e   : > { %v3976_v6 = vpop.f32.mrb[39].mxu0  ;;  %v3978_v47 = vpop.f32.mrb[39].mxu1  ;;  %v4081_v45 = vsel %vm1823_vm15, %v6344_v52, %v1822_v39  ;;  %3167 = vrsqrt.f32 %v3842_v18  ;;  %v1361_v9 = vmul.f32 %v3937_v14, %v3937_v14  ;;  %v1493_v17 = vmul.f32 %v3939_v59, %v3939_v59 }
 0x13f   : > { %6345 = vst [vmem:[#allocation15_spill] sm:$0xff] %v4081_v45  ;;  %v3160_v57 = vpop.eup %3159  ;;  %v6346_v56 = vand.u32 2147483648, %v3693_v16  ;;  %v4105_v46 = vsel %vm1837_vm2, %v1838_v48, %v1836_v30  ;;  %v1855_v53 = vmul.f32 %v3158_v13, %v3708_v42  ;;  %vm1870_vm10 = vcmp.eq.f32.partialorder %v3756_v27, inf }
 0x140   : > { %6348 = vst [vmem:[#allocation17_spill] sm:$0xff] %v4105_v46  ;;  %v3162_v59 = vpop.eup %3161  ;;  %vm1877_vm11 = vcmp.eq.f32.partialorder %v3758_v28, inf  ;;  %3169 = vrsqrt.f32 %v3848_v25  ;;  %v4123_v13 = vsel %vm1844_vm4, %v1845_v35, %v1843_v22  ;;  %vm1865_vm12 = vcmp.eq.f32.partialorder %v3742_v7, 0.0 }
 0x141   : > { %v4101_v39 = vsel %vm1830_vm1, %v6346_v56, %v1829_v23  ;;  %v3164_v48 = vpop.eup %3163  ;;  %6349 = vst [vmem:[#allocation18_spill] sm:$0xff] %v4123_v13  ;;  %v1850_v23 = vsel %vm1849_vm5, %v3706_v41, %v1848_v51  ;;  %3171 = vrsqrt.f32 %v3850_v26  ;;  %vm1872_vm13 = vcmp.eq.f32.partialorder %v3756_v27, 0.0 }
 0x142   : > { %6347 = vst [vmem:[#allocation16_spill] sm:$0xff] %v4101_v39  ;;  %v3166_v34 = vpop.eup %3165  ;;  %vm1884_vm14 = vcmp.eq.f32.partialorder %v3763_v32, inf  ;;  %3173 = vrsqrt.f32 %v3908_v49  ;;  %v4138_v2 = vadd.f32 %v1493_v17, %v1361_v9  ;;  %v1362_v51 = vmul.f32 %v3948_v63, %v3948_v63 }
 0x143   : > { %v4019_v1 = vpop.f32.mrb[40].mxu0  ;;  %v4021_v15 = vpop.f32.mrb[40].mxu1  ;;  %v1857_v30 = vsel %vm1856_vm7, %v3708_v42, %v1855_v53  ;;  %v1862_v62 = vmul.f32 %v3160_v57, %v3742_v7  ;;  %vm1879_vm15 = vcmp.eq.f32.partialorder %v3758_v28, 0.0  ;;  %vm1886_vm0 = vcmp.eq.f32.partialorder %v3763_v32, 0.0 }
 0x144   : > { %v4030_v33 = vpop.f32.mrb[41].mxu0  ;;  %v4032_v54 = vpop.f32.mrb[41].mxu1  ;;  %v1887_v9 = vand.u32 2147483648, %v3763_v32  ;;  %v1494_v17 = vmul.f32 %v3950_v21, %v3950_v21  ;;  %v4157_v63 = vsel %vm1851_vm6, %v1852_v5, %v1850_v23  ;;  %v1869_v13 = vmul.f32 %v3162_v59, %v3756_v27 }
 0x145   : > { %v4042_v38 = vpop.f32.mrb[42].mxu0  ;;  %v4044_v29 = vpop.f32.mrb[42].mxu1  ;;  %6350 = vst [vmem:[#allocation19_spill] sm:$0xff] %v4157_v63  ;;  %v1876_v46 = vmul.f32 %v3164_v48, %v3758_v28  ;;  %v1363_v57 = vmul.f32 %v3959_v0, %v3959_v0  ;;  %v1883_v53 = vmul.f32 %v3166_v34, %v3763_v32  ;;  %3175 = vrsqrt.f32 %v3942_v37 }
 0x146   : > { %v4054_v40 = vpop.f32.mrb[43].mxu0  ;;  %v4056_v60 = vpop.f32.mrb[43].mxu1  ;;  %v4165_v39 = vadd.f32 %v1494_v17, %v1362_v51  ;;  %v1495_v21 = vmul.f32 %v3961_v58, %v3961_v58  ;;  %v4171_v41 = vsel %vm1858_vm8, %v1859_v31, %v1857_v30  ;;  %3177 = vrsqrt.f32 %v3944_v43 }
 0x147   : > { %6351 = vst [vmem:[#allocation20_spill] sm:$0xff] %v4171_v41  ;;  %v1364_v5 = vmul.f32 %v3976_v6, %v3976_v6  ;;  %v1496_v0 = vmul.f32 %v3978_v47, %v3978_v47  ;;  %v1864_v59 = vsel %vm1863_vm9, %v3742_v7, %v1862_v62  ;;  %vm1891_vm1 = vcmp.eq.f32.partialorder %v3842_v18, inf }
 0x148   : > { %v3168_v48 = vpop.eup %3167  ;;  %v1871_v6 = vsel %vm1870_vm10, %v3756_v27, %v1869_v13  ;;  %v1878_v47 = vsel %vm1877_vm11, %v3758_v28, %v1876_v46  ;;  %vm1898_vm2 = vcmp.eq.f32.partialorder %v3848_v25, inf  ;;  %v4195_v62 = vadd.f32 %v1495_v21, %v1363_v57 }
 0x149   : > { %v4197_v23 = vadd.f32 %v1496_v0, %v1364_v5  ;;  %v1885_v17 = vsel %vm1884_vm14, %v3763_v32, %v1883_v53  ;;  %vm1893_vm3 = vcmp.eq.f32.partialorder %v3842_v18, 0.0  ;;  %3179 = vrsqrt.f32 %v3991_v44 }
 0x14a   : > { %v1365_v46 = vmul.f32 %v4019_v1, %v4019_v1  ;;  %v1497_v13 = vmul.f32 %v4021_v15, %v4021_v15  ;;  %v3170_v5 = vpop.eup %3169  ;;  %v6352_v0 = vand.u32 2147483648, %v3742_v7  ;;  %vm1905_vm4 = vcmp.eq.f32.partialorder %v3850_v26, inf }
 0x14b   : > { %v4109_v61 = vpop.f32.mrb[44].mxu0  ;;  %v4111_v14 = vpop.f32.mrb[44].mxu1  ;;  %3181 = vrsqrt.f32 %v3993_v3  ;;  %v6354_v41 = vand.u32 2147483648, %v3756_v27  ;;  %v1890_v7 = vmul.f32 %v3168_v48, %v3842_v18  ;;  %vm1900_vm5 = vcmp.eq.f32.partialorder %v3848_v25, 0.0 }
 0x14c   : > { %v4117_v16 = vpop.f32.mrb[45].mxu0  ;;  %v4119_v24 = vpop.f32.mrb[45].mxu1  ;;  %v4220_v53 = vsel %vm1865_vm12, %v6352_v0, %v1864_v59  ;;  %vm1912_vm6 = vcmp.eq.f32.partialorder %v3908_v49, inf  ;;  %3183 = vrsqrt.f32 %v4038_v4  ;;  %v6356_v0 = vand.u32 2147483648, %v3758_v28 }
 0x14d   : > { %v4131_v52 = vpop.f32.mrb[46].mxu0  ;;  %v4133_v56 = vpop.f32.mrb[46].mxu1  ;;  %6353 = vst [vmem:[#allocation21_spill] sm:$0xff] %v4220_v53  ;;  %v4233_v63 = vsel %vm1872_vm13, %v6354_v41, %v1871_v6  ;;  %v4247_v27 = vsel %vm1886_vm0, %v1887_v9, %v1885_v17  ;;  %vm1907_vm7 = vcmp.eq.f32.partialorder %v3850_v26, 0.0  ;;  %v1915_v41 = vand.u32 2147483648, %v3908_v49 }
 0x14e   : > { %v4142_v35 = vpop.f32.mrb[47].mxu0  ;;  %v4144_v22 = vpop.f32.mrb[47].mxu1  ;;  %6355 = vst [vmem:[#allocation22_spill] sm:$0xff] %v4233_v63  ;;  %v4243_v42 = vsel %vm1879_vm15, %v6356_v0, %v1878_v47  ;;  %6358 = vst [vmem:[#allocation24_spill] sm:$0xff] %v4247_v27  ;;  %v1366_v48 = vmul.f32 %v4030_v33, %v4030_v33  ;;  %v1897_v6 = vmul.f32 %v3170_v5, %v3848_v25  ;;  %vm1914_vm8 = vcmp.eq.f32.partialorder %v3908_v49, 0.0 }
 0x14f   : > { %v3172_v58 = vpop.eup %3171  ;;  %6357 = vst [vmem:[#allocation23_spill] sm:$0xff] %v4243_v42  ;;  %vm1919_vm9 = vcmp.eq.f32.partialorder %v3942_v37, inf  ;;  %v4256_v28 = vadd.f32 %v1497_v13, %v1365_v46  ;;  %v1498_v32 = vmul.f32 %v4032_v54, %v4032_v54  ;;  %v1367_v17 = vmul.f32 %v4042_v38, %v4042_v38 }
 0x150   : > { %v3174_v59 = vpop.eup %3173  ;;  %v1904_v9 = vmul.f32 %v3172_v58, %v3850_v26  ;;  %v1499_v33 = vmul.f32 %v4044_v29, %v4044_v29  ;;  %v1892_v0 = vsel %vm1891_vm1, %v3842_v18, %v1890_v7  ;;  %vm1926_vm10 = vcmp.eq.f32.partialorder %v3944_v43, inf }
 0x151   : > { %v3176_v5 = vpop.eup %3175  ;;  %v1911_v46 = vmul.f32 %v3174_v59, %v3908_v49  ;;  %3185 = vrsqrt.f32 %v4073_v20  ;;  %v4277_v38 = vadd.f32 %v1498_v32, %v1366_v48  ;;  %v1368_v7 = vmul.f32 %v4054_v40, %v4054_v40 }
 0x152   : > { %v3178_v13 = vpop.eup %3177  ;;  %3187 = vrsqrt.f32 %v4075_v8  ;;  %v4279_v29 = vadd.f32 %v1499_v33, %v1367_v17  ;;  %v1899_v27 = vsel %vm1898_vm2, %v3848_v25, %v1897_v6  ;;  %vm1921_vm11 = vcmp.eq.f32.partialorder %v3942_v37, 0.0 }
 0x153   : > { %v4184_v31 = vpop.f32.mrb[48].mxu0  ;;  %v4186_v34 = vpop.f32.mrb[48].mxu1  ;;  %v1500_v42 = vmul.f32 %v4056_v60, %v4056_v60  ;;  %v1369_v48 = vmul.f32 %v4109_v61, %v4109_v61  ;;  %v1501_v32 = vmul.f32 %v4111_v14, %v4111_v14  ;;  %v6359_v33 = vand.u32 2147483648, %v3842_v18 }
 0x154   : > { %v4199_v30 = vpop.f32.mrb[49].mxu0  ;;  %v4201_v51 = vpop.f32.mrb[49].mxu1  ;;  %v1906_v60 = vsel %vm1905_vm4, %v3850_v26, %v1904_v9  ;;  %v1918_v63 = vmul.f32 %v3176_v5, %v3942_v37  ;;  %vm1928_vm12 = vcmp.eq.f32.partialorder %v3944_v43, 0.0  ;;  %v1929_v61 = vand.u32 2147483648, %v3944_v43 }
 0x155   : > { %v4212_v57 = vpop.f32.mrb[50].mxu0  ;;  %v4214_v21 = vpop.f32.mrb[50].mxu1  ;;  %v4305_v6 = vsel %vm1893_vm3, %v6359_v33, %v1892_v0  ;;  %v1913_v18 = vsel %vm1912_vm6, %v3908_v49, %v1911_v46  ;;  %v1925_v0 = vmul.f32 %v3178_v13, %v3944_v43  ;;  %vm1933_vm13 = vcmp.eq.f32.partialorder %v3991_v44, inf }
 0x156   : > { %v4225_v1 = vpop.f32.mrb[51].mxu0  ;;  %v4227_v15 = vpop.f32.mrb[51].mxu1  ;;  %6360 = vst [vmem:[#allocation25_spill] sm:$0xff] %v4305_v6  ;;  %3189 = vrsqrt.f32 %v4086_v19  ;;  %v6361_v5 = vand.u32 2147483648, %v3848_v25  ;;  %v4331_v12 = vadd.f32 %v1500_v42, %v1368_v7  ;;  %v6363_v13 = vand.u32 2147483648, %v3850_v26 }
 0x157   : > { %v3180_v45 = vpop.eup %3179  ;;  %3191 = vrsqrt.f32 %v4138_v2  ;;  %vm1940_vm14 = vcmp.eq.f32.partialorder %v3993_v3, inf  ;;  %v1943_v11 = vand.u32 2147483648, %v3993_v3  ;;  %v4341_v25 = vadd.f32 %v1501_v32, %v1369_v48 }
 0x158   : > { %v3182_v9 = vpop.eup %3181  ;;  %v4327_v33 = vsel %vm1900_vm5, %v6361_v5, %v1899_v27  ;;  %v4337_v50 = vsel %vm1907_vm7, %v6363_v13, %v1906_v60  ;;  %v4345_v27 = vsel %vm1914_vm8, %v1915_v41, %v1913_v18  ;;  %v1920_v42 = vsel %vm1919_vm9, %v3942_v37, %v1918_v63 }
 0x159   : > { %6362 = vst [vmem:[#allocation26_spill] sm:$0xff] %v4327_v33  ;;  %v3184_v46 = vpop.eup %3183  ;;  %6364 = vst [vmem:[#allocation27_spill] sm:$0xff] %v4337_v50  ;;  %vm1935_vm15 = vcmp.eq.f32.partialorder %v3991_v44, 0.0  ;;  %vm1942_vm0 = vcmp.eq.f32.partialorder %v3993_v3, 0.0  ;;  %vm1947_vm1 = vcmp.eq.f32.partialorder %v4038_v4, inf  ;;  %v1950_v26 = vand.u32 2147483648, %v4038_v4 }
 0x15a   : > { %6365 = vst [vmem:[#allocation28_spill] sm:$0xff] %v4345_v27  ;;  %v1927_v7 = vsel %vm1926_vm10, %v3944_v43, %v1925_v0  ;;  %vm1949_vm2 = vcmp.eq.f32.partialorder %v4038_v4, 0.0  ;;  %vm1954_vm3 = vcmp.eq.f32.partialorder %v4073_v20, inf  ;;  %3193 = vrsqrt.f32 %v4165_v39 }
 0x15b   : > { %v4272_v54 = vpop.f32.mrb[52].mxu0  ;;  %v4274_v58 = vpop.f32.mrb[52].mxu1  ;;  %v1370_v63 = vmul.f32 %v4117_v16, %v4117_v16  ;;  %v1932_v32 = vmul.f32 %v3180_v45, %v3991_v44  ;;  %v1939_v60 = vmul.f32 %v3182_v9, %v3993_v3  ;;  %v1946_v18 = vmul.f32 %v3184_v46, %v4038_v4 }
 0x15c   : > { %v4283_v47 = vpop.f32.mrb[53].mxu0  ;;  %v4285_v59 = vpop.f32.mrb[53].mxu1  ;;  %3195 = vrsqrt.f32 %v4195_v62  ;;  %v1502_v16 = vmul.f32 %v4119_v24, %v4119_v24  ;;  %v1371_v49 = vmul.f32 %v4131_v52, %v4131_v52  ;;  %v1503_v45 = vmul.f32 %v4133_v56, %v4133_v56 }
 0x15d   : > { %v4297_v40 = vpop.f32.mrb[54].mxu0  ;;  %v4299_v17 = vpop.f32.mrb[54].mxu1  ;;  %3197 = vrsqrt.f32 %v4197_v23  ;;  %v6366_v27 = vand.u32 2147483648, %v3942_v37  ;;  %vm1961_vm4 = vcmp.eq.f32.partialorder %v4075_v8, inf  ;;  %v1372_v24 = vmul.f32 %v4142_v35, %v4142_v35 }
 0x15e   : > { %v4313_v14 = vpop.f32.mrb[55].mxu0  ;;  %v4315_v53 = vpop.f32.mrb[55].mxu1  ;;  %v1504_v52 = vmul.f32 %v4144_v22, %v4144_v22  ;;  %v4403_v10 = vsel %vm1928_vm12, %v1929_v61, %v1927_v7  ;;  %vm1956_vm5 = vcmp.eq.f32.partialorder %v4073_v20, 0.0  ;;  %v1964_v37 = vand.u32 2147483648, %v4075_v8 }
 0x15f   : > { %v3186_v13 = vpop.eup %3185  ;;  %v4390_v50 = vsel %vm1921_vm11, %v6366_v27, %v1920_v42  ;;  %6368 = vst [vmem:[#allocation30_spill] sm:$0xff] %v4403_v10  ;;  %v4407_v27 = vadd.f32 %v1502_v16, %v1370_v63  ;;  %v4409_v42 = vadd.f32 %v1503_v45, %v1371_v49  ;;  %v1934_v35 = vsel %vm1933_vm13, %v3991_v44, %v1932_v32 }
 0x160   : > { %v3188_v6 = vpop.eup %3187  ;;  %6367 = vst [vmem:[#allocation29_spill] sm:$0xff] %v4390_v50  ;;  %v1941_v22 = vsel %vm1940_vm14, %v3993_v3, %v1939_v60  ;;  %v1953_v43 = vmul.f32 %v3186_v13, %v4073_v20  ;;  %vm1963_vm6 = vcmp.eq.f32.partialorder %v4075_v8, 0.0  ;;  %vm1968_vm7 = vcmp.eq.f32.partialorder %v4086_v19, inf }
 0x161   : > { %v4420_v61 = vadd.f32 %v1504_v52, %v1372_v24  ;;  %v3190_v7 = vpop.eup %3189  ;;  %v1948_v49 = vsel %vm1947_vm1, %v4038_v4, %v1946_v18  ;;  %v1960_v63 = vmul.f32 %v3188_v6, %v4075_v8  ;;  %3199 = vrsqrt.f32 %v4256_v28 }
 0x162   : > { %v3192_v60 = vpop.eup %3191  ;;  %v1373_v13 = vmul.f32 %v4184_v31, %v4184_v31  ;;  %v1505_v16 = vmul.f32 %v4186_v34, %v4186_v34  ;;  %v1374_v45 = vmul.f32 %v4199_v30, %v4199_v30  ;;  %v1506_v24 = vmul.f32 %v4201_v51, %v4201_v51 }
 0x163   : > { %v4363_v41 = vpop.f32.mrb[56].mxu0  ;;  %v4365_v48 = vpop.f32.mrb[56].mxu1  ;;  %v6369_v18 = vand.u32 2147483648, %v3991_v44  ;;  %v4444_v52 = vsel %vm1942_vm0, %v1943_v11, %v1941_v22  ;;  %vm1970_vm8 = vcmp.eq.f32.partialorder %v4086_v19, 0.0  ;;  %vm1975_vm9 = vcmp.eq.f32.partialorder %v4138_v2, inf }
 0x164   : > { %v4371_v0 = vpop.f32.mrb[57].mxu0  ;;  %v4373_v5 = vpop.f32.mrb[57].mxu1  ;;  %6371 = vst [vmem:[#allocation32_spill] sm:$0xff] %v4444_v52  ;;  %v1978_v31 = vand.u32 2147483648, %v4138_v2  ;;  %v4455_v51 = vsel %vm1949_vm2, %v1950_v26, %v1948_v49  ;;  %v1955_v3 = vsel %vm1954_vm3, %v4073_v20, %v1953_v43  ;;  %vm1977_vm10 = vcmp.eq.f32.partialorder %v4138_v2, 0.0 }
 0x165   : > { %v4382_v9 = vpop.f32.mrb[58].mxu0  ;;  %v4384_v46 = vpop.f32.mrb[58].mxu1  ;;  %v4440_v6 = vsel %vm1935_vm15, %v6369_v18, %v1934_v35  ;;  %6372 = vst [vmem:[#allocation33_spill] sm:$0xff] %v4455_v51  ;;  %vm1982_vm11 = vcmp.eq.f32.partialorder %v4165_v39, inf  ;;  %3201 = vrsqrt.f32 %v4277_v38  ;;  %v1962_v4 = vsel %vm1961_vm4, %v4075_v8, %v1960_v63 }
 0x166   : > { %v4397_v56 = vpop.f32.mrb[59].mxu0  ;;  %v4399_v33 = vpop.f32.mrb[59].mxu1  ;;  %6370 = vst [vmem:[#allocation31_spill] sm:$0xff] %v4440_v6  ;;  %v1967_v26 = vmul.f32 %v3190_v7, %v4086_v19  ;;  %v1974_v43 = vmul.f32 %v3192_v60, %v4138_v2  ;;  %3203 = vrsqrt.f32 %v4279_v29  ;;  %v4478_v32 = vadd.f32 %v1505_v16, %v1373_v13 }
 0x167   : > { %v3194_v22 = vpop.eup %3193  ;;  %v4480_v51 = vadd.f32 %v1506_v24, %v1374_v45  ;;  %v1375_v52 = vmul.f32 %v4212_v57, %v4212_v57  ;;  %v1507_v63 = vmul.f32 %v4214_v21, %v4214_v21  ;;  %vm1984_vm12 = vcmp.eq.f32.partialorder %v4165_v39, 0.0 }
 0x168   : > { %v3196_v11 = vpop.eup %3195  ;;  %vm1989_vm13 = vcmp.eq.f32.partialorder %v4195_v62, inf  ;;  %3205 = vrsqrt.f32 %v4331_v12  ;;  %v1376_v13 = vmul.f32 %v4225_v1, %v4225_v1  ;;  %v1508_v57 = vmul.f32 %v4227_v15, %v4227_v15 }
 0x169   : > { %v3198_v6 = vpop.eup %3197  ;;  %v6373_v16 = vand.u32 2147483648, %v4073_v20  ;;  %vm1991_vm14 = vcmp.eq.f32.partialorder %v4195_v62, 0.0  ;;  %v1992_v45 = vand.u32 2147483648, %v4195_v62  ;;  %vm1996_vm15 = vcmp.eq.f32.partialorder %v4197_v23, inf }
 0x16a   : > { %3207 = vrsqrt.f32 %v4341_v25  ;;  %v4509_v1 = vsel %vm1963_vm6, %v1964_v37, %v1962_v4  ;;  %v1969_v15 = vsel %vm1968_vm7, %v4086_v19, %v1967_v26  ;;  %v1976_v20 = vsel %vm1975_vm9, %v4138_v2, %v1974_v43 }
 0x16b   : > { %v4449_v34 = vpop.f32.mrb[60].mxu0  ;;  %v4451_v30 = vpop.f32.mrb[60].mxu1  ;;  %v4501_v21 = vsel %vm1956_vm5, %v6373_v16, %v1955_v3  ;;  %6375 = vst [vmem:[#allocation35_spill] sm:$0xff] %v4509_v1  ;;  %v1981_v24 = vmul.f32 %v3194_v22, %v4165_v39  ;;  %vm1998_vm0 = vcmp.eq.f32.partialorder %v4197_v23, 0.0  ;;  %v1988_v3 = vmul.f32 %v3196_v11, %v4195_v62 }
 0x16c   : > { %v4464_v44 = vpop.f32.mrb[61].mxu0  ;;  %v4466_v35 = vpop.f32.mrb[61].mxu1  ;;  %6374 = vst [vmem:[#allocation34_spill] sm:$0xff] %v4501_v21  ;;  %v1995_v16 = vmul.f32 %v3198_v6, %v4197_v23  ;;  %v4521_v21 = vadd.f32 %v1507_v63, %v1375_v52  ;;  %v1377_v8 = vmul.f32 %v4272_v54, %v4272_v54  ;;  %v4525_v4 = vadd.f32 %v1508_v57, %v1376_v13 }
 0x16d   : > { %v4474_v49 = vpop.f32.mrb[62].mxu0  ;;  %v4476_v18 = vpop.f32.mrb[62].mxu1  ;;  %v1509_v26 = vmul.f32 %v4274_v58, %v4274_v58  ;;  %v1378_v22 = vmul.f32 %v4283_v47, %v4283_v47  ;;  %v1510_v43 = vmul.f32 %v4285_v59, %v4285_v59  ;;  %v6376_v52 = vand.u32 2147483648, %v4086_v19 }
 0x16e   : > { %v4486_v7 = vpop.f32.mrb[63].mxu0  ;;  %v4488_v60 = vpop.f32.mrb[63].mxu1  ;;  %v1999_v63 = vand.u32 2147483648, %v4197_v23  ;;  %vm2003_vm1 = vcmp.eq.f32.partialorder %v4256_v28, inf  ;;  %v2006_v58 = vand.u32 2147483648, %v4256_v28  ;;  %v4552_v59 = vsel %vm1977_vm10, %v1978_v31, %v1976_v20 }
 0x16f   : > { %v3200_v37 = vpop.eup %3199  ;;  %v4541_v54 = vsel %vm1970_vm8, %v6376_v52, %v1969_v15  ;;  %6378 = vst [vmem:[#allocation37_spill] sm:$0xff] %v4552_v59  ;;  %v1983_v19 = vsel %vm1982_vm11, %v4165_v39, %v1981_v24  ;;  %vm2005_vm2 = vcmp.eq.f32.partialorder %v4256_v28, 0.0  ;;  %vm2010_vm3 = vcmp.eq.f32.partialorder %v4277_v38, inf }
 0x170   : > { %6377 = vst [vmem:[#allocation36_spill] sm:$0xff] %v4541_v54  ;;  %3209 = vrsqrt.f32 %v4407_v27  ;;  %v3202_v52 = vpop.eup %3201  ;;  %v1990_v2 = vsel %vm1989_vm13, %v4195_v62, %v1988_v3  ;;  %v2002_v31 = vmul.f32 %v3200_v37, %v4256_v28  ;;  %v4569_v20 = vadd.f32 %v1509_v26, %v1377_v8 }
 0x171   : > { %3211 = vrsqrt.f32 %v4409_v42  ;;  %v3204_v54 = vpop.eup %3203  ;;  %v1997_v1 = vsel %vm1996_vm15, %v4197_v23, %v1995_v16  ;;  %v2013_v10 = vand.u32 2147483648, %v4277_v38  ;;  %vm2017_vm4 = vcmp.eq.f32.partialorder %v4279_v29, inf }
 0x172   : > { %v4580_v3 = vadd.f32 %v1510_v43, %v1378_v22  ;;  %v6379_v37 = vand.u32 2147483648, %v4165_v39  ;;  %vm2012_vm5 = vcmp.eq.f32.partialorder %v4277_v38, 0.0  ;;  %v2020_v26 = vand.u32 2147483648, %v4279_v29  ;;  %v3206_v16 = vpop.eup %3205 }
 0x173   : > { %v4533_v11 = vpop.f32.mrb[64].mxu0  ;;  %v4535_v6 = vpop.f32.mrb[64].mxu1  ;;  %vm2024_vm6 = vcmp.eq.f32.partialorder %v4331_v12, inf  ;;  %3213 = vrsqrt.f32 %v4420_v61  ;;  %v4594_v50 = vsel %vm1991_vm14, %v1992_v45, %v1990_v2  ;;  %vm2019_vm7 = vcmp.eq.f32.partialorder %v4279_v29, 0.0 }
 0x174   : > { %v4546_v47 = vpop.f32.mrb[65].mxu0  ;;  %v4548_v13 = vpop.f32.mrb[65].mxu1  ;;  %v4586_v8 = vsel %vm1984_vm12, %v6379_v37, %v1983_v19  ;;  %6381 = vst [vmem:[#allocation39_spill] sm:$0xff] %v4594_v50  ;;  %v2027_v22 = vand.u32 2147483648, %v4331_v12  ;;  %vm2031_vm8 = vcmp.eq.f32.partialorder %v4341_v25, inf  ;;  %v2034_v39 = vand.u32 2147483648, %v4341_v25 }
 0x175   : > { %v4560_v57 = vpop.f32.mrb[66].mxu0  ;;  %v4562_v15 = vpop.f32.mrb[66].mxu1  ;;  %6380 = vst [vmem:[#allocation38_spill] sm:$0xff] %v4586_v8  ;;  %v4602_v19 = vsel %vm1998_vm0, %v1999_v63, %v1997_v1  ;;  %v2004_v37 = vsel %vm2003_vm1, %v4256_v28, %v2002_v31  ;;  %v2009_v62 = vmul.f32 %v3202_v52, %v4277_v38  ;;  %vm2026_vm9 = vcmp.eq.f32.partialorder %v4331_v12, 0.0 }
 0x176   : > { %v4571_v24 = vpop.f32.mrb[67].mxu0  ;;  %v4573_v59 = vpop.f32.mrb[67].mxu1  ;;  %6382 = vst [vmem:[#allocation40_spill] sm:$0xff] %v4602_v19  ;;  %v1379_v45 = vmul.f32 %v4297_v40, %v4297_v40  ;;  %v2016_v2 = vmul.f32 %v3204_v54, %v4279_v29  ;;  %vm2033_vm10 = vcmp.eq.f32.partialorder %v4341_v25, 0.0  ;;  %v1511_v23 = vmul.f32 %v4299_v17, %v4299_v17 }
 0x177   : > { %v3208_v43 = vpop.eup %3207  ;;  %v1380_v1 = vmul.f32 %v4313_v14, %v4313_v14  ;;  %v1512_v63 = vmul.f32 %v4315_v53, %v4315_v53  ;;  %v2023_v19 = vmul.f32 %v3206_v16, %v4331_v12  ;;  %3215 = vrsqrt.f32 %v4478_v32 }
 0x178   : > { %v1381_v40 = vmul.f32 %v4363_v41, %v4363_v41  ;;  %v1513_v17 = vmul.f32 %v4365_v48, %v4365_v48  ;;  %v2030_v53 = vmul.f32 %v3208_v43, %v4341_v25  ;;  %3217 = vrsqrt.f32 %v4480_v51 }
 0x179   : > { %v4635_v50 = vadd.f32 %v1511_v23, %v1379_v45  ;;  %v4637_v8 = vadd.f32 %v1512_v63, %v1380_v1  ;;  %v4645_v41 = vsel %vm2005_vm2, %v2006_v58, %v2004_v37  ;;  %v2011_v48 = vsel %vm2010_vm3, %v4277_v38, %v2009_v62 }
 0x17a   : > { %6383 = vst [vmem:[#allocation41_spill] sm:$0xff] %v4645_v41  ;;  %vm2038_vm11 = vcmp.eq.f32.partialorder %v4407_v27, inf  ;;  %v4651_v43 = vadd.f32 %v1513_v17, %v1381_v40  ;;  %v3210_v1 = vpop.eup %3209  ;;  %v2018_v63 = vsel %vm2017_vm4, %v4279_v29, %v2016_v2  ;;  %vm2045_vm12 = vcmp.eq.f32.partialorder %v4409_v42, inf }
 0x17b   : > { %v4619_v31 = vpop.f32.mrb[68].mxu0  ;;  %v4621_v52 = vpop.f32.mrb[68].mxu1  ;;  %3219 = vrsqrt.f32 %v4521_v21  ;;  %v2025_v37 = vsel %vm2024_vm6, %v4331_v12, %v2023_v19  ;;  %v1382_v62 = vmul.f32 %v4371_v0, %v4371_v0  ;;  %v1514_v40 = vmul.f32 %v4373_v5, %v4373_v5 }
 0x17c   : > { %v4629_v54 = vpop.f32.mrb[69].mxu0  ;;  %v4631_v14 = vpop.f32.mrb[69].mxu1  ;;  %3221 = vrsqrt.f32 %v4525_v4  ;;  %v4673_v2 = vsel %vm2012_vm5, %v2013_v10, %v2011_v48  ;;  %v2032_v17 = vsel %vm2031_vm8, %v4341_v25, %v2030_v53  ;;  %vm2040_vm13 = vcmp.eq.f32.partialorder %v4407_v27, 0.0 }
 0x17d   : > { %v4639_v16 = vpop.f32.mrb[70].mxu0  ;;  %v4641_v55 = vpop.f32.mrb[70].mxu1  ;;  %6384 = vst [vmem:[#allocation42_spill] sm:$0xff] %v4673_v2  ;;  %v2048_v19 = vand.u32 2147483648, %v4409_v42  ;;  %3223 = vrsqrt.f32 %v4569_v20  ;;  %v4683_v0 = vsel %vm2019_vm7, %v2020_v26, %v2018_v63  ;;  %vm2047_vm14 = vcmp.eq.f32.partialorder %v4409_v42, 0.0 }
 0x17e   : > { %v4653_v45 = vpop.f32.mrb[71].mxu0  ;;  %v4655_v23 = vpop.f32.mrb[71].mxu1  ;;  %6385 = vst [vmem:[#allocation43_spill] sm:$0xff] %v4683_v0  ;;  %vm2052_vm15 = vcmp.eq.f32.partialorder %v4420_v61, inf  ;;  %v2055_v10 = vand.u32 2147483648, %v4420_v61  ;;  %3225 = vrsqrt.f32 %v4580_v3  ;;  %v4691_v38 = vsel %vm2026_vm9, %v2027_v22, %v2025_v37 }
 0x17f   : > { %v3212_v58 = vpop.eup %3211  ;;  %6386 = vst [vmem:[#allocation44_spill] sm:$0xff] %v4691_v38  ;;  %v2037_v5 = vmul.f32 %v3210_v1, %v4407_v27  ;;  %vm2054_vm0 = vcmp.eq.f32.partialorder %v4420_v61, 0.0  ;;  %v1383_v29 = vmul.f32 %v4382_v9, %v4382_v9  ;;  %v4704_v63 = vsel %vm2033_vm10, %v2034_v39, %v2032_v17 }
 0x180   : > { %v3214_v28 = vpop.eup %3213  ;;  %v2044_v53 = vmul.f32 %v3212_v58, %v4409_v42  ;;  %6387 = vst [vmem:[#allocation45_spill] sm:$0xff] %v4704_v63  ;;  %vm2059_vm1 = vcmp.eq.f32.partialorder %v4478_v32, inf  ;;  %v4707_v12 = vadd.f32 %v1514_v40, %v1382_v62  ;;  %v1515_v22 = vmul.f32 %v4384_v46, %v4384_v46 }
 0x181   : > { %v1384_v1 = vmul.f32 %v4397_v56, %v4397_v56  ;;  %v2051_v37 = vmul.f32 %v3214_v28, %v4420_v61  ;;  %v1516_v25 = vmul.f32 %v4399_v33, %v4399_v33  ;;  %v1385_v39 = vmul.f32 %v4449_v34, %v4449_v34  ;;  %v3216_v56 = vpop.eup %3215 }
 0x182   : > { %v1517_v62 = vmul.f32 %v4451_v30, %v4451_v30  ;;  %vm2066_vm2 = vcmp.eq.f32.partialorder %v4480_v51, inf  ;;  %v3218_v34 = vpop.eup %3217  ;;  %v2039_v30 = vsel %vm2038_vm11, %v4407_v27, %v2037_v5  ;;  %v2046_v0 = vsel %vm2045_vm12, %v4409_v42, %v2044_v53 }
 0x183   : > { %v4698_v26 = vpop.f32.mrb[72].mxu0  ;;  %v4700_v48 = vpop.f32.mrb[72].mxu1  ;;  %vm2061_vm3 = vcmp.eq.f32.partialorder %v4478_v32, 0.0  ;;  %3227 = vrsqrt.f32 %v4635_v50  ;;  %v4744_v28 = vadd.f32 %v1515_v22, %v1383_v29  ;;  %vm2068_vm4 = vcmp.eq.f32.partialorder %v4480_v51, 0.0 }
 0x184   : > { %v4713_v58 = vpop.f32.mrb[73].mxu0  ;;  %v4715_v9 = vpop.f32.mrb[73].mxu1  ;;  %v4747_v63 = vadd.f32 %v1516_v25, %v1384_v1  ;;  %v4749_v17 = vadd.f32 %v1517_v62, %v1385_v39  ;;  %v1386_v2 = vmul.f32 %v4464_v44, %v4464_v44  ;;  %v1518_v5 = vmul.f32 %v4466_v35, %v4466_v35 }
 0x185   : > { %v4724_v40 = vpop.f32.mrb[74].mxu0  ;;  %v4726_v46 = vpop.f32.mrb[74].mxu1  ;;  %v2053_v53 = vsel %vm2052_vm15, %v4420_v61, %v2051_v37  ;;  %v2058_v29 = vmul.f32 %v3216_v56, %v4478_v32  ;;  %vm2073_vm5 = vcmp.eq.f32.partialorder %v4521_v21, inf  ;;  %vm2080_vm6 = vcmp.eq.f32.partialorder %v4525_v4, inf }
 0x186   : > { %v4732_v33 = vpop.f32.mrb[75].mxu0  ;;  %v4734_v38 = vpop.f32.mrb[75].mxu1  ;;  %3229 = vrsqrt.f32 %v4637_v8  ;;  %v6388_v1 = vand.u32 2147483648, %v4407_v27  ;;  %v2065_v35 = vmul.f32 %v3218_v34, %v4480_v51  ;;  %v4773_v39 = vsel %vm2047_vm14, %v2048_v19, %v2046_v0 }
 0x187   : > { %v3220_v41 = vpop.eup %3219  ;;  %3231 = vrsqrt.f32 %v4651_v43  ;;  %6390 = vst [vmem:[#allocation47_spill] sm:$0xff] %v4773_v39  ;;  %vm2087_vm7 = vcmp.eq.f32.partialorder %v4569_v20, inf  ;;  %vm2075_vm8 = vcmp.eq.f32.partialorder %v4521_v21, 0.0  ;;  %vm2082_vm9 = vcmp.eq.f32.partialorder %v4525_v4, 0.0 }
 0x188   : > { %v3222_v22 = vpop.eup %3221  ;;  %v4766_v44 = vsel %vm2040_vm13, %v6388_v1, %v2039_v30  ;;  %3233 = vrsqrt.f32 %v4707_v12  ;;  %v4784_v30 = vsel %vm2054_vm0, %v2055_v10, %v2053_v53  ;;  %vm2094_vm10 = vcmp.eq.f32.partialorder %v4580_v3, inf }
 0x189   : > { %6389 = vst [vmem:[#allocation46_spill] sm:$0xff] %v4766_v44  ;;  %v3224_v37 = vpop.eup %3223  ;;  %6391 = vst [vmem:[#allocation48_spill] sm:$0xff] %v4784_v30  ;;  %3235 = vrsqrt.f32 %v4744_v28  ;;  %v4790_v42 = vadd.f32 %v1518_v5, %v1386_v2  ;;  %v2060_v61 = vsel %vm2059_vm1, %v4478_v32, %v2058_v29  ;;  %vm2089_vm11 = vcmp.eq.f32.partialorder %v4569_v20, 0.0 }
 0x18a   : > { %v3226_v34 = vpop.eup %3225  ;;  %vm2096_vm12 = vcmp.eq.f32.partialorder %v4580_v3, 0.0  ;;  %v2097_v10 = vand.u32 2147483648, %v4580_v3  ;;  %3237 = vrsqrt.f32 %v4747_v63  ;;  %v1387_v2 = vmul.f32 %v4474_v49, %v4474_v49 }
 0x18b   : > { %v4778_v27 = vpop.f32.mrb[76].mxu0  ;;  %v4780_v56 = vpop.f32.mrb[76].mxu1  ;;  %6392 = vst [vmem:[#allocation49_spill] sm:$0xff] %v4790_v42  ;;  %v2067_v1 = vsel %vm2066_vm2, %v4480_v51, %v2065_v35  ;;  %v2072_v29 = vmul.f32 %v3220_v41, %v4521_v21  ;;  %v2079_v62 = vmul.f32 %v3222_v22, %v4525_v4  ;;  %3239 = vrsqrt.f32 %v4749_v17 }
 0x18c   : > { %v4792_v19 = vpop.f32.mrb[77].mxu0  ;;  %v4794_v0 = vpop.f32.mrb[77].mxu1  ;;  %v2086_v49 = vmul.f32 %v3224_v37, %v4569_v20  ;;  %v2093_v39 = vmul.f32 %v3226_v34, %v4580_v3  ;;  %v1519_v44 = vmul.f32 %v4476_v18, %v4476_v18  ;;  %v1388_v35 = vmul.f32 %v4486_v7, %v4486_v7 }
 0x18d   : > { %v4805_v5 = vpop.f32.mrb[78].mxu0  ;;  %v4807_v53 = vpop.f32.mrb[78].mxu1  ;;  %v6395_v41 = vand.u32 2147483648, %v4478_v32  ;;  %v1389_v37 = vmul.f32 %v4533_v11, %v4533_v11  ;;  %v1521_v34 = vmul.f32 %v4535_v6, %v4535_v6  ;;  %v6397_v18 = vand.u32 2147483648, %v4480_v51 }
 0x18e   : > { %v4815_v25 = vpop.f32.mrb[79].mxu0  ;;  %v4817_v30 = vpop.f32.mrb[79].mxu1  ;;  %vm2101_vm13 = vcmp.eq.f32.partialorder %v4635_v50, inf  ;;  %v2081_v11 = vsel %vm2080_vm6, %v4525_v4, %v2079_v62  ;;  %vm2108_vm14 = vcmp.eq.f32.partialorder %v4637_v8, inf  ;;  %v6404_v32 = vand.u32 2147483648, %v4521_v21 }
 0x18f   : > { %6393 = vst [vmem:[#allocation50_spill] sm:$0xff] %v4815_v25  ;;  %6394 = vst [vmem:[#allocation51_spill] sm:$0xff] %v4817_v30  ;;  %v4829_v22 = vsel %vm2061_vm3, %v6395_v41, %v2060_v61  ;;  %v1520_v25 = vmul.f32 %v4488_v60, %v4488_v60  ;;  %v3228_v30 = vpop.eup %3227  ;;  %v4841_v7 = vsel %vm2068_vm4, %v6397_v18, %v2067_v1  ;;  %vm2115_vm15 = vcmp.eq.f32.partialorder %v4651_v43, inf }
 0x190   : > { %6396 = vst [vmem:[#allocation52_spill] sm:$0xff] %v4829_v22  ;;  %6398 = vst [vmem:[#allocation53_spill] sm:$0xff] %v4841_v7  ;;  %v4845_v61 = vadd.f32 %v1519_v44, %v1387_v2  ;;  %v2074_v60 = vsel %vm2073_vm5, %v4521_v21, %v2072_v29  ;;  %v4855_v41 = vadd.f32 %v1521_v34, %v1389_v37  ;;  %v3230_v51 = vpop.eup %3229  ;;  %vm2122_vm0 = vcmp.eq.f32.partialorder %v4707_v12, inf }
 0x191   : > { %v4853_v6 = vadd.f32 %v1520_v25, %v1388_v35  ;;  %v2088_v1 = vsel %vm2087_vm7, %v4569_v20, %v2086_v49  ;;  %v2095_v44 = vsel %vm2094_vm10, %v4580_v3, %v2093_v39  ;;  %v3232_v25 = vpop.eup %3231  ;;  %v1390_v35 = vmul.f32 %v4546_v47, %v4546_v47 }
 0x192   : > { %6399 = vst [vmem:[#allocation54_spill] sm:$0xff] %v4845_v61  ;;  %6401 = vst [vmem:[#allocation56_spill] sm:$0xff] %v4855_v41  ;;  %v1522_v37 = vmul.f32 %v4548_v13, %v4548_v13  ;;  %v1391_v49 = vmul.f32 %v4560_v57, %v4560_v57  ;;  %v1523_v39 = vmul.f32 %v4562_v15, %v4562_v15  ;;  %v3234_v2 = vpop.eup %3233  ;;  %v6406_v47 = vand.u32 2147483648, %v4525_v4 }
 0x193   : > { %6400 = vst [vmem:[#allocation55_spill] sm:$0xff] %v4853_v6  ;;  %v4865_v29 = vpop.f32.mrb[80].mxu0  ;;  %v4867_v62 = vpop.f32.mrb[80].mxu1  ;;  %v4885_v7 = vsel %vm2075_vm8, %v6404_v32, %v2074_v60  ;;  %v2100_v57 = vmul.f32 %v3228_v30, %v4635_v50  ;;  %v4907_v4 = vsel %vm2096_vm12, %v2097_v10, %v2095_v44  ;;  %vm2129_vm1 = vcmp.eq.f32.partialorder %v4744_v28, inf }
 0x194   : > { %v4877_v34 = vpop.f32.mrb[81].mxu0  ;;  %v4879_v18 = vpop.f32.mrb[81].mxu1  ;;  %6405 = vst [vmem:[#allocation59_spill] sm:$0xff] %v4885_v7  ;;  %v4891_v13 = vsel %vm2082_vm9, %v6406_v47, %v2081_v11  ;;  %6410 = vst [vmem:[#allocation62_spill] sm:$0xff] %v4907_v4  ;;  %v2125_v47 = vand.u32 2147483648, %v4707_v12  ;;  %vm2136_vm2 = vcmp.eq.f32.partialorder %v4747_v63, inf  ;;  %v2107_v10 = vmul.f32 %v3230_v51, %v4637_v8 }
 0x195   : > { %6402 = vst [vmem:[#allocation57_spill] sm:$0xff] %v4877_v34  ;;  %6403 = vst [vmem:[#allocation58_spill] sm:$0xff] %v4879_v18  ;;  %v4895_v15 = vpop.f32.mrb[82].mxu0  ;;  %v4897_v22 = vpop.f32.mrb[82].mxu1  ;;  %v6408_v34 = vand.u32 2147483648, %v4569_v20  ;;  %v2132_v20 = vand.u32 2147483648, %v4744_v28  ;;  %v4923_v44 = vadd.f32 %v1522_v37, %v1390_v35  ;;  %v2102_v32 = vsel %vm2101_vm13, %v4635_v50, %v2100_v57 }
 0x196   : > { %6407 = vst [vmem:[#allocation60_spill] sm:$0xff] %v4891_v13  ;;  %v3236_v18 = vpop.eup %3235  ;;  %v4911_v30 = vpop.f32.mrb[83].mxu0  ;;  %vm2103_vm3 = vcmp.eq.f32.partialorder %v4635_v50, 0.0  ;;  %vm2110_vm4 = vcmp.eq.f32.partialorder %v4637_v8, 0.0  ;;  %vm2117_vm5 = vcmp.eq.f32.partialorder %v4651_v43, 0.0  ;;  %vm2124_vm6 = vcmp.eq.f32.partialorder %v4707_v12, 0.0 }
 0x197   : > { %v4903_v21 = vsel %vm2089_vm11, %v6408_v34, %v2088_v1  ;;  %v4913_v60 = vpop.f32.mrb[83].mxu1  ;;  %v3238_v11 = vpop.eup %3237  ;;  %v2139_v1 = vand.u32 2147483648, %v4747_v63  ;;  %6411 = vst [vmem:[#allocation63_spill] sm:$0xff] %v4923_v44  ;;  %v4925_v34 = vadd.f32 %v1523_v39, %v1391_v49  ;;  %vm2143_vm7 = vcmp.eq.f32.partialorder %v4749_v17, inf }
 0x198   : > { %6409 = vst [vmem:[#allocation61_spill] sm:$0xff] %v4903_v21  ;;  %v3240_v3 = vpop.eup %3239  ;;  %v1392_v51 = vmul.f32 %v4571_v24, %v4571_v24  ;;  %v1524_v4 = vmul.f32 %v4573_v59, %v4573_v59  ;;  %v2114_v35 = vmul.f32 %v3232_v25, %v4651_v43  ;;  %v2121_v37 = vmul.f32 %v3234_v2, %v4707_v12 }
 0x199   : > { %v2128_v49 = vmul.f32 %v3236_v18, %v4744_v28  ;;  %vm2131_vm8 = vcmp.eq.f32.partialorder %v4744_v28, 0.0  ;;  %vm2138_vm9 = vcmp.eq.f32.partialorder %v4747_v63, 0.0  ;;  %3241 = vrsqrt.f32 %v4790_v42 }
 0x19a   : > { %v2135_v39 = vmul.f32 %v3238_v11, %v4747_v63  ;;  %v2142_v57 = vmul.f32 %v3240_v3, %v4749_v17  ;;  %vm2145_vm10 = vcmp.eq.f32.partialorder %v4749_v17, 0.0  ;;  %3243 = vrsqrt.f32 %v4925_v34 }
 0x19b   : > { %v4947_v59 = vpop.f32.mrb[84].mxu0  ;;  %v4949_v24 = vpop.f32.mrb[84].mxu1  ;;  %v2109_v2 = vsel %vm2108_vm14, %v4637_v8, %v2107_v10  ;;  %3245 = vrsqrt.f32 %v4845_v61  ;;  %v4955_v25 = vadd.f32 %v1524_v4, %v1392_v51  ;;  %v1393_v18 = vmul.f32 %v4619_v31, %v4619_v31 }
 0x19c   : > { %v4959_v11 = vpop.f32.mrb[85].mxu0  ;;  %v4961_v3 = vpop.f32.mrb[85].mxu1  ;;  %3247 = vrsqrt.f32 %v4853_v6  ;;  %v1525_v21 = vmul.f32 %v4621_v52, %v4621_v52  ;;  %v1394_v13 = vmul.f32 %v4629_v54, %v4629_v54  ;;  %v1526_v10 = vmul.f32 %v4631_v14, %v4631_v14 }
 0x19d   : > { %v4970_v4 = vpop.f32.mrb[86].mxu0  ;;  %v4972_v51 = vpop.f32.mrb[86].mxu1  ;;  %v2116_v31 = vsel %vm2115_vm15, %v4651_v43, %v2114_v35  ;;  %v2123_v6 = vsel %vm2122_vm0, %v4707_v12, %v2121_v37  ;;  %v2130_v52 = vsel %vm2129_vm1, %v4744_v28, %v2128_v49  ;;  %3249 = vrsqrt.f32 %v4955_v25 }
 0x19e   : > { %6412 = vst [vmem:[#allocation64_spill] sm:$0xff] %v4972_v51  ;;  %v4984_v54 = vpop.f32.mrb[87].mxu0  ;;  %v4986_v14 = vpop.f32.mrb[87].mxu1  ;;  %v2137_v61 = vsel %vm2136_vm2, %v4747_v63, %v2135_v39  ;;  %v2144_v35 = vsel %vm2143_vm7, %v4749_v17, %v2142_v57  ;;  %v4994_v7 = vadd.f32 %v1525_v21, %v1393_v18  ;;  %v4996_v37 = vadd.f32 %v1526_v10, %v1394_v13 }
 0x19f   : > { %6413 = vst [vmem:[#allocation65_spill] sm:$0xff] %v4984_v54  ;;  %6414 = vst [vmem:[#allocation66_spill] sm:$0xff] %v4986_v14  ;;  %v1395_v49 = vmul.f32 %v4639_v16, %v4639_v16  ;;  %v1527_v54 = vmul.f32 %v4641_v55, %v4641_v55  ;;  %v1396_v14 = vmul.f32 %v4653_v45, %v4653_v45  ;;  %v6415_v51 = vand.u32 2147483648, %v4635_v50 }
 0x1a0   : > { %v1528_v39 = vmul.f32 %v4655_v23, %v4655_v23  ;;  %v6417_v13 = vand.u32 2147483648, %v4637_v8  ;;  %v2146_v55 = vand.u32 2147483648, %v4749_v17  ;;  %3251 = vrsqrt.f32 %v4994_v7 }
 0x1a1   : > { %v5010_v21 = vsel %vm2103_vm3, %v6415_v51, %v2102_v32  ;;  %v6419_v45 = vand.u32 2147483648, %v4651_v43  ;;  %v5028_v50 = vsel %vm2124_vm6, %v2125_v47, %v2123_v6  ;;  %3253 = vrsqrt.f32 %v4855_v41 }
 0x1a2   : > { %6416 = vst [vmem:[#allocation67_spill] sm:$0xff] %v5010_v21  ;;  %v5016_v16 = vsel %vm2110_vm4, %v6417_v13, %v2109_v2  ;;  %6421 = vst [vmem:[#allocation70_spill] sm:$0xff] %v5028_v50  ;;  %v5034_v8 = vsel %vm2131_vm8, %v2132_v20, %v2130_v52  ;;  %v5038_v57 = vsel %vm2138_vm9, %v2139_v1, %v2137_v61  ;;  %3255 = vrsqrt.f32 %v4996_v37 }
 0x1a3   : > { %6418 = vst [vmem:[#allocation68_spill] sm:$0xff] %v5016_v16  ;;  %v5024_v23 = vsel %vm2117_vm5, %v6419_v45, %v2116_v31  ;;  %6422 = vst [vmem:[#allocation71_spill] sm:$0xff] %v5034_v8  ;;  %v5042_v43 = vsel %vm2145_vm10, %v2146_v55, %v2144_v35  ;;  %v5045_v12 = vpop.f32.mrb[88].mxu0  ;;  %v5047_v6 = vpop.f32.mrb[88].mxu1  ;;  %3257 = vrsqrt.f32 %v4923_v44  ;;  %vm2185_vm11 = vcmp.eq.f32.partialorder %v4925_v34, inf }
 0x1a4   : > { %6420 = vst [vmem:[#allocation69_spill] sm:$0xff] %v5024_v23  ;;  %6423 = vst [vmem:[#allocation72_spill] sm:$0xff] %v5038_v57  ;;  %v5049_v47 = vpop.eup %3241  ;;  %v5053_v28 = vadd.f32 %v1527_v54, %v1395_v49  ;;  %v5055_v63 = vadd.f32 %v1528_v39, %v1396_v14  ;;  %v5057_v61 = vpop.f32.mrb[89].mxu0  ;;  %vm2187_vm12 = vcmp.eq.f32.partialorder %v4925_v34, 0.0  ;;  %v2188_v1 = vand.u32 2147483648, %v4925_v34 }
 0x1a5   : > { %6424 = vst [vmem:[#allocation73_spill] sm:$0xff] %v5042_v43  ;;  %6425 = vst [vmem:[#allocation74_spill] sm:$0xff] %v5049_v47  ;;  %v5059_v17 = vpop.f32.mrb[89].mxu1  ;;  %v3244_v20 = vpop.eup %3243  ;;  %v1397_v2 = vmul.f32 %v4698_v26, %v4698_v26  ;;  %v1529_v18 = vmul.f32 %v4700_v48, %v4700_v48  ;;  %vm2192_vm13 = vcmp.eq.f32.partialorder %v4955_v25, inf  ;;  %vm2194_vm14 = vcmp.eq.f32.partialorder %v4955_v25, 0.0 }
 0x1a6   : > { %v5067_v10 = vpop.f32.mrb[90].mxu0  ;;  %v5069_v51 = vpop.f32.mrb[90].mxu1  ;;  %v2184_v52 = vmul.f32 %v3244_v20, %v4925_v34  ;;  %3259 = vrsqrt.f32 %v5053_v28  ;;  %v2195_v48 = vand.u32 2147483648, %v4955_v25  ;;  %vm2199_vm15 = vcmp.eq.f32.partialorder %v4994_v7, inf }
 0x1a7   : > { %v5071_v31 = vpop.eup %3245  ;;  %v5077_v54 = vpop.f32.mrb[91].mxu0  ;;  %vm2201_vm0 = vcmp.eq.f32.partialorder %v4994_v7, 0.0  ;;  %3261 = vrsqrt.f32 %v5055_v63  ;;  %v2202_v39 = vand.u32 2147483648, %v4994_v7  ;;  %vm2206_vm1 = vcmp.eq.f32.partialorder %v4996_v37, inf }
 0x1a8   : > { %6426 = vst [vmem:[#allocation75_spill] sm:$0xff] %v5071_v31  ;;  %v5079_v26 = vpop.f32.mrb[91].mxu1  ;;  %v5081_v14 = vpop.eup %3247  ;;  %v2186_v49 = vsel %vm2185_vm11, %v4925_v34, %v2184_v52  ;;  %v1398_v13 = vmul.f32 %v4713_v58, %v4713_v58  ;;  %v5097_v20 = vadd.f32 %v1529_v18, %v1397_v2  ;;  %v1530_v32 = vmul.f32 %v4715_v9, %v4715_v9 }
 0x1a9   : > { %6427 = vst [vmem:[#allocation76_spill] sm:$0xff] %v5081_v14  ;;  %v3250_v35 = vpop.eup %3249  ;;  %v2189_v55 = vsel %vm2187_vm12, %v2188_v1, %v2186_v49  ;;  %vm2208_vm2 = vcmp.eq.f32.partialorder %v4996_v37, 0.0  ;;  %v1399_v52 = vmul.f32 %v4724_v40, %v4724_v40  ;;  %v1531_v58 = vmul.f32 %v4726_v46, %v4726_v46 }
 0x1aa   : > { %v2191_v45 = vmul.f32 %v3250_v35, %v4955_v25  ;;  %v2645_v44 = vsub.f32 %v3771_v36, %v2189_v55  ;;  %v3252_v41 = vpop.eup %3251  ;;  %v2209_v1 = vand.u32 2147483648, %v4996_v37  ;;  %vm2213_vm3 = vcmp.eq.f32.partialorder %v5053_v28, inf }
 0x1ab   : > { %3263 = vrsqrt.f32 %v5097_v20  ;;  %v5113_v36 = vpop.f32.mrb[92].mxu0  ;;  %v5115_v9 = vpop.f32.mrb[92].mxu1  ;;  %v2198_v46 = vmul.f32 %v3252_v41, %v4994_v7  ;;  %vm2215_vm4 = vcmp.eq.f32.partialorder %v5053_v28, 0.0  ;;  %v2216_v18 = vand.u32 2147483648, %v5053_v28 }
 0x1ac   : > { %v2193_v34 = vsel %vm2192_vm13, %v4955_v25, %v2191_v45  ;;  %v5117_v2 = vpop.eup %3253  ;;  %v5124_v35 = vpop.f32.mrb[93].mxu0  ;;  %v6429_v45 = vld [vmem:[#allocation2_spill] sm:$0xff]  ;;  %vm2220_vm5 = vcmp.eq.f32.partialorder %v5055_v63, inf  ;;  %v5130_v43 = vadd.f32 %v1530_v32, %v1398_v13  ;;  %v1532_v32 = vmul.f32 %v4734_v38, %v4734_v38 }
 0x1ad   : > { %6428 = vst [vmem:[#allocation77_spill] sm:$0xff] %v5117_v2  ;;  %v2196_v40 = vsel %vm2194_vm14, %v2195_v48, %v2193_v34  ;;  %v5126_v49 = vpop.f32.mrb[93].mxu1  ;;  %v3256_v55 = vpop.eup %3255  ;;  %v5132_v2 = vadd.f32 %v1531_v58, %v1399_v52  ;;  %v2200_v34 = vsel %vm2199_vm15, %v4994_v7, %v2198_v46  ;;  %v1401_v46 = vmul.f32 %v4778_v27, %v4778_v27 }
 0x1ae   : > { %v2646_v14 = vsub.f32 %v6429_v45, %v2196_v40  ;;  %v5134_v25 = vpop.f32.mrb[94].mxu0  ;;  %v5136_v41 = vpop.f32.mrb[94].mxu1  ;;  %v2205_v31 = vmul.f32 %v3256_v55, %v4996_v37  ;;  %v1400_v40 = vmul.f32 %v4732_v33, %v4732_v33  ;;  %v2203_v58 = vsel %vm2201_vm0, %v2202_v39, %v2200_v34  ;;  %v6431_v33 = vld [vmem:[#allocation3_spill] sm:$0xff] }
 0x1af   : > { %v5138_v48 = vpop.eup %3257  ;;  %v5148_v13 = vpop.f32.mrb[95].mxu0  ;;  %3265 = vrsqrt.f32 %v5130_v43  ;;  %v1533_v55 = vmul.f32 %v4780_v56, %v4780_v56  ;;  %vm2222_vm6 = vcmp.eq.f32.partialorder %v5055_v63, 0.0  ;;  %v2223_v7 = vand.u32 2147483648, %v5055_v63 }
 0x1b0   : > { %6430 = vst [vmem:[#allocation2_spill] sm:$0xff] %v5138_v48  ;;  %v5150_v52 = vpop.f32.mrb[95].mxu1  ;;  %v3260_v45 = vpop.eup %3259  ;;  %v2647_v48 = vsub.f32 %v6431_v33, %v2203_v58  ;;  %v2207_v38 = vsel %vm2206_vm1, %v4996_v37, %v2205_v31  ;;  %vm2227_vm7 = vcmp.eq.f32.partialorder %v5097_v20, inf  ;;  %3267 = vrsqrt.f32 %v5132_v2  ;;  %v6432_v33 = vld [vmem:[#allocation4_spill] sm:$0xff] }
 0x1b1   : > { %v3262_v39 = vpop.eup %3261  ;;  %v2210_v34 = vsel %vm2208_vm2, %v2209_v1, %v2207_v38  ;;  %v2212_v27 = vmul.f32 %v3260_v45, %v5053_v28  ;;  %v2711_v56 = vmul.f32 %v2645_v44, %v2645_v44  ;;  %v2712_v8 = vmul.f32 %v2646_v14, %v2646_v14 }
 0x1b2   : > { %v2713_v58 = vmul.f32 %v2647_v48, %v2647_v48  ;;  %v2648_v57 = vsub.f32 %v6432_v33, %v2210_v34  ;;  %v2219_v31 = vmul.f32 %v3262_v39, %v5055_v63  ;;  %v5175_v23 = vadd.f32 %v1532_v32, %v1400_v40  ;;  %v6433_v32 = vld [vmem:[#allocation5_spill] sm:$0xff] }
 0x1b3   : > { %v2214_v50 = vsel %vm2213_vm3, %v5053_v28, %v2212_v27  ;;  %v5177_v37 = vadd.f32 %v1533_v55, %v1401_v46  ;;  %v5179_v1 = vpop.f32.mrb[96].mxu0  ;;  %v5181_v45 = vpop.f32.mrb[96].mxu1  ;;  %vm2229_vm8 = vcmp.eq.f32.partialorder %v5097_v20, 0.0  ;;  %vm2234_vm9 = vcmp.eq.f32.partialorder %v5130_v43, inf }
 0x1b4   : > { %v2777_v38 = vadd.f32 %v2713_v58, %v2711_v56  ;;  %v2714_v44 = vmul.f32 %v2648_v57, %v2648_v57  ;;  %v2217_v48 = vsel %vm2215_vm4, %v2216_v18, %v2214_v50  ;;  %v2221_v14 = vsel %vm2220_vm5, %v5055_v63, %v2219_v31  ;;  %v5188_v39 = vpop.f32.mrb[97].mxu0  ;;  %v5190_v34 = vpop.f32.mrb[97].mxu1  ;;  %v6434_v18 = vld [vmem:[#allocation6_spill] sm:$0xff] }
 0x1b5   : > { %v3264_v40 = vpop.eup %3263  ;;  %v2649_v46 = vsub.f32 %v6433_v32, %v2217_v48  ;;  %v2224_v55 = vsel %vm2222_vm6, %v2223_v7, %v2221_v14  ;;  %3269 = vrsqrt.f32 %v5175_v23  ;;  %v5197_v57 = vpop.f32.mrb[98].mxu0  ;;  %v2230_v58 = vand.u32 2147483648, %v5097_v20 }
 0x1b6   : > { %v5199_v50 = vpop.f32.mrb[98].mxu1  ;;  %v2809_v28 = vadd.f32 %v2714_v44, %v2712_v8  ;;  %v2650_v27 = vsub.f32 %v6434_v18, %v2224_v55  ;;  %v2226_v56 = vmul.f32 %v3264_v40, %v5097_v20  ;;  %v5204_v33 = vpop.f32.mrb[99].mxu0  ;;  %vm2236_vm10 = vcmp.eq.f32.partialorder %v5130_v43, 0.0  ;;  %v6435_v18 = vld [vmem:[#allocation7_spill] sm:$0xff] }
 0x1b7   : > { %v5206_v31 = vpop.f32.mrb[99].mxu1  ;;  %v2715_v63 = vmul.f32 %v2649_v46, %v2649_v46  ;;  %3271 = vrsqrt.f32 %v5177_v37  ;;  %v2237_v44 = vand.u32 2147483648, %v5130_v43  ;;  %vm2241_vm11 = vcmp.eq.f32.partialorder %v5132_v2, inf }
 0x1b8   : > { %v2716_v7 = vmul.f32 %v2650_v27, %v2650_v27  ;;  %v2228_v8 = vsel %vm2227_vm7, %v5097_v20, %v2226_v56  ;;  %v1402_v32 = vmul.f32 %v4792_v19, %v4792_v19  ;;  %v1534_v46 = vmul.f32 %v4794_v0, %v4794_v0 }
 0x1b9   : > { %v3266_v48 = vpop.eup %3265  ;;  %v2778_v14 = vadd.f32 %v2777_v38, %v2715_v63  ;;  %v2231_v40 = vsel %vm2229_vm8, %v2230_v58, %v2228_v8  ;;  %v1403_v16 = vmul.f32 %v4805_v5, %v4805_v5  ;;  %v1535_v20 = vmul.f32 %v4807_v53, %v4807_v53  ;;  %v6436_v38 = vld [vmem:[#allocation50_spill] sm:$0xff]  ;;  %v6437_v58 = vld [vmem:[#allocation51_spill] sm:$0xff] }
 0x1ba   : > { %v2810_v55 = vadd.f32 %v2809_v28, %v2716_v7  ;;  %v2651_v27 = vsub.f32 %v6435_v18, %v2231_v40  ;;  %v2233_v56 = vmul.f32 %v3266_v48, %v5130_v43  ;;  %v3268_v21 = vpop.eup %3267  ;;  %v5226_v47 = vadd.f32 %v1534_v46, %v1402_v32 }
 0x1bb   : > { %v1404_v19 = vmul.f32 %v6436_v38, %v6436_v38  ;;  %v1536_v0 = vmul.f32 %v6437_v58, %v6437_v58  ;;  %v5234_v28 = vpop.f32.mrb[100].mxu0  ;;  %v5236_v63 = vpop.f32.mrb[100].mxu1  ;;  %v2240_v8 = vmul.f32 %v3268_v21, %v5132_v2  ;;  %vm2243_vm12 = vcmp.eq.f32.partialorder %v5132_v2, 0.0 }
 0x1bc   : > { %v2717_v7 = vmul.f32 %v2651_v27, %v2651_v27  ;;  %v2235_v5 = vsel %vm2234_vm9, %v5130_v43, %v2233_v56  ;;  %v5243_v53 = vpop.f32.mrb[101].mxu0  ;;  %v5245_v48 = vpop.f32.mrb[101].mxu1  ;;  %v2244_v32 = vand.u32 2147483648, %v5132_v2  ;;  %vm2248_vm13 = vcmp.eq.f32.partialorder %v5175_v23, inf  ;;  %v6439_v27 = vld [vmem:[#allocation8_spill] sm:$0xff] }
 0x1bd   : > { %v2238_v40 = vsel %vm2236_vm10, %v2237_v44, %v2235_v5  ;;  %3273 = vrsqrt.f32 %v5226_v47  ;;  %v5252_v46 = vpop.f32.mrb[102].mxu0  ;;  %v5254_v18 = vpop.f32.mrb[102].mxu1  ;;  %v2242_v38 = vsel %vm2241_vm11, %v5132_v2, %v2240_v8  ;;  %vm2250_vm14 = vcmp.eq.f32.partialorder %v5175_v23, 0.0 }
 0x1be   : > { %6438 = vst [vmem:[#allocation3_spill] sm:$0xff] %v5254_v18  ;;  %v2779_v21 = vadd.f32 %v2778_v14, %v2717_v7  ;;  %v2652_v56 = vsub.f32 %v6439_v27, %v2238_v40  ;;  %v5261_v43 = vpop.f32.mrb[103].mxu0  ;;  %v5263_v44 = vpop.f32.mrb[103].mxu1  ;;  %v2245_v5 = vsel %vm2243_vm12, %v2244_v32, %v2242_v38  ;;  %v2251_v42 = vand.u32 2147483648, %v5175_v23  ;;  %v6441_v40 = vld [vmem:[#allocation9_spill] sm:$0xff] }
 0x1bf   : > { %6440 = vst [vmem:[#allocation4_spill] sm:$0xff] %v5261_v43  ;;  %v3270_v58 = vpop.eup %3269  ;;  %v5268_v18 = vadd.f32 %v1535_v20, %v1403_v16  ;;  %v5270_v14 = vadd.f32 %v1536_v0, %v1404_v19  ;;  %v2653_v27 = vsub.f32 %v6441_v40, %v2245_v5  ;;  %vm2255_vm15 = vcmp.eq.f32.partialorder %v5177_v37, inf }
 0x1c0   : > { %v2718_v7 = vmul.f32 %v2652_v56, %v2652_v56  ;;  %v2247_v8 = vmul.f32 %v3270_v58, %v5175_v23  ;;  %vm2257_vm0 = vcmp.eq.f32.partialorder %v5177_v37, 0.0  ;;  %v1405_v2 = vmul.f32 %v4865_v29, %v4865_v29  ;;  %v6442_v58 = vld [vmem:[#allocation10_spill] sm:$0xff] }
 0x1c1   : > { %v3272_v43 = vpop.eup %3271  ;;  %3275 = vrsqrt.f32 %v5268_v18  ;;  %v1537_v16 = vmul.f32 %v4867_v62, %v4867_v62  ;;  %v2719_v19 = vmul.f32 %v2653_v27, %v2653_v27  ;;  %v2258_v38 = vand.u32 2147483648, %v5177_v37 }
 0x1c2   : > { %v2811_v20 = vadd.f32 %v2810_v55, %v2718_v7  ;;  %v2249_v0 = vsel %vm2248_vm13, %v5175_v23, %v2247_v8  ;;  %v2254_v32 = vmul.f32 %v3272_v43, %v5177_v37  ;;  %vm2262_vm1 = vcmp.eq.f32.partialorder %v5226_v47, inf  ;;  %v6443_v7 = vld [vmem:[#allocation57_spill] sm:$0xff] }
 0x1c3   : > { %v2252_v56 = vsel %vm2250_vm14, %v2251_v42, %v2249_v0  ;;  %3277 = vrsqrt.f32 %v5270_v14  ;;  %v5290_v29 = vpop.f32.mrb[104].mxu0  ;;  %v5292_v62 = vpop.f32.mrb[104].mxu1  ;;  %v2780_v55 = vadd.f32 %v2779_v21, %v2719_v19  ;;  %v1406_v42 = vmul.f32 %v6443_v7, %v6443_v7  ;;  %v6445_v0 = vld [vmem:[#allocation58_spill] sm:$0xff]  ;;  %v6448_v7 = vld [vmem:[#allocation11_spill] sm:$0xff] }
 0x1c4   : > { %v2654_v5 = vsub.f32 %v6442_v58, %v2252_v56  ;;  %v2256_v43 = vsel %vm2255_vm15, %v5177_v37, %v2254_v32  ;;  %v5300_v23 = vpop.f32.mrb[105].mxu0  ;;  %v5302_v40 = vpop.f32.mrb[105].mxu1  ;;  %v5306_v8 = vadd.f32 %v1537_v16, %v1405_v2  ;;  %v1538_v21 = vmul.f32 %v6445_v0, %v6445_v0 }
 0x1c5   : > { %6444 = vst [vmem:[#allocation5_spill] sm:$0xff] %v5300_v23  ;;  %v2259_v27 = vsel %vm2257_vm0, %v2258_v38, %v2256_v43  ;;  %v1407_v19 = vmul.f32 %v4895_v15, %v4895_v15  ;;  %v5312_v56 = vpop.f32.mrb[106].mxu0  ;;  %v5314_v32 = vpop.f32.mrb[106].mxu1  ;;  %vm2264_vm2 = vcmp.eq.f32.partialorder %v5226_v47, 0.0  ;;  %v1539_v37 = vmul.f32 %v4897_v22, %v4897_v22 }
 0x1c6   : > { %6446 = vst [vmem:[#allocation6_spill] sm:$0xff] %v5312_v56  ;;  %6447 = vst [vmem:[#allocation7_spill] sm:$0xff] %v5314_v32  ;;  %v2720_v58 = vmul.f32 %v2654_v5, %v2654_v5  ;;  %v2655_v23 = vsub.f32 %v6448_v7, %v2259_v27  ;;  %v5320_v2 = vpop.f32.mrb[107].mxu0  ;;  %v5322_v16 = vpop.f32.mrb[107].mxu1  ;;  %v2265_v43 = vand.u32 2147483648, %v5226_v47  ;;  %vm2269_vm3 = vcmp.eq.f32.partialorder %v5268_v18, inf }
 0x1c7   : > { %6449 = vst [vmem:[#allocation50_spill] sm:$0xff] %v5320_v2  ;;  %6450 = vst [vmem:[#allocation51_spill] sm:$0xff] %v5322_v16  ;;  %v3274_v38 = vpop.eup %3273  ;;  %3279 = vrsqrt.f32 %v5306_v8  ;;  %v1408_v15 = vmul.f32 %v4911_v30, %v4911_v30  ;;  %v5330_v7 = vadd.f32 %v1538_v21, %v1406_v42  ;;  %v5332_v22 = vadd.f32 %v1539_v37, %v1407_v19 }
 0x1c8   : > { %v2812_v5 = vadd.f32 %v2811_v20, %v2720_v58  ;;  %v2721_v27 = vmul.f32 %v2655_v23, %v2655_v23  ;;  %v2261_v0 = vmul.f32 %v3274_v38, %v5226_v47  ;;  %v1540_v16 = vmul.f32 %v4913_v60, %v4913_v60 }
 0x1c9   : > { %v1409_v2 = vmul.f32 %v4947_v59, %v4947_v59  ;;  %v1541_v32 = vmul.f32 %v4949_v24, %v4949_v24  ;;  %vm2271_vm4 = vcmp.eq.f32.partialorder %v5268_v18, 0.0  ;;  %3281 = vrsqrt.f32 %v5330_v7 }
 0x1ca   : > { %v2781_v56 = vadd.f32 %v2780_v55, %v2721_v27  ;;  %v2263_v30 = vsel %vm2262_vm1, %v5226_v47, %v2261_v0  ;;  %v2272_v60 = vand.u32 2147483648, %v5268_v18  ;;  %vm2276_vm5 = vcmp.eq.f32.partialorder %v5270_v14, inf  ;;  %v6451_v55 = vld [vmem:[#allocation12_spill] sm:$0xff] }
 0x1cb   : > { %v3276_v20 = vpop.eup %3275  ;;  %v2266_v42 = vsel %vm2264_vm2, %v2265_v43, %v2263_v30  ;;  %3283 = vrsqrt.f32 %v5332_v22  ;;  %v5350_v59 = vpop.f32.mrb[108].mxu0  ;;  %vm2278_vm6 = vcmp.eq.f32.partialorder %v5270_v14, 0.0  ;;  %v2279_v19 = vand.u32 2147483648, %v5270_v14 }
 0x1cc   : > { %v5352_v24 = vpop.f32.mrb[108].mxu1  ;;  %v2656_v23 = vsub.f32 %v6451_v55, %v2266_v42  ;;  %v2268_v21 = vmul.f32 %v3276_v20, %v5268_v18  ;;  %v5358_v47 = vpop.f32.mrb[109].mxu0  ;;  %vm2283_vm7 = vcmp.eq.f32.partialorder %v5306_v8, inf  ;;  %vm2285_vm8 = vcmp.eq.f32.partialorder %v5306_v8, 0.0 }
 0x1cd   : > { %6452 = vst [vmem:[#allocation8_spill] sm:$0xff] %v5358_v47  ;;  %v5360_v58 = vpop.f32.mrb[109].mxu1  ;;  %v3278_v37 = vpop.eup %3277  ;;  %v5364_v38 = vadd.f32 %v1540_v16, %v1408_v15  ;;  %v5366_v43 = vadd.f32 %v1541_v32, %v1409_v2  ;;  %v2286_v55 = vand.u32 2147483648, %v5306_v8  ;;  %v1410_v2 = vmul.f32 %v4959_v11, %v4959_v11 }
 0x1ce   : > { %6453 = vst [vmem:[#allocation9_spill] sm:$0xff] %v5360_v58  ;;  %v5368_v27 = vpop.f32.mrb[110].mxu0  ;;  %v5370_v0 = vpop.f32.mrb[110].mxu1  ;;  %v2722_v30 = vmul.f32 %v2656_v23, %v2656_v23  ;;  %v2270_v20 = vsel %vm2269_vm3, %v5268_v18, %v2268_v21  ;;  %v2275_v42 = vmul.f32 %v3278_v37, %v5270_v14  ;;  %v1542_v16 = vmul.f32 %v4961_v3, %v4961_v3  ;;  %v6457_v23 = vld [vmem:[#allocation13_spill] sm:$0xff] }
 0x1cf   : > { %6454 = vst [vmem:[#allocation10_spill] sm:$0xff] %v5370_v0  ;;  %v5377_v58 = vpop.f32.mrb[111].mxu0  ;;  %v5379_v47 = vpop.f32.mrb[111].mxu1  ;;  %v2273_v32 = vsel %vm2271_vm4, %v2272_v60, %v2270_v20  ;;  %3285 = vrsqrt.f32 %v5364_v38  ;;  %vm2290_vm9 = vcmp.eq.f32.partialorder %v5330_v7, inf  ;;  %vm2292_vm10 = vcmp.eq.f32.partialorder %v5330_v7, 0.0 }
 0x1d0   : > { %6455 = vst [vmem:[#allocation57_spill] sm:$0xff] %v5377_v58  ;;  %6456 = vst [vmem:[#allocation58_spill] sm:$0xff] %v5379_v47  ;;  %v2813_v15 = vadd.f32 %v2812_v5, %v2722_v30  ;;  %v2657_v21 = vsub.f32 %v6457_v23, %v2273_v32  ;;  %v2277_v37 = vsel %vm2276_vm5, %v5270_v14, %v2275_v42  ;;  %v2293_v11 = vand.u32 2147483648, %v5330_v7  ;;  %v6458_v5 = vld [vmem:[#allocation14_spill] sm:$0xff]  ;;  %v6459_v14 = vld [vmem:[#allocation64_spill] sm:$0xff] }
 0x1d1   : > { %v3280_v47 = vpop.eup %3279  ;;  %v2280_v18 = vsel %vm2278_vm6, %v2279_v19, %v2277_v37  ;;  %3287 = vrsqrt.f32 %v5366_v43  ;;  %vm2297_vm11 = vcmp.eq.f32.partialorder %v5332_v22, inf  ;;  %v5401_v20 = vadd.f32 %v1542_v16, %v1410_v2  ;;  %v6460_v32 = vld [vmem:[#allocation65_spill] sm:$0xff]  ;;  %v6463_v16 = vld [vmem:[#allocation66_spill] sm:$0xff] }
 0x1d2   : > { %v2723_v3 = vmul.f32 %v2657_v21, %v2657_v21  ;;  %v2658_v60 = vsub.f32 %v6458_v5, %v2280_v18  ;;  %v2282_v30 = vmul.f32 %v3280_v47, %v5306_v8  ;;  %v1411_v42 = vmul.f32 %v4970_v4, %v4970_v4 }
 0x1d3   : > { %v1543_v19 = vmul.f32 %v6459_v14, %v6459_v14  ;;  %v1412_v23 = vmul.f32 %v6460_v32, %v6460_v32  ;;  %v5409_v37 = vpop.f32.mrb[112].mxu0  ;;  %v5411_v21 = vpop.f32.mrb[112].mxu1  ;;  %v1544_v4 = vmul.f32 %v6463_v16, %v6463_v16  ;;  %vm2299_vm12 = vcmp.eq.f32.partialorder %v5332_v22, 0.0 }
 0x1d4   : > { %6461 = vst [vmem:[#allocation11_spill] sm:$0xff] %v5409_v37  ;;  %6462 = vst [vmem:[#allocation12_spill] sm:$0xff] %v5411_v21  ;;  %v3282_v18 = vpop.eup %3281  ;;  %v2782_v5 = vadd.f32 %v2781_v56, %v2723_v3  ;;  %v2724_v47 = vmul.f32 %v2658_v60, %v2658_v60  ;;  %v2284_v2 = vsel %vm2283_vm7, %v5306_v8, %v2282_v30  ;;  %v5418_v58 = vpop.f32.mrb[113].mxu0  ;;  %3289 = vrsqrt.f32 %v5401_v20  ;;  %v6466_v30 = vld [vmem:[#allocation15_spill] sm:$0xff] }
 0x1d5   : > { %6464 = vst [vmem:[#allocation13_spill] sm:$0xff] %v5418_v58  ;;  %v5420_v14 = vpop.f32.mrb[113].mxu1  ;;  %v3284_v0 = vpop.eup %3283  ;;  %v2287_v32 = vsel %vm2285_vm8, %v2286_v55, %v2284_v2  ;;  %v2289_v21 = vmul.f32 %v3282_v18, %v5330_v7  ;;  %vm2304_vm13 = vcmp.eq.f32.partialorder %v5364_v38, inf  ;;  %v5442_v18 = vadd.f32 %v1543_v19, %v1411_v42 }
 0x1d6   : > { %6465 = vst [vmem:[#allocation14_spill] sm:$0xff] %v5420_v14  ;;  %v5427_v56 = vpop.f32.mrb[114].mxu0  ;;  %v5429_v3 = vpop.f32.mrb[114].mxu1  ;;  %v2814_v60 = vadd.f32 %v2813_v15, %v2724_v47  ;;  %v2659_v16 = vsub.f32 %v6466_v30, %v2287_v32  ;;  %v2296_v58 = vmul.f32 %v3284_v0, %v5332_v22  ;;  %v2300_v14 = vand.u32 2147483648, %v5332_v22  ;;  %v6468_v30 = vld [vmem:[#allocation16_spill] sm:$0xff] }
 0x1d7   : > { %v5434_v37 = vpop.f32.mrb[115].mxu0  ;;  %v5436_v8 = vpop.f32.mrb[115].mxu1  ;;  %v2291_v55 = vsel %vm2290_vm9, %v5330_v7, %v2289_v21  ;;  %v5444_v2 = vadd.f32 %v1544_v4, %v1412_v23  ;;  %vm2306_vm14 = vcmp.eq.f32.partialorder %v5364_v38, 0.0  ;;  %v2307_v42 = vand.u32 2147483648, %v5364_v38  ;;  %v6469_v23 = vld [vmem:[#allocation17_spill] sm:$0xff] }
 0x1d8   : > { %6467 = vst [vmem:[#allocation64_spill] sm:$0xff] %v5436_v8  ;;  %v2725_v15 = vmul.f32 %v2659_v16, %v2659_v16  ;;  %v2294_v0 = vsel %vm2292_vm10, %v2293_v11, %v2291_v55  ;;  %v2298_v47 = vsel %vm2297_vm11, %v5332_v22, %v2296_v58  ;;  %3291 = vrsqrt.f32 %v5442_v18 }
 0x1d9   : > { %v3286_v32 = vpop.eup %3285  ;;  %v2660_v8 = vsub.f32 %v6468_v30, %v2294_v0  ;;  %v2301_v21 = vsel %vm2299_vm12, %v2300_v14, %v2298_v47  ;;  %vm2311_vm15 = vcmp.eq.f32.partialorder %v5366_v43, inf  ;;  %vm2313_vm0 = vcmp.eq.f32.partialorder %v5366_v43, 0.0 }
 0x1da   : > { %v2783_v19 = vadd.f32 %v2782_v5, %v2725_v15  ;;  %v2661_v7 = vsub.f32 %v6469_v23, %v2301_v21  ;;  %v2303_v11 = vmul.f32 %v3286_v32, %v5364_v38  ;;  %3293 = vrsqrt.f32 %v5444_v2 }
 0x1db   : > { %v3288_v58 = vpop.eup %3287  ;;  %v2726_v4 = vmul.f32 %v2660_v8, %v2660_v8  ;;  %v1413_v22 = vmul.f32 %v5045_v12, %v5045_v12  ;;  %v5464_v14 = vpop.f32.mrb[116].mxu0  ;;  %v2314_v15 = vand.u32 2147483648, %v5366_v43  ;;  %vm2318_vm1 = vcmp.eq.f32.partialorder %v5401_v20, inf }
 0x1dc   : > { %v2727_v16 = vmul.f32 %v2661_v7, %v2661_v7  ;;  %v2305_v5 = vsel %vm2304_vm13, %v5364_v38, %v2303_v11  ;;  %v2310_v55 = vmul.f32 %v3288_v58, %v5366_v43  ;;  %v5471_v0 = vpop.f32.mrb[116].mxu1  ;;  %v5473_v8 = vpop.f32.mrb[117].mxu0  ;;  %v1545_v12 = vmul.f32 %v5047_v6, %v5047_v6  ;;  %v6470_v7 = vld [vmem:[#allocation18_spill] sm:$0xff] }
 0x1dd   : > { %v2815_v47 = vadd.f32 %v2814_v60, %v2726_v4  ;;  %v2308_v32 = vsel %vm2306_vm14, %v2307_v42, %v2305_v5  ;;  %v5480_v30 = vpop.f32.mrb[117].mxu1  ;;  %v5482_v21 = vpop.f32.mrb[118].mxu0  ;;  %v1414_v38 = vmul.f32 %v5057_v61, %v5057_v61  ;;  %v6473_v61 = vld [vmem:[#allocation19_spill] sm:$0xff]  ;;  %vm2320_vm2 = vcmp.eq.f32.partialorder %v5401_v20, 0.0 }
 0x1de   : > { %v2784_v23 = vadd.f32 %v2783_v19, %v2727_v16  ;;  %v2662_v11 = vsub.f32 %v6470_v7, %v2308_v32  ;;  %v2312_v58 = vsel %vm2311_vm15, %v5366_v43, %v2310_v55  ;;  %v5490_v60 = vpop.f32.mrb[118].mxu1  ;;  %v5492_v42 = vpop.f32.mrb[119].mxu0  ;;  %v5496_v5 = vadd.f32 %v1545_v12, %v1413_v22 }
 0x1df   : > { %6471 = vst [vmem:[#allocation65_spill] sm:$0xff] %v5490_v60  ;;  %6472 = vst [vmem:[#allocation66_spill] sm:$0xff] %v5492_v42  ;;  %v3290_v4 = vpop.eup %3289  ;;  %v2315_v6 = vsel %vm2313_vm0, %v2314_v15, %v2312_v58  ;;  %v1546_v19 = vmul.f32 %v5059_v17, %v5059_v17  ;;  %v1415_v16 = vmul.f32 %v5067_v10, %v5067_v10  ;;  %v5502_v55 = vpop.f32.mrb[119].mxu1  ;;  %v2321_v43 = vand.u32 2147483648, %v5401_v20 }
 0x1e0   : > { %v2728_v32 = vmul.f32 %v2662_v11, %v2662_v11  ;;  %v2663_v7 = vsub.f32 %v6473_v61, %v2315_v6  ;;  %v2317_v60 = vmul.f32 %v3290_v4, %v5401_v20  ;;  %v1547_v42 = vmul.f32 %v5069_v51, %v5069_v51 }
 0x1e1   : > { %vm2325_vm3 = vcmp.eq.f32.partialorder %v5442_v18, inf  ;;  %3295 = vrsqrt.f32 %v5496_v5  ;;  %v5515_v15 = vadd.f32 %v1546_v19, %v1414_v38  ;;  %v1416_v51 = vmul.f32 %v5077_v54, %v5077_v54 }
 0x1e2   : > { %v2816_v17 = vadd.f32 %v2815_v47, %v2728_v32  ;;  %v2729_v10 = vmul.f32 %v2663_v7, %v2663_v7  ;;  %v2319_v22 = vsel %vm2318_vm1, %v5401_v20, %v2317_v60  ;;  %v3292_v12 = vpop.eup %3291  ;;  %v5517_v58 = vadd.f32 %v1547_v42, %v1415_v16  ;;  %v6474_v32 = vld [vmem:[#allocation20_spill] sm:$0xff] }
 0x1e3   : > { %v2322_v11 = vsel %vm2320_vm2, %v2321_v43, %v2319_v22  ;;  %v1548_v4 = vmul.f32 %v5079_v26, %v5079_v26  ;;  %v5523_v6 = vpop.f32.mrb[120].mxu0  ;;  %v2324_v7 = vmul.f32 %v3292_v12, %v5442_v18  ;;  %3297 = vrsqrt.f32 %v5515_v15  ;;  %v5528_v20 = vpop.f32.mrb[120].mxu1 }
 0x1e4   : > { %v2785_v47 = vadd.f32 %v2784_v23, %v2729_v10  ;;  %v2664_v61 = vsub.f32 %v6474_v32, %v2322_v11  ;;  %v5530_v38 = vpop.f32.mrb[121].mxu0  ;;  %v3294_v60 = vpop.eup %3293  ;;  %vm2327_vm4 = vcmp.eq.f32.partialorder %v5442_v18, 0.0  ;;  %v2328_v54 = vand.u32 2147483648, %v5442_v18 }
 0x1e5   : > { %vm2332_vm5 = vcmp.eq.f32.partialorder %v5444_v2, inf  ;;  %3299 = vrsqrt.f32 %v5517_v58  ;;  %v5536_v26 = vpop.f32.mrb[121].mxu1  ;;  %v5538_v23 = vpop.f32.mrb[122].mxu0  ;;  %v2326_v19 = vsel %vm2325_vm3, %v5442_v18, %v2324_v7  ;;  %v2331_v16 = vmul.f32 %v3294_v60, %v5444_v2 }
 0x1e6   : > { %6475 = vst [vmem:[#allocation15_spill] sm:$0xff] %v5538_v23  ;;  %v2730_v42 = vmul.f32 %v2664_v61, %v2664_v61  ;;  %vm2334_vm6 = vcmp.eq.f32.partialorder %v5444_v2, 0.0  ;;  %v5545_v43 = vpop.f32.mrb[122].mxu1  ;;  %v5547_v10 = vpop.f32.mrb[123].mxu0  ;;  %v2329_v22 = vsel %vm2327_vm4, %v2328_v54, %v2326_v19  ;;  %v2335_v12 = vand.u32 2147483648, %v5444_v2  ;;  %v6477_v23 = vld [vmem:[#allocation21_spill] sm:$0xff] }
 0x1e7   : > { %6476 = vst [vmem:[#allocation16_spill] sm:$0xff] %v5547_v10  ;;  %vm2339_vm7 = vcmp.eq.f32.partialorder %v5496_v5, inf  ;;  %v5551_v11 = vadd.f32 %v1548_v4, %v1416_v51  ;;  %v5553_v32 = vpop.f32.mrb[123].mxu1  ;;  %v2665_v18 = vsub.f32 %v6477_v23, %v2329_v22  ;;  %v2333_v7 = vsel %vm2332_vm5, %v5444_v2, %v2331_v16  ;;  %v6478_v4 = vld [vmem:[#allocation22_spill] sm:$0xff] }
 0x1e8   : > { %v2817_v61 = vadd.f32 %v2816_v17, %v2730_v42  ;;  %v1417_v60 = vmul.f32 %v5113_v36, %v5113_v36  ;;  %v2336_v10 = vsel %vm2334_vm6, %v2335_v12, %v2333_v7  ;;  %vm2341_vm8 = vcmp.eq.f32.partialorder %v5496_v5, 0.0 }
 0x1e9   : > { %v2342_v54 = vand.u32 2147483648, %v5496_v5  ;;  %3301 = vrsqrt.f32 %v5551_v11  ;;  %v2731_v51 = vmul.f32 %v2665_v18, %v2665_v18  ;;  %v2666_v19 = vsub.f32 %v6478_v4, %v2336_v10 }
 0x1ea   : > { %vm2346_vm9 = vcmp.eq.f32.partialorder %v5515_v15, inf  ;;  %v1549_v17 = vmul.f32 %v5115_v9, %v5115_v9  ;;  %v1418_v2 = vmul.f32 %v5124_v35, %v5124_v35  ;;  %v1550_v36 = vmul.f32 %v5126_v49, %v5126_v49 }
 0x1eb   : > { %v3296_v23 = vpop.eup %3295  ;;  %v1419_v42 = vmul.f32 %v5134_v25, %v5134_v25  ;;  %v1551_v16 = vmul.f32 %v5136_v41, %v5136_v41  ;;  %v5576_v22 = vpop.f32.mrb[124].mxu0  ;;  %v2786_v10 = vadd.f32 %v2785_v47, %v2731_v51  ;;  %v2732_v12 = vmul.f32 %v2666_v19, %v2666_v19 }
 0x1ec   : > { %v2338_v18 = vmul.f32 %v3296_v23, %v5496_v5  ;;  %v5579_v9 = vadd.f32 %v1549_v17, %v1417_v60  ;;  %v5581_v7 = vpop.f32.mrb[124].mxu1  ;;  %v5583_v35 = vpop.f32.mrb[125].mxu0  ;;  %vm2348_vm10 = vcmp.eq.f32.partialorder %v5515_v15, 0.0  ;;  %v2349_v49 = vand.u32 2147483648, %v5515_v15 }
 0x1ed   : > { %v5587_v25 = vadd.f32 %v1550_v36, %v1418_v2  ;;  %v5589_v4 = vadd.f32 %v1551_v16, %v1419_v42  ;;  %v5591_v41 = vpop.f32.mrb[125].mxu1  ;;  %v5593_v47 = vpop.f32.mrb[126].mxu0  ;;  %v2818_v19 = vadd.f32 %v2817_v61, %v2732_v12  ;;  %vm2353_vm11 = vcmp.eq.f32.partialorder %v5517_v58, inf  ;;  %v6484_v12 = vld [vmem:[#allocation23_spill] sm:$0xff] }
 0x1ee   : > { %6479 = vst [vmem:[#allocation17_spill] sm:$0xff] %v5591_v41  ;;  %6480 = vst [vmem:[#allocation18_spill] sm:$0xff] %v5593_v47  ;;  %v3298_v51 = vpop.eup %3297  ;;  %v2340_v60 = vsel %vm2339_vm7, %v5496_v5, %v2338_v18  ;;  %3303 = vrsqrt.f32 %v5579_v9  ;;  %v5600_v17 = vpop.f32.mrb[126].mxu1  ;;  %vm2355_vm12 = vcmp.eq.f32.partialorder %v5517_v58, 0.0  ;;  %v1420_v61 = vmul.f32 %v5148_v13, %v5148_v13 }
 0x1ef   : > { %6481 = vst [vmem:[#allocation19_spill] sm:$0xff] %v5600_v17  ;;  %v5602_v23 = vpop.f32.mrb[127].mxu0  ;;  %v3300_v2 = vpop.eup %3299  ;;  %v2343_v36 = vsel %vm2341_vm8, %v2342_v54, %v2340_v60  ;;  %v2345_v42 = vmul.f32 %v3298_v51, %v5515_v15  ;;  %3305 = vrsqrt.f32 %v5587_v25  ;;  %v2356_v54 = vand.u32 2147483648, %v5517_v58 }
 0x1f0   : > { %6482 = vst [vmem:[#allocation20_spill] sm:$0xff] %v5602_v23  ;;  %v5610_v16 = vpop.f32.mrb[127].mxu1  ;;  %v2667_v18 = vsub.f32 %v6484_v12, %v2343_v36  ;;  %v2352_v47 = vmul.f32 %v3300_v2, %v5517_v58  ;;  %v1552_v23 = vmul.f32 %v5150_v52, %v5150_v52  ;;  %vm2360_vm13 = vcmp.eq.f32.partialorder %v5551_v11, inf  ;;  %v6485_v2 = vld [vmem:[#allocation24_spill] sm:$0xff] }
 0x1f1   : > { %6483 = vst [vmem:[#allocation21_spill] sm:$0xff] %v5610_v16  ;;  %v2347_v5 = vsel %vm2346_vm9, %v5515_v15, %v2345_v42  ;;  %3307 = vrsqrt.f32 %v5589_v4  ;;  %vm2362_vm14 = vcmp.eq.f32.partialorder %v5551_v11, 0.0  ;;  %v2363_v12 = vand.u32 2147483648, %v5551_v11 }
 0x1f2   : > { %v2733_v13 = vmul.f32 %v2667_v18, %v2667_v18  ;;  %v2350_v51 = vsel %vm2348_vm10, %v2349_v49, %v2347_v5  ;;  %v2354_v60 = vsel %vm2353_vm11, %v5517_v58, %v2352_v47  ;;  %vm2367_vm15 = vcmp.eq.f32.partialorder %v5579_v9, inf  ;;  %v6486_v49 = vld [vmem:[#allocation25_spill] sm:$0xff] }
 0x1f3   : > { %v3302_v52 = vpop.eup %3301  ;;  %v2668_v36 = vsub.f32 %v6485_v2, %v2350_v51  ;;  %v2357_v42 = vsel %vm2355_vm12, %v2356_v54, %v2354_v60  ;;  %v5634_v18 = vpop.f32.mrb[128].mxu0  ;;  %v5638_v47 = vadd.f32 %v1552_v23, %v1420_v61  ;;  %vm2369_vm0 = vcmp.eq.f32.partialorder %v5579_v9, 0.0 }
 0x1f4   : > { %v2787_v15 = vadd.f32 %v2786_v10, %v2733_v13  ;;  %v2669_v5 = vsub.f32 %v6486_v49, %v2357_v42  ;;  %v2359_v16 = vmul.f32 %v3302_v52, %v5551_v11  ;;  %v5640_v17 = vpop.f32.mrb[128].mxu1  ;;  %v5642_v41 = vpop.f32.mrb[129].mxu0  ;;  %v1421_v58 = vmul.f32 %v5179_v1, %v5179_v1 }
 0x1f5   : > { %v2734_v51 = vmul.f32 %v2668_v36, %v2668_v36  ;;  %v1553_v54 = vmul.f32 %v5181_v45, %v5181_v45  ;;  %v5649_v10 = vpop.f32.mrb[129].mxu1  ;;  %v5651_v13 = vpop.f32.mrb[130].mxu0  ;;  %v2370_v61 = vand.u32 2147483648, %v5579_v9  ;;  %3309 = vrsqrt.f32 %v5638_v47 }
 0x1f6   : > { %6487 = vst [vmem:[#allocation22_spill] sm:$0xff] %v5649_v10  ;;  %6488 = vst [vmem:[#allocation23_spill] sm:$0xff] %v5651_v13  ;;  %v2735_v60 = vmul.f32 %v2669_v5, %v2669_v5  ;;  %v2361_v23 = vsel %vm2360_vm13, %v5551_v11, %v2359_v16  ;;  %v5658_v52 = vpop.f32.mrb[130].mxu1  ;;  %v5660_v2 = vpop.f32.mrb[131].mxu0  ;;  %vm2374_vm1 = vcmp.eq.f32.partialorder %v5587_v25, inf  ;;  %v1422_v36 = vmul.f32 %v5188_v39, %v5188_v39  ;;  %v6490_v5 = vld [vmem:[#allocation26_spill] sm:$0xff] }
 0x1f7   : > { %6489 = vst [vmem:[#allocation24_spill] sm:$0xff] %v5660_v2  ;;  %v2819_v1 = vadd.f32 %v2818_v19, %v2734_v51  ;;  %v2364_v45 = vsel %vm2362_vm14, %v2363_v12, %v2361_v23  ;;  %v5667_v42 = vpop.f32.mrb[131].mxu1  ;;  %v5670_v10 = vadd.f32 %v1553_v54, %v1421_v58  ;;  %v1554_v2 = vmul.f32 %v5190_v34, %v5190_v34 }
 0x1f8   : > { %v3304_v16 = vpop.eup %3303  ;;  %v2788_v49 = vadd.f32 %v2787_v15, %v2735_v60  ;;  %v2670_v13 = vsub.f32 %v6490_v5, %v2364_v45  ;;  %vm2376_vm2 = vcmp.eq.f32.partialorder %v5587_v25, 0.0  ;;  %v1423_v11 = vmul.f32 %v5197_v57, %v5197_v57  ;;  %v6491_v45 = vld [vmem:[#allocation27_spill] sm:$0xff] }
 0x1f9   : > { %v2366_v19 = vmul.f32 %v3304_v16, %v5579_v9  ;;  %v1555_v39 = vmul.f32 %v5199_v50, %v5199_v50  ;;  %v3306_v12 = vpop.eup %3305  ;;  %v2377_v15 = vand.u32 2147483648, %v5587_v25  ;;  %vm2381_vm3 = vcmp.eq.f32.partialorder %v5589_v4, inf }
 0x1fa   : > { %v2736_v51 = vmul.f32 %v2670_v13, %v2670_v13  ;;  %3311 = vrsqrt.f32 %v5670_v10  ;;  %v2373_v54 = vmul.f32 %v3306_v12, %v5587_v25  ;;  %vm2383_vm4 = vcmp.eq.f32.partialorder %v5589_v4, 0.0 }
 0x1fb   : > { %v3308_v58 = vpop.eup %3307  ;;  %v2368_v34 = vsel %vm2367_vm15, %v5579_v9, %v2366_v19  ;;  %v5688_v57 = vadd.f32 %v1554_v2, %v1422_v36  ;;  %v5693_v23 = vadd.f32 %v1555_v39, %v1423_v11  ;;  %v2384_v19 = vand.u32 2147483648, %v5589_v4  ;;  %v6492_v36 = vld [vmem:[#allocation28_spill] sm:$0xff] }
 0x1fc   : > { %v2820_v50 = vadd.f32 %v2819_v1, %v2736_v51  ;;  %v2371_v13 = vsel %vm2369_vm0, %v2370_v61, %v2368_v34  ;;  %v2380_v60 = vmul.f32 %v3308_v58, %v5589_v4  ;;  %v2375_v5 = vsel %vm2374_vm1, %v5587_v25, %v2373_v54  ;;  %v6493_v25 = vld [vmem:[#allocation29_spill] sm:$0xff] }
 0x1fd   : > { %v2671_v16 = vsub.f32 %v6491_v45, %v2371_v13  ;;  %3313 = vrsqrt.f32 %v5688_v57  ;;  %v2378_v2 = vsel %vm2376_vm2, %v2377_v15, %v2375_v5  ;;  %vm2388_vm5 = vcmp.eq.f32.partialorder %v5638_v47, inf }
 0x1fe   : > { %v2382_v9 = vsel %vm2381_vm3, %v5589_v4, %v2380_v60  ;;  %v1424_v61 = vmul.f32 %v5204_v33, %v5204_v33  ;;  %v2672_v11 = vsub.f32 %v6492_v36, %v2378_v2  ;;  %3315 = vrsqrt.f32 %v5693_v23 }
 0x1ff   : > { %v2737_v1 = vmul.f32 %v2671_v16, %v2671_v16  ;;  %v2385_v39 = vsel %vm2383_vm4, %v2384_v19, %v2382_v9  ;;  %v3310_v12 = vpop.eup %3309  ;;  %vm2390_vm6 = vcmp.eq.f32.partialorder %v5638_v47, 0.0  ;;  %v2391_v15 = vand.u32 2147483648, %v5638_v47 }
 0x200   : > { %v2673_v51 = vsub.f32 %v6493_v25, %v2385_v39  ;;  %vm2395_vm7 = vcmp.eq.f32.partialorder %v5670_v10, inf  ;;  %v2738_v34 = vmul.f32 %v2672_v11, %v2672_v11  ;;  %v2387_v33 = vmul.f32 %v3310_v12, %v5638_v47 }
 0x201   : > { %v2789_v58 = vadd.f32 %v2788_v49, %v2737_v1  ;;  %v1556_v54 = vmul.f32 %v5206_v31, %v5206_v31  ;;  %vm2397_vm8 = vcmp.eq.f32.partialorder %v5670_v10, 0.0  ;;  %v1425_v13 = vmul.f32 %v5234_v28, %v5234_v28 }
 0x202   : > { %v2739_v4 = vmul.f32 %v2673_v51, %v2673_v51  ;;  %v1557_v60 = vmul.f32 %v5236_v63, %v5236_v63  ;;  %v2821_v45 = vadd.f32 %v2820_v50, %v2738_v34  ;;  %v2389_v49 = vsel %vm2388_vm5, %v5638_v47, %v2387_v33  ;;  %v6494_v63 = vld [vmem:[#allocation30_spill] sm:$0xff]  ;;  %v6495_v51 = vld [vmem:[#allocation3_spill] sm:$0xff] }
 0x203   : > { %v5728_v16 = vadd.f32 %v1556_v54, %v1424_v61  ;;  %v1426_v5 = vmul.f32 %v5243_v53, %v5243_v53  ;;  %v2392_v2 = vsel %vm2390_vm6, %v2391_v15, %v2389_v49  ;;  %v1558_v28 = vmul.f32 %v5245_v48, %v5245_v48  ;;  %v6496_v33 = vld [vmem:[#allocation31_spill] sm:$0xff] }
 0x204   : > { %v3312_v31 = vpop.eup %3311  ;;  %v2790_v19 = vadd.f32 %v2789_v58, %v2739_v4  ;;  %v5734_v9 = vadd.f32 %v1557_v60, %v1425_v13  ;;  %v2674_v50 = vsub.f32 %v6494_v63, %v2392_v2  ;;  %v2398_v61 = vand.u32 2147483648, %v5670_v10  ;;  %v6497_v4 = vld [vmem:[#allocation4_spill] sm:$0xff] }
 0x205   : > { %v2394_v1 = vmul.f32 %v3312_v31, %v5670_v10  ;;  %3317 = vrsqrt.f32 %v5728_v16  ;;  %vm2402_vm9 = vcmp.eq.f32.partialorder %v5688_v57, inf  ;;  %vm2404_vm10 = vcmp.eq.f32.partialorder %v5688_v57, 0.0  ;;  %v6498_v31 = vld [vmem:[#allocation32_spill] sm:$0xff] }
 0x206   : > { %v2405_v53 = vand.u32 2147483648, %v5688_v57  ;;  %3319 = vrsqrt.f32 %v5734_v9  ;;  %v2740_v36 = vmul.f32 %v2674_v50, %v2674_v50  ;;  %vm2409_vm11 = vcmp.eq.f32.partialorder %v5693_v23, inf }
 0x207   : > { %v3314_v47 = vpop.eup %3313  ;;  %v2396_v48 = vsel %vm2395_vm7, %v5670_v10, %v2394_v1  ;;  %v1427_v11 = vmul.f32 %v5252_v46, %v5252_v46  ;;  %v5755_v25 = vadd.f32 %v1558_v28, %v1426_v5  ;;  %v1559_v15 = vmul.f32 %v6495_v51, %v6495_v51 }
 0x208   : > { %v2399_v39 = vsel %vm2397_vm8, %v2398_v61, %v2396_v48  ;;  %v2401_v12 = vmul.f32 %v3314_v47, %v5688_v57  ;;  %v3316_v58 = vpop.eup %3315  ;;  %v2822_v34 = vadd.f32 %v2821_v45, %v2740_v36  ;;  %v1428_v13 = vmul.f32 %v6497_v4, %v6497_v4  ;;  %v6499_v47 = vld [vmem:[#allocation33_spill] sm:$0xff] }
 0x209   : > { %v2675_v54 = vsub.f32 %v6496_v33, %v2399_v39  ;;  %v1560_v46 = vmul.f32 %v5263_v44, %v5263_v44  ;;  %v2408_v60 = vmul.f32 %v3316_v58, %v5693_v23  ;;  %vm2411_vm12 = vcmp.eq.f32.partialorder %v5693_v23, 0.0 }
 0x20a   : > { %v2403_v10 = vsel %vm2402_vm9, %v5688_v57, %v2401_v12  ;;  %3321 = vrsqrt.f32 %v5755_v25  ;;  %v2412_v5 = vand.u32 2147483648, %v5693_v23  ;;  %vm2416_vm13 = vcmp.eq.f32.partialorder %v5728_v16, inf }
 0x20b   : > { %v2741_v49 = vmul.f32 %v2675_v54, %v2675_v54  ;;  %v2406_v45 = vsel %vm2404_vm10, %v2405_v53, %v2403_v10  ;;  %v2410_v2 = vsel %vm2409_vm11, %v5693_v23, %v2408_v60  ;;  %v5778_v28 = vadd.f32 %v1559_v15, %v1427_v11  ;;  %v6500_v15 = vld [vmem:[#allocation5_spill] sm:$0xff]  ;;  %v6501_v60 = vld [vmem:[#allocation34_spill] sm:$0xff] }
 0x20c   : > { %v2676_v44 = vsub.f32 %v6498_v31, %v2406_v45  ;;  %v5780_v63 = vadd.f32 %v1560_v46, %v1428_v13  ;;  %v2413_v1 = vsel %vm2411_vm12, %v2412_v5, %v2410_v2  ;;  %v1429_v57 = vmul.f32 %v5290_v29, %v5290_v29  ;;  %v6503_v5 = vld [vmem:[#allocation35_spill] sm:$0xff] }
 0x20d   : > { %v2791_v50 = vadd.f32 %v2790_v19, %v2741_v49  ;;  %v1561_v61 = vmul.f32 %v5292_v62, %v5292_v62  ;;  %v2677_v36 = vsub.f32 %v6499_v47, %v2413_v1  ;;  %vm2418_vm14 = vcmp.eq.f32.partialorder %v5728_v16, 0.0 }
 0x20e   : > { %v2742_v53 = vmul.f32 %v2676_v44, %v2676_v44  ;;  %3323 = vrsqrt.f32 %v5778_v28  ;;  %v2419_v48 = vand.u32 2147483648, %v5728_v16  ;;  %vm2423_vm15 = vcmp.eq.f32.partialorder %v5734_v9, inf }
 0x20f   : > { %v3318_v23 = vpop.eup %3317  ;;  %vm2425_vm0 = vcmp.eq.f32.partialorder %v5734_v9, 0.0  ;;  %3325 = vrsqrt.f32 %v5780_v63  ;;  %v2743_v11 = vmul.f32 %v2677_v36, %v2677_v36  ;;  %v2426_v39 = vand.u32 2147483648, %v5734_v9 }
 0x210   : > { %v3320_v29 = vpop.eup %3319  ;;  %v2823_v19 = vadd.f32 %v2822_v34, %v2742_v53  ;;  %v2415_v62 = vmul.f32 %v3318_v23, %v5728_v16  ;;  %vm2430_vm1 = vcmp.eq.f32.partialorder %v5755_v25, inf  ;;  %v5797_v51 = vadd.f32 %v1561_v61, %v1429_v57  ;;  %v6505_v61 = vld [vmem:[#allocation50_spill] sm:$0xff]  ;;  %v6506_v53 = vld [vmem:[#allocation51_spill] sm:$0xff] }
 0x211   : > { %v2422_v12 = vmul.f32 %v3320_v29, %v5734_v9  ;;  %v1430_v58 = vmul.f32 %v6500_v15, %v6500_v15  ;;  %v2792_v33 = vadd.f32 %v2791_v50, %v2743_v11  ;;  %vm2432_vm2 = vcmp.eq.f32.partialorder %v5755_v25, 0.0  ;;  %v6504_v50 = vld [vmem:[#allocation7_spill] sm:$0xff]  ;;  %v6507_v15 = vld [vmem:[#allocation36_spill] sm:$0xff] }
 0x212   : > { %v2417_v54 = vsel %vm2416_vm13, %v5728_v16, %v2415_v62  ;;  %v1562_v34 = vmul.f32 %v5302_v40, %v5302_v40  ;;  %v2433_v46 = vand.u32 2147483648, %v5755_v25  ;;  %3327 = vrsqrt.f32 %v5797_v51  ;;  %v6502_v40 = vld [vmem:[#allocation6_spill] sm:$0xff] }
 0x213   : > { %v2420_v4 = vsel %vm2418_vm14, %v2419_v48, %v2417_v54  ;;  %v2424_v13 = vsel %vm2423_vm15, %v5734_v9, %v2422_v12  ;;  %vm2437_vm3 = vcmp.eq.f32.partialorder %v5778_v28, inf  ;;  %v1431_v16 = vmul.f32 %v6502_v40, %v6502_v40  ;;  %v6508_v40 = vld [vmem:[#allocation37_spill] sm:$0xff] }
 0x214   : > { %v3322_v10 = vpop.eup %3321  ;;  %v2678_v49 = vsub.f32 %v6501_v60, %v2420_v4  ;;  %v2427_v45 = vsel %vm2425_vm0, %v2426_v39, %v2424_v13  ;;  %v5822_v2 = vadd.f32 %v1562_v34, %v1430_v58  ;;  %v1563_v1 = vmul.f32 %v6504_v50, %v6504_v50 }
 0x215   : > { %v2679_v31 = vsub.f32 %v6503_v5, %v2427_v45  ;;  %v2429_v44 = vmul.f32 %v3322_v10, %v5755_v25  ;;  %vm2439_vm4 = vcmp.eq.f32.partialorder %v5778_v28, 0.0  ;;  %v1432_v9 = vmul.f32 %v6505_v61, %v6505_v61 }
 0x216   : > { %v2744_v57 = vmul.f32 %v2678_v49, %v2678_v49  ;;  %v1564_v47 = vmul.f32 %v6506_v53, %v6506_v53  ;;  %v2440_v48 = vand.u32 2147483648, %v5778_v28  ;;  %3329 = vrsqrt.f32 %v5822_v2 }
 0x217   : > { %v2745_v36 = vmul.f32 %v2679_v31, %v2679_v31  ;;  %v2431_v23 = vsel %vm2430_vm1, %v5755_v25, %v2429_v44  ;;  %vm2444_vm5 = vcmp.eq.f32.partialorder %v5780_v63, inf  ;;  %vm2446_vm6 = vcmp.eq.f32.partialorder %v5780_v63, 0.0 }
 0x218   : > { %v3324_v29 = vpop.eup %3323  ;;  %v2824_v11 = vadd.f32 %v2823_v19, %v2744_v57  ;;  %v2434_v62 = vsel %vm2432_vm2, %v2433_v46, %v2431_v23  ;;  %v5842_v34 = vadd.f32 %v1563_v1, %v1431_v16  ;;  %v2447_v13 = vand.u32 2147483648, %v5780_v63  ;;  %v6510_v57 = vld [vmem:[#allocation8_spill] sm:$0xff]  ;;  %v6512_v23 = vld [vmem:[#allocation10_spill] sm:$0xff] }
 0x219   : > { %v3326_v39 = vpop.eup %3325  ;;  %v2793_v12 = vadd.f32 %v2792_v33, %v2745_v36  ;;  %v2680_v58 = vsub.f32 %v6507_v15, %v2434_v62  ;;  %v2436_v54 = vmul.f32 %v3324_v29, %v5778_v28  ;;  %v5846_v19 = vadd.f32 %v1564_v47, %v1432_v9  ;;  %v6511_v9 = vld [vmem:[#allocation9_spill] sm:$0xff]  ;;  %v6513_v15 = vld [vmem:[#allocation39_spill] sm:$0xff] }
 0x21a   : > { %v2443_v4 = vmul.f32 %v3326_v39, %v5780_v63  ;;  %v1433_v25 = vmul.f32 %v5350_v59, %v5350_v59  ;;  %3331 = vrsqrt.f32 %v5842_v34  ;;  %v1565_v10 = vmul.f32 %v5352_v24, %v5352_v24  ;;  %v6509_v24 = vld [vmem:[#allocation38_spill] sm:$0xff] }
 0x21b   : > { %v2746_v46 = vmul.f32 %v2680_v58, %v2680_v58  ;;  %v2438_v33 = vsel %vm2437_vm3, %v5778_v28, %v2436_v54  ;;  %vm2451_vm7 = vcmp.eq.f32.partialorder %v5797_v51, inf  ;;  %vm2453_vm8 = vcmp.eq.f32.partialorder %v5797_v51, 0.0 }
 0x21c   : > { %v2441_v60 = vsel %vm2439_vm4, %v2440_v48, %v2438_v33  ;;  %v2445_v49 = vsel %vm2444_vm5, %v5780_v63, %v2443_v4  ;;  %v3328_v59 = vpop.eup %3327  ;;  %3333 = vrsqrt.f32 %v5846_v19  ;;  %v2454_v44 = vand.u32 2147483648, %v5797_v51  ;;  %v6515_v33 = vld [vmem:[#allocation58_spill] sm:$0xff] }
 0x21d   : > { %v2825_v45 = vadd.f32 %v2824_v11, %v2746_v46  ;;  %v2681_v16 = vsub.f32 %v6508_v40, %v2441_v60  ;;  %v2448_v5 = vsel %vm2446_vm6, %v2447_v13, %v2445_v49  ;;  %v2450_v31 = vmul.f32 %v3328_v59, %v5797_v51  ;;  %v6516_v40 = vld [vmem:[#allocation40_spill] sm:$0xff] }
 0x21e   : > { %v2682_v28 = vsub.f32 %v6509_v24, %v2448_v5  ;;  %vm2458_vm9 = vcmp.eq.f32.partialorder %v5822_v2, inf  ;;  %v5871_v1 = vadd.f32 %v1565_v10, %v1433_v25  ;;  %v1434_v61 = vmul.f32 %v6510_v57, %v6510_v57  ;;  %v6514_v25 = vld [vmem:[#allocation57_spill] sm:$0xff] }
 0x21f   : > { %v2747_v50 = vmul.f32 %v2681_v16, %v2681_v16  ;;  %v1566_v63 = vmul.f32 %v6511_v9, %v6511_v9  ;;  %v2452_v47 = vsel %vm2451_vm7, %v5797_v51, %v2450_v31  ;;  %v1435_v36 = vmul.f32 %v5368_v27, %v5368_v27 }
 0x220   : > { %v2748_v53 = vmul.f32 %v2682_v28, %v2682_v28  ;;  %v1567_v48 = vmul.f32 %v6512_v23, %v6512_v23  ;;  %v3330_v29 = vpop.eup %3329  ;;  %v2455_v62 = vsel %vm2453_vm8, %v2454_v44, %v2452_v47  ;;  %vm2460_vm10 = vcmp.eq.f32.partialorder %v5822_v2, 0.0  ;;  %v6517_v28 = vld [vmem:[#allocation11_spill] sm:$0xff]  ;;  %v6519_v47 = vld [vmem:[#allocation13_spill] sm:$0xff]  ;;  %v6520_v23 = vld [vmem:[#allocation14_spill] sm:$0xff] }
 0x221   : > { %v2794_v11 = vadd.f32 %v2793_v12, %v2747_v50  ;;  %3335 = vrsqrt.f32 %v5871_v1  ;;  %v2683_v58 = vsub.f32 %v6513_v15, %v2455_v62  ;;  %v2457_v54 = vmul.f32 %v3330_v29, %v5822_v2 }
 0x222   : > { %v2826_v39 = vadd.f32 %v2825_v45, %v2748_v53  ;;  %v2461_v4 = vand.u32 2147483648, %v5822_v2  ;;  %vm2465_vm11 = vcmp.eq.f32.partialorder %v5842_v34, inf  ;;  %vm2467_vm12 = vcmp.eq.f32.partialorder %v5842_v34, 0.0 }
 0x223   : > { %v5893_v27 = vadd.f32 %v1566_v63, %v1434_v61  ;;  %v5895_v12 = vadd.f32 %v1567_v48, %v1435_v36  ;;  %v2749_v51 = vmul.f32 %v2683_v58, %v2683_v58  ;;  %v2459_v13 = vsel %vm2458_vm9, %v5822_v2, %v2457_v54  ;;  %v6518_v63 = vld [vmem:[#allocation12_spill] sm:$0xff] }
 0x224   : > { %v1436_v46 = vmul.f32 %v6514_v25, %v6514_v25  ;;  %v1568_v10 = vmul.f32 %v6515_v33, %v6515_v33  ;;  %v3332_v60 = vpop.eup %3331  ;;  %v2462_v49 = vsel %vm2460_vm10, %v2461_v4, %v2459_v13  ;;  %v2468_v59 = vand.u32 2147483648, %v5842_v34 }
 0x225   : > { %vm2472_vm13 = vcmp.eq.f32.partialorder %v5846_v19, inf  ;;  %3337 = vrsqrt.f32 %v5893_v27  ;;  %v2795_v45 = vadd.f32 %v2794_v11, %v2749_v51  ;;  %v2684_v16 = vsub.f32 %v6516_v40, %v2462_v49  ;;  %v6521_v11 = vld [vmem:[#allocation41_spill] sm:$0xff] }
 0x226   : > { %v2464_v5 = vmul.f32 %v3332_v60, %v5842_v34  ;;  %vm2474_vm14 = vcmp.eq.f32.partialorder %v5846_v19, 0.0  ;;  %v3334_v2 = vpop.eup %3333  ;;  %v2475_v24 = vand.u32 2147483648, %v5846_v19  ;;  %vm2479_vm15 = vcmp.eq.f32.partialorder %v5871_v1, inf }
 0x227   : > { %3339 = vrsqrt.f32 %v5895_v12  ;;  %v1437_v31 = vmul.f32 %v6517_v28, %v6517_v28  ;;  %v2750_v44 = vmul.f32 %v2684_v16, %v2684_v16  ;;  %v2471_v57 = vmul.f32 %v3334_v2, %v5846_v19 }
 0x228   : > { %v2466_v50 = vsel %vm2465_vm11, %v5842_v34, %v2464_v5  ;;  %v5919_v61 = vadd.f32 %v1568_v10, %v1436_v46  ;;  %v1569_v53 = vmul.f32 %v6518_v63, %v6518_v63  ;;  %v1438_v36 = vmul.f32 %v6519_v47, %v6519_v47 }
 0x229   : > { %v2469_v9 = vsel %vm2467_vm12, %v2468_v59, %v2466_v50  ;;  %v1570_v48 = vmul.f32 %v6520_v23, %v6520_v23  ;;  %v2827_v29 = vadd.f32 %v2826_v39, %v2750_v44  ;;  %v2473_v15 = vsel %vm2472_vm13, %v5846_v19, %v2471_v57  ;;  %v6522_v39 = vld [vmem:[#allocation42_spill] sm:$0xff]  ;;  %v6524_v57 = vld [vmem:[#allocation64_spill] sm:$0xff] }
 0x22a   : > { %v2685_v62 = vsub.f32 %v6521_v11, %v2469_v9  ;;  %3341 = vrsqrt.f32 %v5919_v61  ;;  %v2476_v58 = vsel %vm2474_vm14, %v2475_v24, %v2473_v15  ;;  %vm2481_vm0 = vcmp.eq.f32.partialorder %v5871_v1, 0.0 }
 0x22b   : > { %v3336_v34 = vpop.eup %3335  ;;  %v2482_v54 = vand.u32 2147483648, %v5871_v1  ;;  %vm2486_vm1 = vcmp.eq.f32.partialorder %v5893_v27, inf  ;;  %v2686_v51 = vsub.f32 %v6522_v39, %v2476_v58  ;;  %v5941_v25 = vadd.f32 %v1569_v53, %v1437_v31 }
 0x22c   : > { %v2751_v4 = vmul.f32 %v2685_v62, %v2685_v62  ;;  %v2478_v13 = vmul.f32 %v3336_v34, %v5871_v1  ;;  %vm2488_vm2 = vcmp.eq.f32.partialorder %v5893_v27, 0.0  ;;  %v5944_v46 = vadd.f32 %v1570_v48, %v1438_v36  ;;  %v6525_v36 = vld [vmem:[#allocation44_spill] sm:$0xff]  ;;  %v6526_v34 = vld [vmem:[#allocation45_spill] sm:$0xff] }
 0x22d   : > { %v1439_v19 = vmul.f32 %v5427_v56, %v5427_v56  ;;  %v1571_v33 = vmul.f32 %v5429_v3, %v5429_v3  ;;  %v2752_v60 = vmul.f32 %v2686_v51, %v2686_v51  ;;  %3343 = vrsqrt.f32 %v5941_v25  ;;  %v6523_v3 = vld [vmem:[#allocation43_spill] sm:$0xff] }
 0x22e   : > { %v2796_v10 = vadd.f32 %v2795_v45, %v2751_v4  ;;  %v2480_v49 = vsel %vm2479_vm15, %v5871_v1, %v2478_v13  ;;  %v2489_v16 = vand.u32 2147483648, %v5893_v27  ;;  %vm2493_vm3 = vcmp.eq.f32.partialorder %v5895_v12, inf }
 0x22f   : > { %v3338_v59 = vpop.eup %3337  ;;  %v2483_v40 = vsel %vm2481_vm0, %v2482_v54, %v2480_v49  ;;  %vm2495_vm4 = vcmp.eq.f32.partialorder %v5895_v12, 0.0  ;;  %v2828_v56 = vadd.f32 %v2827_v29, %v2752_v60  ;;  %3345 = vrsqrt.f32 %v5944_v46 }
 0x230   : > { %v2687_v45 = vsub.f32 %v6523_v3, %v2483_v40  ;;  %v2485_v5 = vmul.f32 %v3338_v59, %v5893_v27  ;;  %v2496_v24 = vand.u32 2147483648, %v5895_v12  ;;  %vm2500_vm5 = vcmp.eq.f32.partialorder %v5919_v61, inf }
 0x231   : > { %v3340_v2 = vpop.eup %3339  ;;  %v5964_v1 = vadd.f32 %v1571_v33, %v1439_v19  ;;  %v1440_v28 = vmul.f32 %v5434_v37, %v5434_v37  ;;  %v1572_v9 = vmul.f32 %v6524_v57, %v6524_v57  ;;  %vm2502_vm6 = vcmp.eq.f32.partialorder %v5919_v61, 0.0 }
 0x232   : > { %v2753_v31 = vmul.f32 %v2687_v45, %v2687_v45  ;;  %v2487_v44 = vsel %vm2486_vm1, %v5893_v27, %v2485_v5  ;;  %v2492_v50 = vmul.f32 %v3340_v2, %v5895_v12  ;;  %v2503_v53 = vand.u32 2147483648, %v5919_v61 }
 0x233   : > { %v2490_v63 = vsel %vm2488_vm2, %v2489_v16, %v2487_v44  ;;  %3347 = vrsqrt.f32 %v5964_v1  ;;  %vm2507_vm7 = vcmp.eq.f32.partialorder %v5941_v25, inf  ;;  %v5987_v11 = vadd.f32 %v1572_v9, %v1440_v28  ;;  %v6528_v16 = vld [vmem:[#allocation65_spill] sm:$0xff]  ;;  %v6529_v28 = vld [vmem:[#allocation47_spill] sm:$0xff] }
 0x234   : > { %v3342_v37 = vpop.eup %3341  ;;  %v2797_v47 = vadd.f32 %v2796_v10, %v2753_v31  ;;  %v2688_v23 = vsub.f32 %v6525_v36, %v2490_v63  ;;  %v2494_v48 = vsel %vm2493_vm3, %v5895_v12, %v2492_v50  ;;  %v1441_v62 = vmul.f32 %v5464_v14, %v5464_v14  ;;  %v6530_v63 = vld [vmem:[#allocation66_spill] sm:$0xff] }
 0x235   : > { %v2497_v27 = vsel %vm2495_vm4, %v2496_v24, %v2494_v48  ;;  %v2499_v29 = vmul.f32 %v3342_v37, %v5919_v61  ;;  %vm2509_vm8 = vcmp.eq.f32.partialorder %v5941_v25, 0.0  ;;  %v1573_v54 = vmul.f32 %v5471_v0, %v5471_v0  ;;  %v6527_v0 = vld [vmem:[#allocation46_spill] sm:$0xff]  ;;  %v6532_v48 = vld [vmem:[#allocation49_spill] sm:$0xff] }
 0x236   : > { %v2754_v15 = vmul.f32 %v2688_v23, %v2688_v23  ;;  %v2689_v58 = vsub.f32 %v6526_v34, %v2497_v27  ;;  %v2510_v4 = vand.u32 2147483648, %v5941_v25  ;;  %vm2514_vm9 = vcmp.eq.f32.partialorder %v5944_v46, inf  ;;  %v6533_v27 = vld [vmem:[#allocation74_spill] sm:$0xff] }
 0x237   : > { %v2501_v12 = vsel %vm2500_vm5, %v5919_v61, %v2499_v29  ;;  %3349 = vrsqrt.f32 %v5987_v11  ;;  %v3344_v39 = vpop.eup %3343  ;;  %v1442_v19 = vmul.f32 %v5473_v8, %v5473_v8  ;;  %v6007_v60 = vadd.f32 %v1573_v54, %v1441_v62  ;;  %v6534_v54 = vld [vmem:[#allocation52_spill] sm:$0xff] }
 0x238   : > { %v2829_v14 = vadd.f32 %v2828_v56, %v2754_v15  ;;  %v2755_v51 = vmul.f32 %v2689_v58, %v2689_v58  ;;  %v2504_v13 = vsel %vm2502_vm6, %v2503_v53, %v2501_v12  ;;  %v2506_v10 = vmul.f32 %v3344_v39, %v5941_v25 }
 0x239   : > { %v2690_v33 = vsub.f32 %v6527_v0, %v2504_v13  ;;  %v1574_v49 = vmul.f32 %v5480_v30, %v5480_v30  ;;  %v3346_v59 = vpop.eup %3345  ;;  %vm2516_vm10 = vcmp.eq.f32.partialorder %v5944_v46, 0.0  ;;  %v1443_v61 = vmul.f32 %v5482_v21, %v5482_v21 }
 0x23a   : > { %v2798_v40 = vadd.f32 %v2797_v47, %v2755_v51  ;;  %v1575_v56 = vmul.f32 %v6528_v16, %v6528_v16  ;;  %v2508_v3 = vsel %vm2507_vm7, %v5941_v25, %v2506_v10  ;;  %v2513_v45 = vmul.f32 %v3346_v59, %v5944_v46  ;;  %v6531_v47 = vld [vmem:[#allocation48_spill] sm:$0xff]  ;;  %v6535_v59 = vld [vmem:[#allocation53_spill] sm:$0xff] }
 0x23b   : > { %v2756_v8 = vmul.f32 %v2690_v33, %v2690_v33  ;;  %3351 = vrsqrt.f32 %v6007_v60  ;;  %v2511_v30 = vsel %vm2509_vm8, %v2510_v4, %v2508_v3  ;;  %v2517_v5 = vand.u32 2147483648, %v5944_v46 }
 0x23c   : > { %vm2521_vm11 = vcmp.eq.f32.partialorder %v5964_v1, inf  ;;  %v2524_v21 = vand.u32 2147483648, %v5964_v1  ;;  %v2691_v31 = vsub.f32 %v6529_v28, %v2511_v30  ;;  %v2515_v44 = vsel %vm2514_vm9, %v5944_v46, %v2513_v45 }
 0x23d   : > { %v3348_v2 = vpop.eup %3347  ;;  %v2830_v24 = vadd.f32 %v2829_v14, %v2756_v8  ;;  %v6030_v50 = vadd.f32 %v1574_v49, %v1442_v19  ;;  %v2518_v25 = vsel %vm2516_vm10, %v2517_v5, %v2515_v44  ;;  %v6035_v9 = vadd.f32 %v1575_v56, %v1443_v61  ;;  %v6536_v56 = vld [vmem:[#allocation15_spill] sm:$0xff]  ;;  %v6537_v5 = vld [vmem:[#allocation16_spill] sm:$0xff] }
 0x23e   : > { %v2520_v57 = vmul.f32 %v3348_v2, %v5964_v1  ;;  %v1444_v53 = vmul.f32 %v6530_v63, %v6530_v63  ;;  %v2757_v37 = vmul.f32 %v2691_v31, %v2691_v31  ;;  %v2692_v36 = vsub.f32 %v6531_v47, %v2518_v25  ;;  %v6538_v31 = vld [vmem:[#allocation59_spill] sm:$0xff] }
 0x23f   : > { %3353 = vrsqrt.f32 %v6030_v50  ;;  %v1576_v23 = vmul.f32 %v5502_v55, %v5502_v55  ;;  %v6045_v29 = vmul.f32 %v6533_v27, %v6532_v48  ;;  %vm2523_vm12 = vcmp.eq.f32.partialorder %v5964_v1, 0.0  ;;  %v6539_v27 = vld [vmem:[#allocation60_spill] sm:$0xff] }
 0x240   : > { %v2522_v46 = vsel %vm2521_vm11, %v5964_v1, %v2520_v57  ;;  %3355 = vrsqrt.f32 %v6035_v9  ;;  %v2799_v15 = vadd.f32 %v2798_v40, %v2757_v37  ;;  %v2758_v34 = vmul.f32 %v2692_v36, %v2692_v36 }
 0x241   : > { %v3350_v62 = vpop.eup %3349  ;;  %v2525_v58 = vsel %vm2523_vm12, %v2524_v21, %v2522_v46  ;;  %vm2528_vm13 = vcmp.eq.f32.partialorder %v5987_v11, inf  ;;  %vm2530_vm14 = vcmp.eq.f32.partialorder %v5987_v11, 0.0  ;;  %v2531_v4 = vand.u32 2147483648, %v5987_v11 }
 0x242   : > { %v2693_v55 = vsub.f32 %v6534_v54, %v2525_v58  ;;  %v2527_v12 = vmul.f32 %v3350_v62, %v5987_v11  ;;  %v2831_v39 = vadd.f32 %v2830_v24, %v2758_v34  ;;  %v6057_v14 = vadd.f32 %v1576_v23, %v1444_v53  ;;  %v6540_v34 = vld [vmem:[#allocation61_spill] sm:$0xff] }
 0x243   : > { %v1445_v1 = vmul.f32 %v5523_v6, %v5523_v6  ;;  %v1577_v51 = vmul.f32 %v5528_v20, %v5528_v20  ;;  %v1446_v0 = vmul.f32 %v5530_v38, %v5530_v38  ;;  %v1578_v33 = vmul.f32 %v5536_v26, %v5536_v26 }
 0x244   : > { %v2759_v13 = vmul.f32 %v2693_v55, %v2693_v55  ;;  %v2529_v19 = vsel %vm2528_vm13, %v5987_v11, %v2527_v12  ;;  %vm2535_vm15 = vcmp.eq.f32.partialorder %v6007_v60, inf  ;;  %vm2537_vm0 = vcmp.eq.f32.partialorder %v6007_v60, 0.0 }
 0x245   : > { %v3352_v10 = vpop.eup %3351  ;;  %v2532_v49 = vsel %vm2530_vm14, %v2531_v4, %v2529_v19  ;;  %3357 = vrsqrt.f32 %v6057_v14  ;;  %v2538_v11 = vand.u32 2147483648, %v6007_v60  ;;  %vm2542_vm1 = vcmp.eq.f32.partialorder %v6030_v50, inf }
 0x246   : > { %v2800_v6 = vadd.f32 %v2799_v15, %v2759_v13  ;;  %v2694_v20 = vsub.f32 %v6535_v59, %v2532_v49  ;;  %v2534_v40 = vmul.f32 %v3352_v10, %v6007_v60  ;;  %vm2544_vm2 = vcmp.eq.f32.partialorder %v6030_v50, 0.0  ;;  %v6541_v13 = vld [vmem:[#allocation17_spill] sm:$0xff]  ;;  %v6543_v59 = vld [vmem:[#allocation62_spill] sm:$0xff] }
 0x247   : > { %v6076_v38 = vadd.f32 %v1577_v51, %v1445_v1  ;;  %v6078_v26 = vadd.f32 %v1578_v33, %v1446_v0  ;;  %v1447_v8 = vmul.f32 %v6536_v56, %v6536_v56  ;;  %v1579_v3 = vmul.f32 %v5545_v43, %v5545_v43 }
 0x248   : > { %v2760_v61 = vmul.f32 %v2694_v20, %v2694_v20  ;;  %v2536_v16 = vsel %vm2535_vm15, %v6007_v60, %v2534_v40  ;;  %v1448_v21 = vmul.f32 %v6537_v5, %v6537_v5  ;;  %v1580_v2 = vmul.f32 %v5553_v32, %v5553_v32 }
 0x249   : > { %v3354_v45 = vpop.eup %3353  ;;  %v2539_v30 = vsel %vm2537_vm0, %v2538_v11, %v2536_v16  ;;  %3359 = vrsqrt.f32 %v6076_v38  ;;  %v2545_v25 = vand.u32 2147483648, %v6030_v50  ;;  %vm2549_vm3 = vcmp.eq.f32.partialorder %v6035_v9, inf }
 0x24a   : > { %v3356_v24 = vpop.eup %3355  ;;  %v2832_v28 = vadd.f32 %v2831_v39, %v2760_v61  ;;  %v2695_v60 = vsub.f32 %v6538_v31, %v2539_v30  ;;  %v2541_v44 = vmul.f32 %v3354_v45, %v6030_v50  ;;  %vm2551_vm4 = vcmp.eq.f32.partialorder %v6035_v9, 0.0 }
 0x24b   : > { %v2548_v43 = vmul.f32 %v3356_v24, %v6035_v9  ;;  %3361 = vrsqrt.f32 %v6078_v26  ;;  %v2552_v63 = vand.u32 2147483648, %v6035_v9  ;;  %v6101_v53 = vadd.f32 %v1579_v3, %v1447_v8 }
 0x24c   : > { %v2761_v57 = vmul.f32 %v2695_v60, %v2695_v60  ;;  %v2543_v32 = vsel %vm2542_vm1, %v6030_v50, %v2541_v44  ;;  %vm2556_vm5 = vcmp.eq.f32.partialorder %v6057_v14, inf  ;;  %v6107_v36 = vadd.f32 %v1580_v2, %v1448_v21  ;;  %v6545_v2 = vld [vmem:[#allocation67_spill] sm:$0xff]  ;;  %v6546_v44 = vld [vmem:[#allocation20_spill] sm:$0xff] }
 0x24d   : > { %v2546_v37 = vsel %vm2544_vm2, %v2545_v25, %v2543_v32  ;;  %v2550_v47 = vsel %vm2549_vm3, %v6035_v9, %v2548_v43  ;;  %3363 = vrsqrt.f32 %v6101_v53  ;;  %vm2558_vm6 = vcmp.eq.f32.partialorder %v6057_v14, 0.0  ;;  %v6547_v43 = vld [vmem:[#allocation21_spill] sm:$0xff] }
 0x24e   : > { %v2801_v23 = vadd.f32 %v2800_v6, %v2761_v57  ;;  %v2696_v46 = vsub.f32 %v6539_v27, %v2546_v37  ;;  %v2553_v62 = vsel %vm2551_vm4, %v2552_v63, %v2550_v47  ;;  %v2559_v50 = vand.u32 2147483648, %v6057_v14  ;;  %v6542_v6 = vld [vmem:[#allocation18_spill] sm:$0xff]  ;;  %v6548_v37 = vld [vmem:[#allocation68_spill] sm:$0xff] }
 0x24f   : > { %v3358_v15 = vpop.eup %3357  ;;  %v2697_v58 = vsub.f32 %v6540_v34, %v2553_v62  ;;  %v1449_v9 = vmul.f32 %v5576_v22, %v5576_v22  ;;  %vm2563_vm7 = vcmp.eq.f32.partialorder %v6076_v38, inf  ;;  %3365 = vrsqrt.f32 %v6107_v36 }
 0x250   : > { %v2762_v54 = vmul.f32 %v2696_v46, %v2696_v46  ;;  %v2555_v55 = vmul.f32 %v3358_v15, %v6057_v14  ;;  %vm2565_vm8 = vcmp.eq.f32.partialorder %v6076_v38, 0.0  ;;  %v2566_v4 = vand.u32 2147483648, %v6076_v38 }
 0x251   : > { %v2763_v12 = vmul.f32 %v2697_v58, %v2697_v58  ;;  %v1581_v39 = vmul.f32 %v5581_v7, %v5581_v7  ;;  %v1450_v51 = vmul.f32 %v5583_v35, %v5583_v35  ;;  %v1582_v19 = vmul.f32 %v6541_v13, %v6541_v13  ;;  %v6544_v35 = vld [vmem:[#allocation19_spill] sm:$0xff]  ;;  %v6549_v58 = vld [vmem:[#allocation69_spill] sm:$0xff] }
 0x252   : > { %v2833_v1 = vadd.f32 %v2832_v28, %v2762_v54  ;;  %v2557_v22 = vsel %vm2556_vm5, %v6057_v14, %v2555_v55  ;;  %v1451_v7 = vmul.f32 %v6542_v6, %v6542_v6  ;;  %v1583_v61 = vmul.f32 %v6544_v35, %v6544_v35  ;;  %v6552_v35 = vld [vmem:[#allocation23_spill] sm:$0xff] }
 0x253   : > { %v3360_v0 = vpop.eup %3359  ;;  %v2802_v33 = vadd.f32 %v2801_v23, %v2763_v12  ;;  %v2560_v10 = vsel %vm2558_vm6, %v2559_v50, %v2557_v22  ;;  %v6132_v49 = vadd.f32 %v1581_v39, %v1449_v9  ;;  %v6138_v11 = vadd.f32 %v1582_v19, %v1450_v51  ;;  %v6551_v19 = vld [vmem:[#allocation22_spill] sm:$0xff] }
 0x254   : > { %v2698_v20 = vsub.f32 %v6543_v59, %v2560_v10  ;;  %v2562_v40 = vmul.f32 %v3360_v0, %v6076_v38  ;;  %vm2570_vm9 = vcmp.eq.f32.partialorder %v6078_v26, inf  ;;  %vm2572_vm10 = vcmp.eq.f32.partialorder %v6078_v26, 0.0 }
 0x255   : > { %v3362_v16 = vpop.eup %3361  ;;  %v2573_v14 = vand.u32 2147483648, %v6078_v26  ;;  %3367 = vrsqrt.f32 %v6132_v49  ;;  %vm2577_vm11 = vcmp.eq.f32.partialorder %v6101_v53, inf  ;;  %vm2579_vm12 = vcmp.eq.f32.partialorder %v6101_v53, 0.0 }
 0x256   : > { %v2764_v56 = vmul.f32 %v2698_v20, %v2698_v20  ;;  %v2564_v8 = vsel %vm2563_vm7, %v6076_v38, %v2562_v40  ;;  %v2569_v3 = vmul.f32 %v3362_v16, %v6078_v26  ;;  %3369 = vrsqrt.f32 %v6138_v11 }
 0x257   : > { %v2567_v45 = vsel %vm2565_vm8, %v2566_v4, %v2564_v8  ;;  %v2580_v30 = vand.u32 2147483648, %v6101_v53  ;;  %v3364_v5 = vpop.eup %3363  ;;  %v6158_v31 = vadd.f32 %v1583_v61, %v1451_v7  ;;  %v1452_v25 = vmul.f32 %v6546_v44, %v6546_v44  ;;  %v6554_v8 = vld [vmem:[#allocation71_spill] sm:$0xff] }
 0x258   : > { %v2834_v21 = vadd.f32 %v2833_v1, %v2764_v56  ;;  %v2699_v24 = vsub.f32 %v6545_v2, %v2567_v45  ;;  %v2571_v28 = vsel %vm2570_vm9, %v6078_v26, %v2569_v3  ;;  %v2576_v38 = vmul.f32 %v3364_v5, %v6101_v53  ;;  %v6550_v1 = vld [vmem:[#allocation70_spill] sm:$0xff] }
 0x259   : > { %v2574_v60 = vsel %vm2572_vm10, %v2573_v14, %v2571_v28  ;;  %v1584_v57 = vmul.f32 %v6547_v43, %v6547_v43  ;;  %v3366_v32 = vpop.eup %3365  ;;  %vm2584_vm13 = vcmp.eq.f32.partialorder %v6107_v36, inf  ;;  %3371 = vrsqrt.f32 %v6158_v31  ;;  %v6553_v56 = vld [vmem:[#allocation54_spill] sm:$0xff]  ;;  %v6557_v43 = vld [vmem:[#allocation75_spill] sm:$0xff] }
 0x25a   : > { %v2765_v63 = vmul.f32 %v2699_v24, %v2699_v24  ;;  %v2700_v47 = vsub.f32 %v6548_v37, %v2574_v60  ;;  %vm2150_vm14 = vcmp.eq.f32.partialorder %v6532_v48, inf  ;;  %v2578_v26 = vsel %vm2577_vm11, %v6101_v53, %v2576_v38 }
 0x25b   : > { %v2583_v23 = vmul.f32 %v3366_v32, %v6107_v36  ;;  %vm2586_vm15 = vcmp.eq.f32.partialorder %v6107_v36, 0.0  ;;  %v2587_v27 = vand.u32 2147483648, %v6107_v36  ;;  %v2581_v15 = vsel %vm2579_vm12, %v2580_v30, %v2578_v26 }
 0x25c   : > { %v2803_v46 = vadd.f32 %v2802_v33, %v2765_v63  ;;  %v2766_v62 = vmul.f32 %v2700_v47, %v2700_v47  ;;  %v6179_v34 = vadd.f32 %v1584_v57, %v1452_v25  ;;  %v2701_v50 = vsub.f32 %v6549_v58, %v2581_v15  ;;  %v6558_v47 = vld [vmem:[#allocation73_spill] sm:$0xff] }
 0x25d   : > { %v2585_v9 = vsel %vm2584_vm13, %v6107_v36, %v2583_v23  ;;  %v1453_v54 = vmul.f32 %v5634_v18, %v5634_v18  ;;  %v1585_v55 = vmul.f32 %v5640_v17, %v5640_v17  ;;  %vm2591_vm0 = vcmp.eq.f32.partialorder %v6132_v49, inf }
 0x25e   : > { %v2835_v12 = vadd.f32 %v2834_v21, %v2766_v62  ;;  %v2588_v4 = vsel %vm2586_vm15, %v2587_v27, %v2585_v9  ;;  %3373 = vrsqrt.f32 %v6179_v34  ;;  %v2767_v39 = vmul.f32 %v2701_v50, %v2701_v50  ;;  %v6560_v9 = vld [vmem:[#allocation55_spill] sm:$0xff] }
 0x25f   : > { %v3368_v53 = vpop.eup %3367  ;;  %v2702_v22 = vsub.f32 %v6550_v1, %v2588_v4  ;;  %vm2593_vm1 = vcmp.eq.f32.partialorder %v6132_v49, 0.0  ;;  %v2594_v36 = vand.u32 2147483648, %v6132_v49  ;;  %v6193_v13 = vadd.f32 %v1585_v55, %v1453_v54  ;;  %v6561_v54 = vld [vmem:[#allocation76_spill] sm:$0xff] }
 0x260   : > { %v3370_v51 = vpop.eup %3369  ;;  %v2590_v18 = vmul.f32 %v3368_v53, %v6132_v49  ;;  %v1454_v17 = vmul.f32 %v5642_v41, %v5642_v41  ;;  %v1586_v0 = vmul.f32 %v6551_v19, %v6551_v19  ;;  %v2804_v33 = vadd.f32 %v2803_v46, %v2767_v39  ;;  %v6562_v1 = vld [vmem:[#allocation56_spill] sm:$0xff] }
 0x261   : > { %v2768_v10 = vmul.f32 %v2702_v22, %v2702_v22  ;;  %v2597_v6 = vmul.f32 %v3370_v51, %v6138_v11  ;;  %vm2598_vm2 = vcmp.eq.f32.partialorder %v6138_v11, inf  ;;  %vm2600_vm3 = vcmp.eq.f32.partialorder %v6138_v11, 0.0  ;;  %v6563_v22 = vld [vmem:[#allocation77_spill] sm:$0xff] }
 0x262   : > { %v2592_v7 = vsel %vm2591_vm0, %v6132_v49, %v2590_v18  ;;  %v2601_v59 = vand.u32 2147483648, %v6138_v11  ;;  %3375 = vrsqrt.f32 %v6193_v13  ;;  %vm2152_vm4 = vcmp.eq.f32.partialorder %v6532_v48, 0.0  ;;  %v6555_v49 = vld [vmem:[#allocation72_spill] sm:$0xff] }
 0x263   : > { %v2836_v41 = vadd.f32 %v2835_v12, %v2768_v10  ;;  %v2595_v20 = vsel %vm2593_vm1, %v2594_v36, %v2592_v7  ;;  %v2599_v40 = vsel %vm2598_vm2, %v6138_v11, %v2597_v6  ;;  %v1455_v61 = vmul.f32 %v6552_v35, %v6552_v35  ;;  %v3372_v16 = vpop.eup %3371  ;;  %v6565_v35 = vld [vmem:[#allocation2_spill] sm:$0xff] }
 0x264   : > { %v2151_v14 = vsel %vm2150_vm14, %v6532_v48, %v6045_v29  ;;  %vm2157_vm5 = vcmp.eq.f32.partialorder %v6553_v56, inf  ;;  %v2703_v3 = vsub.f32 %v6554_v8, %v2595_v20  ;;  %v2602_v45 = vsel %vm2600_vm3, %v2601_v59, %v2599_v40  ;;  %v6556_v29 = vld [vmem:[#allocation24_spill] sm:$0xff]  ;;  %v6564_v40 = vld [vmem:[#allocation63_spill] sm:$0xff] }
 0x265   : > { %v6219_v30 = vadd.f32 %v1586_v0, %v1454_v17  ;;  %v2704_v5 = vsub.f32 %v6555_v49, %v2602_v45  ;;  %v2604_v11 = vmul.f32 %v3372_v16, %v6158_v31  ;;  %vm2605_vm6 = vcmp.eq.f32.partialorder %v6158_v31, inf }
 0x266   : > { %v1587_v21 = vmul.f32 %v5658_v52, %v5658_v52  ;;  %v2769_v2 = vmul.f32 %v2703_v3, %v2703_v3  ;;  %v2608_v24 = vand.u32 2147483648, %v6158_v31  ;;  %v1456_v28 = vmul.f32 %v6556_v29, %v6556_v29 }
 0x267   : > { %3377 = vrsqrt.f32 %v6219_v30  ;;  %v2770_v60 = vmul.f32 %v2704_v5, %v2704_v5  ;;  %v2606_v38 = vsel %vm2605_vm6, %v6158_v31, %v2604_v11  ;;  %vm2607_vm7 = vcmp.eq.f32.partialorder %v6158_v31, 0.0 }
 0x268   : > { %v6232_v44 = vadd.f32 %v1587_v21, %v1455_v61  ;;  %v3374_v25 = vpop.eup %3373  ;;  %v2156_v57 = vmul.f32 %v6557_v43, %v6553_v56  ;;  %v2805_v52 = vadd.f32 %v2804_v33, %v2769_v2  ;;  %v2609_v32 = vsel %vm2607_vm7, %v2608_v24, %v2606_v38 }
 0x269   : > { %v1588_v63 = vmul.f32 %v5667_v42, %v5667_v42  ;;  %v2837_v37 = vadd.f32 %v2836_v41, %v2770_v60  ;;  %v2705_v26 = vsub.f32 %v6558_v47, %v2609_v32  ;;  %v2611_v23 = vmul.f32 %v3374_v25, %v6179_v34 }
 0x26a   : > { %3379 = vrsqrt.f32 %v6232_v44  ;;  %vm2159_vm8 = vcmp.eq.f32.partialorder %v6553_v56, 0.0  ;;  %vm2612_vm9 = vcmp.eq.f32.partialorder %v6179_v34, inf  ;;  %v2615_v31 = vand.u32 2147483648, %v6179_v34 }
 0x26b   : > { %v6244_v27 = vadd.f32 %v1588_v63, %v1456_v28  ;;  %v2160_v46 = vand.u32 2147483648, %v6553_v56  ;;  %v2771_v62 = vmul.f32 %v2705_v26, %v2705_v26  ;;  %v2613_v42 = vsel %vm2612_vm9, %v6179_v34, %v2611_v23 }
 0x26c   : > { %vm2614_vm10 = vcmp.eq.f32.partialorder %v6179_v34, 0.0  ;;  %v3376_v15 = vpop.eup %3375  ;;  %v6559_v58 = vand.u32 2147483648, %v6532_v48  ;;  %v2163_v55 = vmul.f32 %v6561_v54, %v6560_v9  ;;  %v2158_v4 = vsel %vm2157_vm5, %v6553_v56, %v2156_v57 }
 0x26d   : > { %v2616_v12 = vsel %vm2614_vm10, %v2615_v31, %v2613_v42  ;;  %3381 = vrsqrt.f32 %v6244_v27  ;;  %v2806_v53 = vadd.f32 %v2805_v52, %v2771_v62  ;;  %v2618_v34 = vmul.f32 %v3376_v15, %v6193_v13 }
 0x26e   : > { %v2154_v50 = vsel %vm2152_vm4, %v6559_v58, %v2151_v14  ;;  %vm2164_vm11 = vcmp.eq.f32.partialorder %v6560_v9, inf  ;;  %v2170_v48 = vmul.f32 %v6563_v22, %v6562_v1  ;;  %vm2619_vm12 = vcmp.eq.f32.partialorder %v6193_v13, inf }
 0x26f   : > { %v2706_v39 = vsub.f32 %v2154_v50, %v2616_v12  ;;  %v2622_v36 = vand.u32 2147483648, %v6193_v13  ;;  %vm2166_vm13 = vcmp.eq.f32.partialorder %v6560_v9, 0.0  ;;  %v2620_v18 = vsel %vm2619_vm12, %v6193_v13, %v2618_v34 }
 0x270   : > { %vm2621_vm14 = vcmp.eq.f32.partialorder %v6193_v13, 0.0  ;;  %v2161_v19 = vsel %vm2159_vm8, %v2160_v46, %v2158_v4  ;;  %v2167_v0 = vand.u32 2147483648, %v6560_v9  ;;  %vm2171_vm15 = vcmp.eq.f32.partialorder %v6562_v1, inf }
 0x271   : > { %v2772_v51 = vmul.f32 %v2706_v39, %v2706_v39  ;;  %v3378_v17 = vpop.eup %3377  ;;  %v2623_v33 = vsel %vm2621_vm14, %v2622_v36, %v2620_v18  ;;  %v2165_v10 = vsel %vm2164_vm11, %v6560_v9, %v2163_v55  ;;  %v2172_v41 = vsel %vm2171_vm15, %v6562_v1, %v2170_v48 }
 0x272   : > { %v2707_v7 = vsub.f32 %v2161_v19, %v2623_v33  ;;  %v2625_v59 = vmul.f32 %v3378_v17, %v6219_v30  ;;  %vm2173_vm0 = vcmp.eq.f32.partialorder %v6562_v1, 0.0  ;;  %vm2626_vm1 = vcmp.eq.f32.partialorder %v6219_v30, inf }
 0x273   : > { %v2838_v6 = vadd.f32 %v2837_v37, %v2772_v51  ;;  %v2629_v13 = vand.u32 2147483648, %v6219_v30  ;;  %v2177_v61 = vmul.f32 %v6565_v35, %v6564_v40  ;;  %vm2628_vm2 = vcmp.eq.f32.partialorder %v6219_v30, 0.0 }
 0x274   : > { %v3380_v20 = vpop.eup %3379  ;;  %v2773_v16 = vmul.f32 %v2707_v7, %v2707_v7  ;;  %v2627_v14 = vsel %vm2626_vm1, %v6219_v30, %v2625_v59  ;;  %v2168_v56 = vsel %vm2166_vm13, %v2167_v0, %v2165_v10  ;;  %v2174_v8 = vand.u32 2147483648, %v6562_v1 }
 0x275   : > { %v2630_v3 = vsel %vm2628_vm2, %v2629_v13, %v2627_v14  ;;  %v2632_v45 = vmul.f32 %v3380_v20, %v6232_v44  ;;  %vm2633_vm3 = vcmp.eq.f32.partialorder %v6232_v44, inf  ;;  %v2636_v11 = vand.u32 2147483648, %v6232_v44 }
 0x276   : > { %v2807_v49 = vadd.f32 %v2806_v53, %v2773_v16  ;;  %v2708_v5 = vsub.f32 %v2168_v56, %v2630_v3  ;;  %v2175_v2 = vsel %vm2173_vm0, %v2174_v8, %v2172_v41  ;;  %vm2178_vm4 = vcmp.eq.f32.partialorder %v6564_v40, inf }
 0x277   : > { %v3382_v21 = vpop.eup %3381  ;;  %v2634_v30 = vsel %vm2633_vm3, %v6232_v44, %v2632_v45  ;;  %vm2635_vm5 = vcmp.eq.f32.partialorder %v6232_v44, 0.0  ;;  %v2179_v24 = vsel %vm2178_vm4, %v6564_v40, %v2177_v61  ;;  %v2181_v38 = vand.u32 2147483648, %v6564_v40 }
 0x278   : > { %v2774_v29 = vmul.f32 %v2708_v5, %v2708_v5  ;;  %v2637_v28 = vsel %vm2635_vm5, %v2636_v11, %v2634_v30  ;;  %v2639_v60 = vmul.f32 %v3382_v21, %v6244_v27  ;;  %vm2640_vm6 = vcmp.eq.f32.partialorder %v6244_v27, inf }
 0x279   : > { %v2709_v25 = vsub.f32 %v2175_v2, %v2637_v28  ;;  %v2643_v43 = vand.u32 2147483648, %v6244_v27  ;;  %vm2180_vm7 = vcmp.eq.f32.partialorder %v6564_v40, 0.0  ;;  %vm2642_vm8 = vcmp.eq.f32.partialorder %v6244_v27, 0.0 }
 0x27a   : > { %v2839_v57 = vadd.f32 %v2838_v6, %v2774_v29  ;;  %v2641_v52 = vsel %vm2640_vm6, %v6244_v27, %v2639_v60  ;;  %v2182_v44 = vsel %vm2180_vm7, %v2181_v38, %v2179_v24 }
 0x27b   : > { %v2775_v32 = vmul.f32 %v2709_v25, %v2709_v25  ;;  %v2644_v63 = vsel %vm2642_vm8, %v2643_v43, %v2641_v52 }
 0x27c   : > { %v2710_v37 = vsub.f32 %v2182_v44, %v2644_v63 }
 0x27d   : > { %v2808_v47 = vadd.f32 %v2807_v49, %v2775_v32 }
 0x27e   : > { %v2776_v26 = vmul.f32 %v2710_v37, %v2710_v37 }
 0x27f   : > { %2845 = vst [vmem:[%s164_s29] sm:$0xff] %v2808_v47 }
 0x280   : > { %v2840_v23 = vadd.f32 %v2839_v57, %v2776_v26 }
 0x282   : > { %2846 = vst [vmem:[%s164_s29 + $0x8] sm:$0xff] %v2840_v23 }
 0x283 PF: > { %s12_s11 = sadd.s32 1, %s3405_s11   ;;  %s6566_s9 = smov %s3401_s10 }
 0x284   : > { %p9_p6 = scmp.ge.s32.totalorder %s12_s11, 4   ;;  %s6567_s10 = smov %s6569_s12 }
 0x286   :  { %11 = sbr.rel (!%p9_p6) target bundleno = 2 (0x2), region = 62 }

</bundles_post_ra>
